<compile_context>
chip_gen: v6e
topology: v6e:2x2x1
jax: 0.10.0
libtpu: 0.0.40
codegen_flags: <defaults>
</compile_context>

<pallas_src>
import jax
import jax.numpy as jnp
from jax import lax
from jax.experimental import pallas as pl
from jax.experimental.pallas import tpu as pltpu


def bottleneck_kernel(x_ref, w1_ref, b1_ref, w2_ref, b2_ref, w3_ref, b3_ref,
                      o_ref):
    NB, H, W, Cin = x_ref.shape
    P = w1_ref.shape[1]

    # ---- conv1 (1x1) + folded-BN bias + relu ------------------------------
    x2d = x_ref[...].astype(jnp.float32).reshape(NB * H * W, Cin)
    h1 = jnp.dot(x2d.astype(w1_ref.dtype), w1_ref[...],
                 preferred_element_type=jnp.float32)
    h1 = jnp.maximum(h1 + b1_ref[...], 0.0).reshape(NB, H, W, P)

    # ---- conv2 (3x3, stride 1, pad 1) + folded-BN bias + relu -------------
    # im2col via zero-padded shifts (no pltpu.roll, no iota masks):
    #   1) width shifts of h1, concatenated on lanes -> (NB,H,W,3P),
    #      channel order kw = -1, 0, +1,
    #   2) height shifts of that slab, concatenated on lanes -> (NB,H,W,9P),
    #      channel order kh = -1, 0, +1 (outer), matching the (kh,kw,cin,cout)
    #      weight reshape done wrapper-side.
    zcol = jnp.zeros((NB, H, 1, P), jnp.float32)
    wl = jnp.concatenate([zcol, h1[:, :, :W - 1, :]], axis=2)   # value at x-1
    wr = jnp.concatenate([h1[:, :, 1:, :], zcol], axis=2)       # value at x+1
    wcat = jnp.concatenate([wl, h1, wr], axis=-1)               # (NB,H,W,3P)

    zrow = jnp.zeros((NB, 1, W, 3 * P), jnp.float32)
    up = jnp.concatenate([zrow, wcat[:, :H - 1]], axis=1)       # value at y-1
    dn = jnp.concatenate([wcat[:, 1:], zrow], axis=1)           # value at y+1
    patch = jnp.concatenate([up, wcat, dn], axis=-1)            # (NB,H,W,9P)
    patch = patch.reshape(NB * H * W, 9 * P)

    h2 = jnp.dot(patch.astype(w2_ref.dtype), w2_ref[...],
                 preferred_element_type=jnp.float32)
    h2 = jnp.maximum(h2 + b2_ref[...], 0.0)

    # ---- conv3 (1x1) + folded-BN bias + residual + relu -------------------
    h3 = jnp.dot(h2.astype(w3_ref.dtype), w3_ref[...],
                 preferred_element_type=jnp.float32) + b3_ref[...]
    # Re-read the residual from VMEM (cheap vld) instead of keeping x2d live
    # across conv2's intermediates.
    res = x_ref[...].astype(jnp.float32).reshape(NB * H * W, Cin)
    out = jnp.maximum(h3 + res, 0.0)
    o_ref[...] = out.reshape(NB, H, W, Cin).astype(o_ref.dtype)


def bottleneck_pallas(x_nchw, params, eps=1e-5, block_n=None, use_bf16=False):
    (w1, g1, be1, m1, v1,
     w2, g2, be2, m2, v2,
     w3, g3, be3, m3, v3) = params

    def fold(g, b, m, v):
        s = g / jnp.sqrt(v + eps)
        return s, b - m * s

    s1, bb1 = fold(g1, be1, m1, v1)
    s2, bb2 = fold(g2, be2, m2, v2)
    s3, bb3 = fold(g3, be3, m3, v3)

    P = w1.shape[0]          # planes
    Cin = w1.shape[1]        # inplanes
    Cout = w3.shape[0]       # 4 * planes
    assert Cin == Cout, "downsample=None requires inplanes == 4*planes"

    # Fold BN scales into the conv weights (pure wrapper-side preprocessing).
    # use_bf16=True casts matmul operands to bf16 for production speed; the
    # default keeps f32 so the result matches the f32 reference tightly.
    wdt = jnp.bfloat16 if use_bf16 else jnp.float32
    w1m = (jnp.transpose(w1[:, :, 0, 0]) * s1[None, :]).astype(wdt)        # (Cin, P)
    w2m = ((jnp.transpose(w2, (2, 3, 1, 0)) * s2)                          # (kh,kw,in,out)
           .reshape(9 * P, P)).astype(wdt)                                 # (9P, P)
    w3m = (jnp.transpose(w3[:, :, 0, 0]) * s3[None, :]).astype(wdt)        # (P, Cout)
    b1 = bb1.reshape(1, P).astype(jnp.float32)
    b2 = bb2.reshape(1, P).astype(jnp.float32)
    b3 = bb3.reshape(1, Cout).astype(jnp.float32)

    x = jnp.transpose(x_nchw, (0, 2, 3, 1))      # NCHW -> NHWC (channels on lanes)
    N, H, W, _ = x.shape
    # NOTE: real ResNet stages have Cout >= 256 so the output lane dim is dense;
    # at toy channel counts (<128) stores are masked -- padding channels to 128
    # would inflate HBM traffic ~8x here, so it is intentionally not done.

    if block_n is None:
        # Fold as much of the batch into one block as fits a conservative VMEM
        # activation budget (x + out, h1/h2, the 9P im2col and its transient
        # 3P/9P concat inputs): fewer grid steps (~0.35us each) and a larger
        # matmul M dim.  For big images / batches this falls back to batch
        # tiling; the grid stays "parallel" for megacore / dual-TC sharding.
        per_img = H * W * (2 * Cin + 22 * P) * 4          # rough f32 bytes/img
        block_n = int(max(1, min(N, (10 * 1024 * 1024) // max(per_img, 1))))
        while N % block_n:
            block_n -= 1
    grid = (N // block_n,)

    flops = 2 * N * H * W * (Cin * P + 9 * P * P + P * Cout)
    bytes_accessed = (4 * (x.size + N * H * W * Cout)
                      + (w1m.size + w2m.size + w3m.size) * w1m.dtype.itemsize
                      + 4 * (b1.size + b2.size + b3.size))

    out_nhwc = pl.pallas_call(
        bottleneck_kernel,
        out_shape=jax.ShapeDtypeStruct((N, H, W, Cout), x.dtype),
        grid_spec=pltpu.PrefetchScalarGridSpec(
            num_scalar_prefetch=0,
            grid=grid,
            in_specs=[
                pl.BlockSpec((block_n, H, W, Cin), lambda n: (n, 0, 0, 0)),
                pl.BlockSpec((Cin, P), lambda n: (0, 0)),
                pl.BlockSpec((1, P), lambda n: (0, 0)),
                pl.BlockSpec((9 * P, P), lambda n: (0, 0)),
                pl.BlockSpec((1, P), lambda n: (0, 0)),
                pl.BlockSpec((P, Cout), lambda n: (0, 0)),
                pl.BlockSpec((1, Cout), lambda n: (0, 0)),
            ],
            out_specs=pl.BlockSpec((block_n, H, W, Cout),
                                   lambda n: (n, 0, 0, 0)),
        ),
        compiler_params=pltpu.CompilerParams(
            dimension_semantics=("parallel",),
            # 48 MiB scoped VMEM: above the default on all chips, but still
            # within v7x's 64 MiB/TC physical capacity.
            vmem_limit_bytes=48 * 1024 * 1024,
        ),
        cost_estimate=pl.CostEstimate(
            flops=int(flops), transcendentals=0,
            bytes_accessed=int(bytes_accessed)),
    )(x, w1m, b1, w2m, b2, w3m, b3)

    return jnp.transpose(out_nhwc, (0, 3, 1, 2))   # back to NCHW


# ------------------------- pure-JAX reference ------------------------------
def bottleneck_ref(x_nchw, params, eps=1e-5):
    (w1, g1, be1, m1, v1,
     w2, g2, be2, m2, v2,
     w3, g3, be3, m3, v3) = params

    def bn(y, g, b, m, v):
        c = lambda a: a[None, :, None, None]
        return (y - c(m)) / jnp.sqrt(c(v) + eps) * c(g) + c(b)

    dn = ('NCHW', 'OIHW', 'NCHW')
    out = lax.conv_general_dilated(x_nchw, w1, (1, 1), 'VALID', dimension_numbers=dn)
    out = jax.nn.relu(bn(out, g1, be1, m1, v1))
    out = lax.conv_general_dilated(out, w2, (1, 1), ((1, 1), (1, 1)), dimension_numbers=dn)
    out = jax.nn.relu(bn(out, g2, be2, m2, v2))
    out = lax.conv_general_dilated(out, w3, (1, 1), 'VALID', dimension_numbers=dn)
    out = bn(out, g3, be3, m3, v3)
    return jax.nn.relu(out + x_nchw)


if __name__ == "__main__":
    # Small shapes: planes=4, inplanes=4*planes=16, N=2, 16x16 spatial,
    # stride=1, downsample=None.
    inplanes, planes = 16, 4
    N, H, W = 2, 16, 16

    keys = jax.random.split(jax.random.PRNGKey(0), 20)
    f32 = jnp.float32
    x = jax.random.normal(keys[0], (N, inplanes, H, W), f32)

    def bn_params(k, c):
        k1, k2, k3, k4 = jax.random.split(k, 4)
        gamma = 1.0 + 0.1 * jax.random.normal(k1, (c,), f32)
        beta = 0.1 * jax.random.normal(k2, (c,), f32)
        mean = 0.1 * jax.random.normal(k3, (c,), f32)
        var = 0.5 + jax.random.uniform(k4, (c,), f32)
        return gamma, beta, mean, var

    w1 = 0.2 * jax.random.normal(keys[1], (planes, inplanes, 1, 1), f32)
    g1, be1, m1, v1 = bn_params(keys[2], planes)
    w2 = 0.2 * jax.random.normal(keys[3], (planes, planes, 3, 3), f32)
    g2, be2, m2, v2 = bn_params(keys[4], planes)
    w3 = 0.2 * jax.random.normal(keys[5], (planes * 4, planes, 1, 1), f32)
    g3, be3, m3, v3 = bn_params(keys[6], planes * 4)

    params = (w1, g1, be1, m1, v1,
              w2, g2, be2, m2, v2,
              w3, g3, be3, m3, v3)

    out = bottleneck_pallas(x, params)
    out = jax.block_until_ready(out)

    ref = jax.block_until_ready(bottleneck_ref(x, params))
    assert out.shape == (N, planes * 4, H, W)
    assert jnp.allclose(out, ref, rtol=1e-3, atol=1e-3), (
        float(jnp.max(jnp.abs(out - ref))))

    print("KERNEL_OK")
</pallas_src>

<mosaic_0001>
module attributes {stable_mosaic.version = 11 : i64} {
  func.func @bottleneck_kernel(%arg0: i32, %arg1: memref<2x16x16x16xf32, #tpu.memory_space<vmem>>, %arg2: memref<16x4xf32, #tpu.memory_space<vmem>>, %arg3: memref<1x4xf32, #tpu.memory_space<vmem>>, %arg4: memref<36x4xf32, #tpu.memory_space<vmem>>, %arg5: memref<1x4xf32, #tpu.memory_space<vmem>>, %arg6: memref<4x16xf32, #tpu.memory_space<vmem>>, %arg7: memref<1x16xf32, #tpu.memory_space<vmem>>, %arg8: memref<2x16x16x16xf32, #tpu.memory_space<vmem>>) attributes {dimension_semantics = [#tpu.dimension_semantics<parallel>], iteration_bounds = array<i64: 1>, scalar_prefetch = 0 : i64, scratch_operands = 0 : i64, tpu.core_type = #tpu.core_type<tc>, window_params = [{transform_indices = @transform_0, window_bounds = array<i64: 2, 16, 16, 16>}, {pipeline_mode = #tpu.pipeline_mode<synchronous>, transform_indices = @transform_1, window_bounds = array<i64: 16, 4>}, {pipeline_mode = #tpu.pipeline_mode<synchronous>, transform_indices = @transform_2, window_bounds = array<i64: 1, 4>}, {pipeline_mode = #tpu.pipeline_mode<synchronous>, transform_indices = @transform_3, window_bounds = array<i64: 36, 4>}, {pipeline_mode = #tpu.pipeline_mode<synchronous>, transform_indices = @transform_4, window_bounds = array<i64: 1, 4>}, {pipeline_mode = #tpu.pipeline_mode<synchronous>, transform_indices = @transform_5, window_bounds = array<i64: 4, 16>}, {pipeline_mode = #tpu.pipeline_mode<synchronous>, transform_indices = @transform_6, window_bounds = array<i64: 1, 16>}, {transform_indices = @transform_7, window_bounds = array<i64: 2, 16, 16, 16>}]} {
    %c0 = arith.constant 0 : index
    %c0_0 = arith.constant 0 : index
    %c0_1 = arith.constant 0 : index
    %c0_2 = arith.constant 0 : index
    %0 = vector.load %arg1[%c0, %c0_0, %c0_1, %c0_2] : memref<2x16x16x16xf32, #tpu.memory_space<vmem>>, vector<2x16x16x16xf32>
    %1 = vector.shape_cast %0 : vector<2x16x16x16xf32> to vector<512x16xf32>
    %c0_3 = arith.constant 0 : index
    %c0_4 = arith.constant 0 : index
    %2 = vector.load %arg2[%c0_3, %c0_4] : memref<16x4xf32, #tpu.memory_space<vmem>>, vector<16x4xf32>
    %cst = arith.constant dense<0.000000e+00> : vector<512x4xf32>
    %3 = tpu.matmul %1, %2, %cst {dimension_numbers = #tpu.dot_dimension_numbers<[1], [0], [0], [1], [0, 0, 1, 1], [], []>} : vector<512x16xf32>, vector<16x4xf32>, vector<512x4xf32> -> vector<512x4xf32>
    %c0_5 = arith.constant 0 : index
    %c0_6 = arith.constant 0 : index
    %4 = vector.load %arg3[%c0_5, %c0_6] : memref<1x4xf32, #tpu.memory_space<vmem>>, vector<1x4xf32>
    %5 = vector.broadcast %4 : vector<1x4xf32> to vector<512x4xf32>
    %6 = arith.addf %3, %5 : vector<512x4xf32>
    %cst_7 = arith.constant 0.000000e+00 : f32
    %7 = vector.broadcast %cst_7 : f32 to vector<512x4xf32>
    %8 = arith.maximumf %6, %7 : vector<512x4xf32>
    %9 = vector.shape_cast %8 : vector<512x4xf32> to vector<2x16x16x4xf32>
    %cst_8 = arith.constant 0.000000e+00 : f32
    %10 = vector.broadcast %cst_8 : f32 to vector<2x16x1x4xf32>
    %11 = vector.extract_strided_slice %9 {offsets = [0, 0, 0, 0], sizes = [2, 16, 15, 4], strides = [1, 1, 1, 1]} : vector<2x16x16x4xf32> to vector<2x16x15x4xf32>
    %12 = tpu.concatenate %10, %11 in 2 : vector<2x16x1x4xf32>, vector<2x16x15x4xf32> -> vector<2x16x16x4xf32>
    %13 = vector.extract_strided_slice %9 {offsets = [0, 0, 1, 0], sizes = [2, 16, 15, 4], strides = [1, 1, 1, 1]} : vector<2x16x16x4xf32> to vector<2x16x15x4xf32>
    %14 = tpu.concatenate %13, %10 in 2 : vector<2x16x15x4xf32>, vector<2x16x1x4xf32> -> vector<2x16x16x4xf32>
    %15 = tpu.concatenate %12, %9, %14 in 3 : vector<2x16x16x4xf32>, vector<2x16x16x4xf32>, vector<2x16x16x4xf32> -> vector<2x16x16x12xf32>
    %cst_9 = arith.constant 0.000000e+00 : f32
    %16 = vector.broadcast %cst_9 : f32 to vector<2x1x16x12xf32>
    %17 = vector.extract_strided_slice %15 {offsets = [0, 0, 0, 0], sizes = [2, 15, 16, 12], strides = [1, 1, 1, 1]} : vector<2x16x16x12xf32> to vector<2x15x16x12xf32>
    %18 = tpu.concatenate %16, %17 in 1 : vector<2x1x16x12xf32>, vector<2x15x16x12xf32> -> vector<2x16x16x12xf32>
    %19 = vector.extract_strided_slice %15 {offsets = [0, 1, 0, 0], sizes = [2, 15, 16, 12], strides = [1, 1, 1, 1]} : vector<2x16x16x12xf32> to vector<2x15x16x12xf32>
    %20 = tpu.concatenate %19, %16 in 1 : vector<2x15x16x12xf32>, vector<2x1x16x12xf32> -> vector<2x16x16x12xf32>
    %21 = tpu.concatenate %18, %15, %20 in 3 : vector<2x16x16x12xf32>, vector<2x16x16x12xf32>, vector<2x16x16x12xf32> -> vector<2x16x16x36xf32>
    %22 = vector.shape_cast %21 : vector<2x16x16x36xf32> to vector<512x36xf32>
    %c0_10 = arith.constant 0 : index
    %c0_11 = arith.constant 0 : index
    %23 = vector.load %arg4[%c0_10, %c0_11] : memref<36x4xf32, #tpu.memory_space<vmem>>, vector<36x4xf32>
    %cst_12 = arith.constant dense<0.000000e+00> : vector<512x4xf32>
    %24 = tpu.matmul %22, %23, %cst_12 {dimension_numbers = #tpu.dot_dimension_numbers<[1], [0], [0], [1], [0, 0, 1, 1], [], []>} : vector<512x36xf32>, vector<36x4xf32>, vector<512x4xf32> -> vector<512x4xf32>
    %c0_13 = arith.constant 0 : index
    %c0_14 = arith.constant 0 : index
    %25 = vector.load %arg5[%c0_13, %c0_14] : memref<1x4xf32, #tpu.memory_space<vmem>>, vector<1x4xf32>
    %26 = vector.broadcast %25 : vector<1x4xf32> to vector<512x4xf32>
    %27 = arith.addf %24, %26 : vector<512x4xf32>
    %cst_15 = arith.constant 0.000000e+00 : f32
    %28 = vector.broadcast %cst_15 : f32 to vector<512x4xf32>
    %29 = arith.maximumf %27, %28 : vector<512x4xf32>
    %c0_16 = arith.constant 0 : index
    %c0_17 = arith.constant 0 : index
    %30 = vector.load %arg6[%c0_16, %c0_17] : memref<4x16xf32, #tpu.memory_space<vmem>>, vector<4x16xf32>
    %cst_18 = arith.constant dense<0.000000e+00> : vector<512x16xf32>
    %31 = tpu.matmul %29, %30, %cst_18 {dimension_numbers = #tpu.dot_dimension_numbers<[1], [0], [0], [1], [0, 0, 1, 1], [], []>} : vector<512x4xf32>, vector<4x16xf32>, vector<512x16xf32> -> vector<512x16xf32>
    %c0_19 = arith.constant 0 : index
    %c0_20 = arith.constant 0 : index
    %32 = vector.load %arg7[%c0_19, %c0_20] : memref<1x16xf32, #tpu.memory_space<vmem>>, vector<1x16xf32>
    %33 = vector.broadcast %32 : vector<1x16xf32> to vector<512x16xf32>
    %34 = arith.addf %31, %33 : vector<512x16xf32>
    %c0_21 = arith.constant 0 : index
    %c0_22 = arith.constant 0 : index
    %c0_23 = arith.constant 0 : index
    %c0_24 = arith.constant 0 : index
    %35 = vector.load %arg1[%c0_21, %c0_22, %c0_23, %c0_24] : memref<2x16x16x16xf32, #tpu.memory_space<vmem>>, vector<2x16x16x16xf32>
    %36 = vector.shape_cast %35 : vector<2x16x16x16xf32> to vector<512x16xf32>
    %37 = arith.addf %34, %36 : vector<512x16xf32>
    %cst_25 = arith.constant 0.000000e+00 : f32
    %38 = vector.broadcast %cst_25 : f32 to vector<512x16xf32>
    %39 = arith.maximumf %37, %38 : vector<512x16xf32>
    %40 = vector.shape_cast %39 : vector<512x16xf32> to vector<2x16x16x16xf32>
    %c0_26 = arith.constant 0 : index
    %c0_27 = arith.constant 0 : index
    %c0_28 = arith.constant 0 : index
    %c0_29 = arith.constant 0 : index
    %41 = vector.load %arg8[%c0_26, %c0_27, %c0_28, %c0_29] : memref<2x16x16x16xf32, #tpu.memory_space<vmem>>, vector<2x16x16x16xf32>
    tpu.vector_store %arg8[%c0_26, %c0_27, %c0_28, %c0_29], %40 {strides = array<i32>} : memref<2x16x16x16xf32, #tpu.memory_space<vmem>>, vector<2x16x16x16xf32>,
    return
  }
  func.func @transform_0(%arg0: i32) -> (i32, i32, i32, i32) {
    %c0_i32 = arith.constant 0 : i32
    %c0_i32_0 = arith.constant 0 : i32
    %c0_i32_1 = arith.constant 0 : i32
    %c0_i32_2 = arith.constant 0 : i32
    return %arg0, %c0_i32, %c0_i32_0, %c0_i32_1 : i32, i32, i32, i32
  }
  func.func @transform_1(%arg0: i32) -> (i32, i32) {
    %c0_i32 = arith.constant 0 : i32
    %c0_i32_0 = arith.constant 0 : i32
    %c0_i32_1 = arith.constant 0 : i32
    return %c0_i32, %c0_i32_0 : i32, i32
  }
  func.func @transform_2(%arg0: i32) -> (i32, i32) {
    %c0_i32 = arith.constant 0 : i32
    %c0_i32_0 = arith.constant 0 : i32
    %c0_i32_1 = arith.constant 0 : i32
    return %c0_i32, %c0_i32_0 : i32, i32
  }
  func.func @transform_3(%arg0: i32) -> (i32, i32) {
    %c0_i32 = arith.constant 0 : i32
    %c0_i32_0 = arith.constant 0 : i32
    %c0_i32_1 = arith.constant 0 : i32
    return %c0_i32, %c0_i32_0 : i32, i32
  }
  func.func @transform_4(%arg0: i32) -> (i32, i32) {
    %c0_i32 = arith.constant 0 : i32
    %c0_i32_0 = arith.constant 0 : i32
    %c0_i32_1 = arith.constant 0 : i32
    return %c0_i32, %c0_i32_0 : i32, i32
  }
  func.func @transform_5(%arg0: i32) -> (i32, i32) {
    %c0_i32 = arith.constant 0 : i32
    %c0_i32_0 = arith.constant 0 : i32
    %c0_i32_1 = arith.constant 0 : i32
    return %c0_i32, %c0_i32_0 : i32, i32
  }
  func.func @transform_6(%arg0: i32) -> (i32, i32) {
    %c0_i32 = arith.constant 0 : i32
    %c0_i32_0 = arith.constant 0 : i32
    %c0_i32_1 = arith.constant 0 : i32
    return %c0_i32, %c0_i32_0 : i32, i32
  }
  func.func @transform_7(%arg0: i32) -> (i32, i32, i32, i32) {
    %c0_i32 = arith.constant 0 : i32
    %c0_i32_0 = arith.constant 0 : i32
    %c0_i32_1 = arith.constant 0 : i32
    %c0_i32_2 = arith.constant 0 : i32
    return %arg0, %c0_i32, %c0_i32_0, %c0_i32_1 : i32, i32, i32, i32
  }
}

</mosaic_0001>

<bundles_post_ra>
// kernel: tpu_custom_call.1
= control target key start
LH: loop header
LB: loop body
LE: loop exit
PB: predicated region body
PF: predicated region fallthrough
CT: control target
= control target key end

     0   :  { %12 = vsyncpa [#allocation3], 0  ;;  %s6988_s0 = inlined_call_operand.hbm [shape: f32[2,16,16,16], index: 0, kind: input, shape index: {}]   ;;  %s6989_s1 = inlined_call_operand.vmem [shape: f32[16,4], index: 1, kind: input, shape index: {}]   ;;  %s6990_s2 = inlined_call_operand.vmem [shape: f32[1,4], index: 2, kind: input, shape index: {}]   ;;  %s6991_s3 = inlined_call_operand.vmem [shape: f32[36,4], index: 3, kind: input, shape index: {}]   ;;  %s6992_s4 = inlined_call_operand.vmem [shape: f32[1,4], index: 4, kind: input, shape index: {}]   ;;  %s6993_s5 = inlined_call_operand.vmem [shape: f32[4,16], index: 5, kind: input, shape index: {}]   ;;  %s6994_s6 = inlined_call_operand.vmem [shape: f32[1,16], index: 6, kind: input, shape index: {}]   ;;  %s6995_s7 = inlined_call_operand.hbm [shape: f32[2,16,16,16], index: 7, kind: output, shape index: {}]  }
   0x1   :  { %13 = vsyncpa [#allocation4], 0  ;;  %s4567_s24 = smov [#allocation2]  }
   0x2   :  { %s19_s25 = sshll.u32 %s4567_s24, 4  ;;  %s20_s25 = int_to_ptr.vmem [resolvable:$true] %s19_s25 }
   0x3   :  { %s4531_s26 = scalar_lea.vmem %s20_s25, 8192  ;;  %p4536_p1 = scmp.lt.s32.totalorder %s20_s25, %s20_s25 }
   0x4   :  { %p4532_p0 = scmp.ne.s32.totalorder %s20_s25, %s4531_s26  ;;  %p4537_p2 = scmp.lt.s32.totalorder %s4531_s26, %s4531_s26 }
   0x6   :  { %p4538_p3 = por %p4537_p2, %p4536_p1 }
   0x8   :  { %p4539_p4 = pnand %p4538_p3, %p4532_p0 }
   0xa   :  { %4542 = shalt.err (!%p4539_p4)
}
   0xb   :  { %s4568_s27 = smov 128   ;;  %s4569_s28 = smov 8  }
   0xc   :  { %25 = dma.hbm_to_vmem [thread:$0]  %s6988_s0, 8192, %s20_s25, [#allocation3], %s4568_s27, %s4568_s27, %s4569_s28  }
   0xd   :  { %4563 = dma.done.wait [#allocation3], 8192  }
   0xe   :  { %4564 = vsyncadd [#allocation3], 4294959104  ;;  %v106_v0 = vld [vmem:[%s6989_s1 + $0x8] sm:$0xff]  ;;  %v105_v1 = vld [vmem:[%s6989_s1] sm:$0xff]  ;;  %vm114_vm0 = vcmask 130048   ;;  %s4570_s12 = smov 4  }
   0xf   :  { %4142 = vmatprep.subr.mxu0 %v106_v0  ;;  %4446 = vmatprep.subr.mxu1 %v106_v0  ;;  %v41_v2 = vld [vmem:[#allocation2] sm:$0xff]  ;;  %v42_v3 = vld [vmem:[#allocation2 + $0x8] sm:$0xff]  ;;  %v43_v5 = vld [vmem:[#allocation2 + $0x10] sm:$0xff]  ;;  %vm1013_vm1 = vcmask 1046528   ;;  %vm820_vm2 = vcmask 1040384   ;;  %vm1590_vm3 = vcmask 31744  }
  0x10   :  { %4143 = vmatpush3.msra.mxu0 %v106_v0  ;;  %4448 = vmatpush3.msra.mxu1 %v106_v0  ;;  %v73_v4 = vld [vmem:[#allocation2 + $0x100] sm:$0xff]  ;;  %v74_v6 = vld [vmem:[#allocation2 + $0x108] sm:$0xff]  ;;  %v75_v7 = vld [vmem:[#allocation2 + $0x110] sm:$0xff]  ;;  %vm1655_vm4 = vcmask 64512   ;;  %s4571_s13 = smov 12   ;;  %s4572_s14 = smov 24  }
  0x11   :  { %4144 = vmatprep.subr.mxu0 %v105_v1  ;;  %4447 = vmatprep.subr.mxu1 %v105_v1  ;;  %v44_v8 = vld [vmem:[#allocation2 + $0x18] sm:$0xff]  ;;  %v45_v9 = vld [vmem:[#allocation2 + $0x20] sm:$0xff]  ;;  %v46_v12 = vld [vmem:[#allocation2 + $0x28] sm:$0xff]  ;;  %vm2495_vm5 = vcmask 1043456   ;;  %vm2160_vm6 = vcmask 97280   ;;  %vm2302_vm7 = vcmask 293888  }
  0x12   :  { %4145 = vmatpush3.msra.mxu0 %v105_v1  ;;  %4146 = vmatprep.mubr.msk.f32.mxu0 %vm114_vm0, %v41_v2  ;;  %v76_v10 = vld [vmem:[#allocation2 + $0x118] sm:$0xff]  ;;  %v77_v11 = vld [vmem:[#allocation2 + $0x120] sm:$0xff]  ;;  %v47_v13 = vld [vmem:[#allocation2 + $0x30] sm:$0xff]  ;;  %vm2225_vm8 = vcmask 195584  }
  0x13   :  { %4449 = vmatpush3.msra.mxu1 %v105_v1  ;;  %4147 = vmatmul.mubr.msk.f32.vlgmr.msra.gmra.mxu0 %vm114_vm0, %v42_v3  ;;  %v78_v14 = vld [vmem:[#allocation2 + $0x128] sm:$0xff]  ;;  %v79_v15 = vld [vmem:[#allocation2 + $0x130] sm:$0xff]  ;;  %v48_v16 = vld [vmem:[#allocation2 + $0x38] sm:$0xff] }
  0x14   :  { %4194 = vmatprep.mubr.msk.f32.mxu1 %vm114_vm0, %v73_v4  ;;  %4149 = vmatprep.mubr.msk.f32.mxu0 %vm114_vm0, %v43_v5  ;;  %v49_v17 = vld [vmem:[#allocation2 + $0x40] sm:$0xff]  ;;  %v80_v18 = vld [vmem:[#allocation2 + $0x138] sm:$0xff]  ;;  %v50_v20 = vld [vmem:[#allocation2 + $0x48] sm:$0xff] }
  0x15   :  { %4195 = vmatmul.mubr.msk.f32.vlgmr.msra.gmra.mxu1 %vm114_vm0, %v74_v6  ;;  %v81_v19 = vld [vmem:[#allocation2 + $0x140] sm:$0xff]  ;;  %v51_v21 = vld [vmem:[#allocation2 + $0x50] sm:$0xff]  ;;  %v82_v22 = vld [vmem:[#allocation2 + $0x148] sm:$0xff] }
  0x16   :  { %4197 = vmatprep.mubr.msk.f32.mxu1 %vm114_vm0, %v75_v7  ;;  %v83_v23 = vld [vmem:[#allocation2 + $0x150] sm:$0xff]  ;;  %v52_v24 = vld [vmem:[#allocation2 + $0x58] sm:$0xff]  ;;  %v53_v25 = vld [vmem:[#allocation2 + $0x60] sm:$0xff] }
  0x17   :  { %4150 = vmatmul.mubr.msk.f32.gmra.mxu0 %vm114_vm0, %v44_v8  ;;  %v84_v26 = vld [vmem:[#allocation2 + $0x158] sm:$0xff]  ;;  %v85_v27 = vld [vmem:[#allocation2 + $0x160] sm:$0xff]  ;;  %v54_v28 = vld [vmem:[#allocation2 + $0x68] sm:$0xff] }
  0x18   :  { %4152 = vmatprep.mubr.msk.f32.mxu0 %vm114_vm0, %v45_v9  ;;  %v55_v29 = vld [vmem:[#allocation2 + $0x70] sm:$0xff]  ;;  %v86_v30 = vld [vmem:[#allocation2 + $0x168] sm:$0xff]  ;;  %v56_v32 = vld [vmem:[#allocation2 + $0x78] sm:$0xff] }
  0x19   :  { %4198 = vmatmul.mubr.msk.f32.gmra.mxu1 %vm114_vm0, %v76_v10  ;;  %v87_v31 = vld [vmem:[#allocation2 + $0x170] sm:$0xff]  ;;  %v57_v33 = vld [vmem:[#allocation2 + $0x80] sm:$0xff]  ;;  %v88_v34 = vld [vmem:[#allocation2 + $0x178] sm:$0xff] }
  0x1a   :  { %4200 = vmatprep.mubr.msk.f32.mxu1 %vm114_vm0, %v77_v11  ;;  %v89_v35 = vld [vmem:[#allocation2 + $0x180] sm:$0xff]  ;;  %v58_v36 = vld [vmem:[#allocation2 + $0x88] sm:$0xff]  ;;  %v59_v37 = vld [vmem:[#allocation2 + $0x90] sm:$0xff] }
  0x1b   :  { %4153 = vmatmul.mubr.msk.f32.gmra.mxu0 %vm114_vm0, %v46_v12  ;;  %v90_v38 = vld [vmem:[#allocation2 + $0x188] sm:$0xff]  ;;  %v91_v39 = vld [vmem:[#allocation2 + $0x190] sm:$0xff]  ;;  %v60_v40 = vld [vmem:[#allocation2 + $0x98] sm:$0xff] }
  0x1c   :  { %4155 = vmatprep.mubr.msk.f32.mxu0 %vm114_vm0, %v47_v13  ;;  %v61_v41 = vld [vmem:[#allocation2 + $0xa0] sm:$0xff]  ;;  %v92_v42 = vld [vmem:[#allocation2 + $0x198] sm:$0xff]  ;;  %v62_v44 = vld [vmem:[#allocation2 + $0xa8] sm:$0xff] }
  0x1d   :  { %4201 = vmatmul.mubr.msk.f32.gmra.mxu1 %vm114_vm0, %v78_v14  ;;  %v93_v43 = vld [vmem:[#allocation2 + $0x1a0] sm:$0xff]  ;;  %v63_v45 = vld [vmem:[#allocation2 + $0xb0] sm:$0xff]  ;;  %v94_v46 = vld [vmem:[#allocation2 + $0x1a8] sm:$0xff] }
  0x1e   :  { %4203 = vmatprep.mubr.msk.f32.mxu1 %vm114_vm0, %v79_v15  ;;  %v95_v47 = vld [vmem:[#allocation2 + $0x1b0] sm:$0xff]  ;;  %v64_v48 = vld [vmem:[#allocation2 + $0xb8] sm:$0xff]  ;;  %v65_v49 = vld [vmem:[#allocation2 + $0xc0] sm:$0xff] }
  0x1f   :  { %4156 = vmatmul.mubr.msk.f32.gmra.mxu0 %vm114_vm0, %v48_v16  ;;  %v96_v50 = vld [vmem:[#allocation2 + $0x1b8] sm:$0xff]  ;;  %v97_v51 = vld [vmem:[#allocation2 + $0x1c0] sm:$0xff]  ;;  %v66_v52 = vld [vmem:[#allocation2 + $0xc8] sm:$0xff] }
  0x20   :  { %4158 = vmatprep.mubr.msk.f32.mxu0 %vm114_vm0, %v49_v17  ;;  %v67_v53 = vld [vmem:[#allocation2 + $0xd0] sm:$0xff]  ;;  %v98_v54 = vld [vmem:[#allocation2 + $0x1c8] sm:$0xff]  ;;  %v68_v56 = vld [vmem:[#allocation2 + $0xd8] sm:$0xff] }
  0x21   :  { %4204 = vmatmul.mubr.msk.f32.gmra.mxu1 %vm114_vm0, %v80_v18  ;;  %v99_v55 = vld [vmem:[#allocation2 + $0x1d0] sm:$0xff]  ;;  %v69_v57 = vld [vmem:[#allocation2 + $0xe0] sm:$0xff]  ;;  %v100_v58 = vld [vmem:[#allocation2 + $0x1d8] sm:$0xff] }
  0x22   :  { %4206 = vmatprep.mubr.msk.f32.mxu1 %vm114_vm0, %v81_v19  ;;  %v101_v59 = vld [vmem:[#allocation2 + $0x1e0] sm:$0xff]  ;;  %v70_v60 = vld [vmem:[#allocation2 + $0xe8] sm:$0xff]  ;;  %v71_v61 = vld [vmem:[#allocation2 + $0xf0] sm:$0xff] }
  0x23   :  { %4159 = vmatmul.mubr.msk.f32.gmra.mxu0 %vm114_vm0, %v50_v20  ;;  %v102_v62 = vld [vmem:[#allocation2 + $0x1e8] sm:$0xff]  ;;  %v103_v63 = vld [vmem:[#allocation2 + $0x1f0] sm:$0xff]  ;;  %v72_v0 = vld [vmem:[#allocation2 + $0xf8] sm:$0xff] }
  0x24   :  { %4161 = vmatprep.mubr.msk.f32.mxu0 %vm114_vm0, %v51_v21  ;;  %v104_v1 = vld [vmem:[#allocation2 + $0x1f8] sm:$0xff]  ;;  %v4694_v2 = vld [vmem:[%s6990_s2] ss:$0 sm:$0xff] }
  0x25   :  { %4207 = vmatmul.mubr.msk.f32.gmra.mxu1 %vm114_vm0, %v82_v22 }
  0x26   :  { %4209 = vmatprep.mubr.msk.f32.mxu1 %vm114_vm0, %v83_v23 }
  0x27   :  { %4162 = vmatmul.mubr.msk.f32.gmra.mxu0 %vm114_vm0, %v52_v24 }
  0x28   :  { %4164 = vmatprep.mubr.msk.f32.mxu0 %vm114_vm0, %v53_v25 }
  0x29   :  { %4210 = vmatmul.mubr.msk.f32.gmra.mxu1 %vm114_vm0, %v84_v26 }
  0x2a   :  { %4212 = vmatprep.mubr.msk.f32.mxu1 %vm114_vm0, %v85_v27 }
  0x2b   :  { %4165 = vmatmul.mubr.msk.f32.gmra.mxu0 %vm114_vm0, %v54_v28 }
  0x2c   :  { %4167 = vmatprep.mubr.msk.f32.mxu0 %vm114_vm0, %v55_v29 }
  0x2d   :  { %4213 = vmatmul.mubr.msk.f32.gmra.mxu1 %vm114_vm0, %v86_v30 }
  0x2e   :  { %4215 = vmatprep.mubr.msk.f32.mxu1 %vm114_vm0, %v87_v31 }
  0x2f   :  { %4168 = vmatmul.mubr.msk.f32.gmra.mxu0 %vm114_vm0, %v56_v32 }
  0x30   :  { %4170 = vmatprep.mubr.msk.f32.mxu0 %vm114_vm0, %v57_v33 }
  0x31   :  { %4216 = vmatmul.mubr.msk.f32.gmra.mxu1 %vm114_vm0, %v88_v34 }
  0x32   :  { %4218 = vmatprep.mubr.msk.f32.mxu1 %vm114_vm0, %v89_v35 }
  0x33   :  { %4171 = vmatmul.mubr.msk.f32.gmra.mxu0 %vm114_vm0, %v58_v36 }
  0x34   :  { %4173 = vmatprep.mubr.msk.f32.mxu0 %vm114_vm0, %v59_v37 }
  0x35   :  { %4219 = vmatmul.mubr.msk.f32.gmra.mxu1 %vm114_vm0, %v90_v38 }
  0x36   :  { %4221 = vmatprep.mubr.msk.f32.mxu1 %vm114_vm0, %v91_v39 }
  0x37   :  { %4174 = vmatmul.mubr.msk.f32.gmra.mxu0 %vm114_vm0, %v60_v40 }
  0x38   :  { %4176 = vmatprep.mubr.msk.f32.mxu0 %vm114_vm0, %v61_v41 }
  0x39   :  { %4222 = vmatmul.mubr.msk.f32.gmra.mxu1 %vm114_vm0, %v92_v42 }
  0x3a   :  { %4224 = vmatprep.mubr.msk.f32.mxu1 %vm114_vm0, %v93_v43 }
  0x3b   :  { %4177 = vmatmul.mubr.msk.f32.gmra.mxu0 %vm114_vm0, %v62_v44 }
  0x3c   :  { %4179 = vmatprep.mubr.msk.f32.mxu0 %vm114_vm0, %v63_v45 }
  0x3d   :  { %4225 = vmatmul.mubr.msk.f32.gmra.mxu1 %vm114_vm0, %v94_v46 }
  0x3e   :  { %4227 = vmatprep.mubr.msk.f32.mxu1 %vm114_vm0, %v95_v47 }
  0x3f   :  { %4180 = vmatmul.mubr.msk.f32.gmra.mxu0 %vm114_vm0, %v64_v48 }
  0x40   :  { %4182 = vmatprep.mubr.msk.f32.mxu0 %vm114_vm0, %v65_v49 }
  0x41   :  { %4228 = vmatmul.mubr.msk.f32.gmra.mxu1 %vm114_vm0, %v96_v50 }
  0x42   :  { %4230 = vmatprep.mubr.msk.f32.mxu1 %vm114_vm0, %v97_v51 }
  0x43   :  { %4183 = vmatmul.mubr.msk.f32.gmra.mxu0 %vm114_vm0, %v66_v52 }
  0x44   :  { %4185 = vmatprep.mubr.msk.f32.mxu0 %vm114_vm0, %v67_v53 }
  0x45   :  { %4231 = vmatmul.mubr.msk.f32.gmra.mxu1 %vm114_vm0, %v98_v54 }
  0x46   :  { %4233 = vmatprep.mubr.msk.f32.mxu1 %vm114_vm0, %v99_v55 }
  0x47   :  { %4186 = vmatmul.mubr.msk.f32.gmra.mxu0 %vm114_vm0, %v68_v56 }
  0x48   :  { %4188 = vmatprep.mubr.msk.f32.mxu0 %vm114_vm0, %v69_v57 }
  0x49   :  { %4234 = vmatmul.mubr.msk.f32.gmra.mxu1 %vm114_vm0, %v100_v58 }
  0x4a   :  { %4236 = vmatprep.mubr.msk.f32.mxu1 %vm114_vm0, %v101_v59 }
  0x4b   :  { %4189 = vmatmul.mubr.msk.f32.gmra.mxu0 %vm114_vm0, %v70_v60 }
  0x4c   :  { %4191 = vmatprep.mubr.msk.f32.mxu0 %vm114_vm0, %v71_v61 }
  0x4d   :  { %4237 = vmatmul.mubr.msk.f32.gmra.mxu1 %vm114_vm0, %v102_v62 }
  0x4e   :  { %4239 = vmatprep.mubr.msk.f32.mxu1 %vm114_vm0, %v103_v63 }
  0x4f   :  { %4192 = vmatmul.mubr.msk.f32.gmra.mxu0 %vm114_vm0, %v72_v0 }
  0x51   :  { %4240 = vmatmul.mubr.msk.f32.gmra.mxu1 %vm114_vm0, %v104_v1 }
  0xd3   :  { %v4148_v3 = vpop.f32.mrf.mxu0 }
  0xd4   :  { %v379_v4 = vadd.f32 %v4148_v3, %v4694_v2 }
  0xd5   :  { %v4196_v5 = vpop.f32.mrf.mxu1  ;;  %v373_v6 = vpop.f32.mrf.mxu0 }
  0xd6   :  { %v4697_v7 = vmax.f32 %v379_v4, 0.0  ;;  %v539_v8 = vadd.f32 %v4196_v5, %v4694_v2  ;;  %v374_v9 = vadd.f32 %v4694_v2, %v373_v6 }
  0xd7   :  { %v533_v10 = vpop.f32.mrf.mxu1  ;;  %v4151_v17 = vpop.f32.mrf.mxu0 }
  0xd8   :  { %v4701_v11 = vmax.f32 %v539_v8, 0.0  ;;  %1176 = vrot.lane.b32.xlu0 %v4697_v7, %s4570_s12  ;;  %v1015_v13 = vrot.slane %v4697_v7, 1  ;;  %v4707_v15 = vmax.f32 %v374_v9, 0.0  ;;  %v534_v19 = vadd.f32 %v4694_v2, %v533_v10 }
  0xd9   :  { %v4199_v12 = vpop.f32.mrf.mxu1  ;;  %v383_v20 = vpop.f32.mrf.mxu0  ;;  %v389_v25 = vadd.f32 %v4151_v17, %v4694_v2  ;;  %v822_v59 = vrot.slane %v4697_v7, 7 }
  0xda   :  { %v549_v14 = vadd.f32 %v4199_v12, %v4694_v2  ;;  %v1142_v16 = vsel %vm1013_vm1, %v1015_v13, 0.0  ;;  %v1014_v21 = vrot.slane %v4707_v15, 1  ;;  %v4721_v22 = vmax.f32 %v534_v19, 0.0 }
  0xdb   :  { %1400 = vrot.lane.b32.xlu1 %v1142_v16, %s4569_s28  ;;  %v384_v23 = vadd.f32 %v4694_v2, %v383_v20  ;;  %v543_v24 = vpop.f32.mrf.mxu1  ;;  %v1063_v27 = vrot.slane %v4701_v11, 1  ;;  %v4733_v30 = vmax.f32 %v389_v25, 0.0  ;;  %v4154_v38 = vpop.f32.mrf.mxu0  ;;  %v7005_v56 = vrot.slane %v4707_v15, 7 }
  0xdc   :  { %v4710_v18 = vmax.f32 %v549_v14, 0.0  ;;  %1240 = vrot.lane.b32.xlu0 %v4701_v11, %s4570_s12  ;;  %7093 = vst [vmem:[#allocation8_spill] sm:$0xff] %v4721_v22  ;;  %v1016_v26 = vsel %vm1013_vm1, %v1014_v21, %v1015_v13  ;;  %v544_v28 = vadd.f32 %v4694_v2, %v543_v24  ;;  %v1062_v35 = vrot.slane %v4721_v22, 1 }
  0xdd   :  { %v4731_v29 = vmax.f32 %v384_v23, 0.0  ;;  %v1158_v31 = vsel %vm1013_vm1, %v1063_v27, 0.0  ;;  %v4202_v32 = vpop.f32.mrf.mxu1  ;;  %v1018_v34 = vrot.slane %v4733_v30, 1  ;;  %v399_v42 = vadd.f32 %v4154_v38, %v4694_v2  ;;  %v393_v44 = vpop.f32.mrf.mxu0 }
  0xde   :  { %v4739_v33 = vmax.f32 %v544_v28, 0.0  ;;  %v559_v36 = vadd.f32 %v4202_v32, %v4694_v2  ;;  %v1064_v39 = vsel %vm1013_vm1, %v1062_v35, %v1063_v27  ;;  %v1066_v40 = vrot.slane %v4710_v18, 1 }
  0xdf   :  { %1244 = vrot.lane.b32.xlu1 %v4710_v18, %s4570_s12  ;;  %v1143_v37 = vsel %vm1013_vm1, %v1018_v34, 0.0  ;;  %v553_v43 = vpop.f32.mrf.mxu1  ;;  %v1017_v46 = vrot.slane %v4731_v29, 1  ;;  %v4758_v47 = vmax.f32 %v399_v42, 0.0  ;;  %v394_v49 = vadd.f32 %v4694_v2, %v393_v44  ;;  %v4157_v53 = vpop.f32.mrf.mxu0 }
  0xe0   :  { %1174 = vrot.lane.b32.xlu0 %v4707_v15, %s4570_s12  ;;  %7094 = vst [vmem:[#allocation9_spill] sm:$0xff] %v4739_v33  ;;  %v4751_v41 = vmax.f32 %v559_v36, 0.0  ;;  %v1159_v45 = vsel %vm1013_vm1, %v1066_v40, 0.0  ;;  %v1065_v51 = vrot.slane %v4739_v33, 1  ;;  %v554_v55 = vadd.f32 %v4694_v2, %v553_v43 }
  0xe1   :  { %v4205_v48 = vpop.f32.mrf.mxu1  ;;  %v1019_v50 = vsel %vm1013_vm1, %v1017_v46, %v1018_v34  ;;  %v4770_v54 = vmax.f32 %v394_v49, 0.0  ;;  %v403_v60 = vpop.f32.mrf.mxu0  ;;  %v870_v62 = vrot.slane %v4701_v11, 7  ;;  %v7000_v0 = vrot.slane %v4721_v22, 7 }
  0xe2   :  { %v569_v52 = vadd.f32 %v4205_v48, %v4694_v2  ;;  %v1067_v57 = vsel %vm1013_vm1, %v1065_v51, %v1066_v40  ;;  %v4782_v63 = vmax.f32 %v554_v55, 0.0  ;;  %v1021_v1 = vrot.slane %v4758_v47, 1 }
  0xe3   :  { %1398 = vrot.lane.b32.xlu1 %v1016_v26, %s4569_s28  ;;  %v563_v61 = vpop.f32.mrf.mxu1  ;;  %v1020_v3 = vrot.slane %v4770_v54, 1  ;;  %v4790_v4 = vsel %vm820_vm2, %v7005_v56, %v822_v59  ;;  %v873_v5 = vrot.slane %v4710_v18, 7  ;;  %v6999_v6 = vrot.slane %v4739_v33, 7  ;;  %v4160_v18 = vpop.f32.mrf.mxu0 }
  0xe4   :  { %1238 = vrot.lane.b32.xlu0 %v4721_v22, %s4570_s12  ;;  %v4775_v58 = vmax.f32 %v569_v52, 0.0  ;;  %7095 = vst [vmem:[#allocation10_spill] sm:$0xff] %v4782_v63  ;;  %7096 = vst [vmem:[#allocation11_spill] sm:$0xff] %v4790_v4  ;;  %v404_v7 = vadd.f32 %v4694_v2, %v403_v60  ;;  %v409_v9 = vadd.f32 %v4157_v53, %v4694_v2  ;;  %v1144_v10 = vsel %vm1013_vm1, %v1021_v1, 0.0 }
  0xe5   :  { %v4208_v8 = vpop.f32.mrf.mxu1  ;;  %v1022_v11 = vsel %vm1013_vm1, %v1020_v3, %v1021_v1  ;;  %v1069_v12 = vrot.slane %v4751_v41, 1  ;;  %v4806_v13 = vsel %vm820_vm2, %v7000_v0, %v870_v62  ;;  %v4816_v17 = vsel %vm820_vm2, %v6999_v6, %v873_v5  ;;  %v413_v28 = vpop.f32.mrf.mxu0 }
  0xe6   :  { %v4808_v14 = vmax.f32 %v404_v7, 0.0  ;;  %v579_v16 = vadd.f32 %v4208_v8, %v4694_v2  ;;  %v825_v19 = vrot.slane %v4733_v30, 7  ;;  %v7004_v20 = vrot.slane %v4731_v29, 7 }
  0xe7   :  { %1178 = vrot.lane.b32.xlu1 %v4731_v29, %s4570_s12  ;;  %v699_v21 = vmax.f32 %v409_v9, 0.0  ;;  %v564_v23 = vadd.f32 %v4694_v2, %v563_v61  ;;  %v1160_v24 = vsel %vm1013_vm1, %v1069_v12, 0.0  ;;  %v876_v26 = vrot.slane %v4751_v41, 7  ;;  %v4163_v53 = vpop.f32.mrf.mxu0 }
  0xe8   :  { %1464 = vrot.lane.b32.xlu0 %v1158_v31, %s4569_s28  ;;  %v4822_v25 = vmax.f32 %v579_v16, 0.0  ;;  %v6998_v27 = vrot.slane %v4782_v63, 7  ;;  %v828_v31 = vrot.slane %v4758_v47, 7  ;;  %v7003_v32 = vrot.slane %v4770_v54, 7 }
  0xe9   :  { %v4834_v34 = vsel %vm820_vm2, %v7004_v20, %v825_v19  ;;  %v4836_v35 = vmax.f32 %v564_v23, 0.0  ;;  %v1068_v36 = vrot.slane %v4782_v63, 1  ;;  %v1024_v38 = vrot.slane %v699_v21, 1  ;;  %v423_v1 = vpop.f32.mrf.mxu0 }
  0xea   :  { %7097 = vst [vmem:[#allocation12_spill] sm:$0xff] %v4834_v34  ;;  %v4849_v43 = vsel %vm820_vm2, %v6998_v27, %v876_v26  ;;  %v4854_v44 = vsel %vm820_vm2, %v7003_v32, %v828_v31  ;;  %v831_v55 = vrot.slane %v699_v21, 7  ;;  %v882_v60 = vrot.slane %v4822_v25, 7 }
  0xeb   :  { %1242 = vrot.lane.b32.xlu1 %v4739_v33, %s4570_s12  ;;  %7098 = vst [vmem:[#allocation13_spill] sm:$0xff] %v4836_v35  ;;  %7099 = vst [vmem:[#allocation14_spill] sm:$0xff] %v4849_v43  ;;  %v6997_v46 = vrot.slane %v4836_v35, 7  ;;  %v1145_v8 = vsel %vm1013_vm1, %v1024_v38, 0.0  ;;  %v1072_v9 = vrot.slane %v4775_v58, 1  ;;  %v429_v16 = vadd.f32 %v4163_v53, %v4694_v2 }
  0xec   :  { %1180 = vrot.lane.b32.xlu0 %v4733_v30, %s4570_s12  ;;  %v573_v30 = vpop.f32.mrf.mxu1  ;;  %v1071_v31 = vrot.slane %v4836_v35, 1 }
  0xed   :  { %v574_v40 = vadd.f32 %v4694_v2, %v573_v30  ;;  %v1161_v19 = vsel %vm1013_vm1, %v1072_v9, 0.0  ;;  %v4166_v30 = vpop.f32.mrf.mxu0 }
  0xee   :  { %v4211_v42 = vpop.f32.mrf.mxu1 }
  0xef   :  { %1404 = vrot.lane.b32.xlu1 %v1143_v37, %s4569_s28  ;;  %v1023_v37 = vrot.slane %v4808_v14, 1  ;;  %v589_v51 = vadd.f32 %v4211_v42, %v4694_v2  ;;  %v1073_v42 = vsel %vm1013_vm1, %v1071_v31, %v1072_v9 }
  0xf0   :  { %1462 = vrot.lane.b32.xlu0 %v1064_v39, %s4569_s28  ;;  %v414_v39 = vadd.f32 %v4694_v2, %v413_v28  ;;  %v4882_v7 = vpop.f32.mrf.mxu1  ;;  %v4909_v28 = vmax.f32 %v429_v16, 0.0 }
  0xf1   :  { %v1025_v48 = vsel %vm1013_vm1, %v1023_v37, %v1024_v38  ;;  %v4875_v62 = vmax.f32 %v589_v51, 0.0  ;;  %v433_v37 = vpop.f32.mrf.mxu0 }
  0xf2   :  { %v4860_v49 = vmax.f32 %v414_v39, 0.0  ;;  %v1030_v39 = vrot.slane %v4909_v28, 1 }
  0xf3   :  { %1468 = vrot.lane.b32.xlu1 %v1159_v45, %s4569_s28  ;;  %v879_v45 = vrot.slane %v4775_v58, 7  ;;  %7102 = vst [vmem:[#allocation17_spill] sm:$0xff] %v4875_v62 }
  0xf4   :  { %1248 = vrot.lane.b32.xlu0 %v4751_v41, %s4570_s12  ;;  %v419_v41 = vadd.f32 %v4160_v18, %v4694_v2  ;;  %v1026_v3 = vrot.slane %v4860_v49, 1  ;;  %v4214_v18 = vpop.f32.mrf.mxu1  ;;  %v7001_v26 = vrot.slane %v4860_v49, 7 }
  0xf5   :  { %v4871_v59 = vsel %vm820_vm2, %v6997_v46, %v879_v45  ;;  %v599_v23 = vadd.f32 %v4214_v18, %v4694_v2  ;;  %v434_v45 = vadd.f32 %v4694_v2, %v433_v37 }
  0xf6   :  { %v701_v52 = vmax.f32 %v419_v41, 0.0  ;;  %7101 = vst [vmem:[#allocation16_spill] sm:$0xff] %v4871_v59 }
  0xf7   :  { %1184 = vrot.lane.b32.xlu1 %v4758_v47, %s4570_s12  ;;  %v1070_v47 = vsel %vm1013_vm1, %v1068_v36, %v1069_v12  ;;  %v4912_v36 = vmax.f32 %v599_v23, 0.0 }
  0xf8   :  { %1402 = vrot.lane.b32.xlu0 %v1019_v50, %s4569_s28  ;;  %v4864_v50 = vmax.f32 %v574_v40, 0.0  ;;  %v1027_v5 = vrot.slane %v701_v52, 1  ;;  %v4919_v40 = vpop.f32.mrf.mxu1 }
  0xf9   :  { %7104 = vst [vmem:[#allocation19_spill] sm:$0xff] %v4912_v36 }
  0xfa   :  { %7100 = vst [vmem:[#allocation15_spill] sm:$0xff] %v4864_v50  ;;  %v6996_v61 = vrot.slane %v4864_v50, 7  ;;  %v4217_v51 = vpop.f32.mrf.mxu1 }
  0xfb   :  { %1466 = vrot.lane.b32.xlu1 %v1067_v57, %s4569_s28  ;;  %v7002_v57 = vrot.slane %v4808_v14, 7  ;;  %v609_v53 = vadd.f32 %v4217_v51, %v4694_v2 }
  0xfc   :  { %1182 = vrot.lane.b32.xlu0 %v4770_v54, %s4570_s12  ;;  %v4898_v12 = vsel %vm820_vm2, %v6996_v61, %v882_v60  ;;  %v4169_v60 = vpop.f32.mrf.mxu0 }
  0xfd   :  { %7103 = vst [vmem:[#allocation18_spill] sm:$0xff] %v4898_v12 }
  0xfe   :  { %v443_v9 = vpop.f32.mrf.mxu0 }
  0xff   :  { %1246 = vrot.lane.b32.xlu1 %v4782_v63, %s4570_s12 }
 0x100   :  { %1252 = vrot.lane.b32.xlu0 %v4775_v58, %s4570_s12  ;;  %v1028_v58 = vsel %vm1013_vm1, %v1026_v3, %v1027_v5  ;;  %v1075_v3 = vrot.slane %v4822_v25, 1 }
 0x102   :  { %v1162_v18 = vsel %vm1013_vm1, %v1075_v3, 0.0 }
 0x103   :  { %1408 = vrot.lane.b32.xlu1 %v1144_v10, %s4569_s28  ;;  %v4889_v10 = vsel %vm820_vm2, %v7002_v57, %v831_v55 }
 0x104   :  { %1406 = vrot.lane.b32.xlu0 %v1022_v11, %s4569_s28  ;;  %v424_v11 = vadd.f32 %v4694_v2, %v423_v1  ;;  %v1146_v1 = vsel %vm1013_vm1, %v1027_v5, 0.0  ;;  %v449_v5 = vadd.f32 %v4169_v60, %v4694_v2 }
 0x106   :  { %v4968_v37 = vmax.f32 %v449_v5, 0.0 }
 0x107   :  { %1472 = vrot.lane.b32.xlu1 %v1160_v24, %s4569_s28  ;;  %v834_v24 = vrot.slane %v701_v52, 7 }
 0x108   :  { %1186 = vrot.lane.b32.xlu0 %v4808_v14, %s4570_s12 }
 0x109   :  { %v4924_v41 = vsel %vm820_vm2, %v7001_v26, %v834_v24  ;;  %v1074_v24 = vrot.slane %v4864_v50, 1 }
 0x10b   :  { %1188 = vrot.lane.b32.xlu1 %v699_v21, %s4570_s12  ;;  %v4903_v21 = vmax.f32 %v424_v11, 0.0 }
 0x10c   :  { %1256 = vrot.lane.b32.xlu0 %v4822_v25, %s4570_s12  ;;  %v444_v25 = vadd.f32 %v4694_v2, %v443_v9 }
 0x10d   :  { %v1029_v38 = vrot.slane %v4903_v21, 1 }
 0x10f   :  { %1470 = vrot.lane.b32.xlu1 %v1070_v47, %s4569_s28  ;;  %v439_v47 = vadd.f32 %v4166_v30, %v4694_v2  ;;  %v4962_v30 = vmax.f32 %v444_v25, 0.0  ;;  %v1078_v25 = vrot.slane %v4875_v62, 1 }
 0x110   :  { %1410 = vrot.lane.b32.xlu0 %v1025_v48, %s4569_s28  ;;  %v1031_v48 = vsel %vm1013_vm1, %v1029_v38, %v1030_v39  ;;  %v4172_v38 = vpop.f32.mrf.mxu0 }
 0x111   :  { %v4939_v55 = vmax.f32 %v439_v47, 0.0  ;;  %v1035_v51 = vrot.slane %v4962_v30, 1 }
 0x113   :  { %1250 = vrot.lane.b32.xlu1 %v4836_v35, %s4570_s12  ;;  %v1033_v16 = vrot.slane %v4939_v55, 1 }
 0x114   :  { %1190 = vrot.lane.b32.xlu0 %v4860_v49, %s4570_s12 }
 0x117   :  { %1412 = vrot.lane.b32.xlu1 %v1145_v8, %s4569_s28  ;;  %v4943_v8 = vmax.f32 %v609_v53, 0.0  ;;  %v7008_v53 = vrot.slane %v4968_v37, 1 }
 0x118   :  { %1260 = vrot.lane.b32.xlu0 %v4875_v62, %s4570_s12 }
 0x119   :  { %7105 = vst [vmem:[#allocation20_spill] sm:$0xff] %v4943_v8  ;;  %v1037_v9 = vsel %vm1013_vm1, %v1035_v51, %v7008_v53 }
 0x11b   :  { %1476 = vrot.lane.b32.xlu1 %v1161_v19, %s4569_s28 }
 0x11c   :  { %1414 = vrot.lane.b32.xlu0 %v1028_v58, %s4569_s28  ;;  %v4950_v58 = vpop.f32.mrf.mxu1 }
 0x11e   :  { %v4220_v23 = vpop.f32.mrf.mxu1 }
 0x11f   :  { %1192 = vrot.lane.b32.xlu1 %v701_v52, %s4570_s12  ;;  %v4933_v52 = vmax.f32 %v434_v45, 0.0  ;;  %v619_v31 = vadd.f32 %v4220_v23, %v4694_v2  ;;  %v1076_v45 = vsel %vm1013_vm1, %v1074_v24, %v1075_v3  ;;  %v459_v3 = vadd.f32 %v4172_v38, %v4694_v2 }
 0x120   :  { %1194 = vrot.lane.b32.xlu0 %v4903_v21, %s4570_s12  ;;  %v4980_v60 = vpop.f32.mrf.mxu1 }
 0x121   :  { %v1032_v11 = vrot.slane %v4933_v52, 1  ;;  %v4973_v47 = vmax.f32 %v619_v31, 0.0  ;;  %v5000_v23 = vmax.f32 %v459_v3, 0.0  ;;  %v1163_v31 = vsel %vm1013_vm1, %v1078_v25, 0.0 }
 0x123   :  { %1474 = vrot.lane.b32.xlu1 %v1073_v42, %s4569_s28  ;;  %v1034_v19 = vsel %vm1013_vm1, %v1032_v11, %v1033_v16  ;;  %v584_v42 = vadd.f32 %v4694_v2, %v4882_v7  ;;  %7106 = vst [vmem:[#allocation21_spill] sm:$0xff] %v4973_v47  ;;  %v4223_v11 = vpop.f32.mrf.mxu1  ;;  %7109 = vst [vmem:[#allocation24_spill] sm:$0xff] %v5000_v23 }
 0x124   :  { %1264 = vrot.lane.b32.xlu0 %v4912_v36, %s4570_s12 }
 0x127   :  { %1254 = vrot.lane.b32.xlu1 %v4864_v50, %s4570_s12 }
 0x128   :  { %1418 = vrot.lane.b32.xlu0 %v1031_v48, %s4569_s28  ;;  %v453_v48 = vpop.f32.mrf.mxu0 }
 0x129   :  { %v454_v7 = vadd.f32 %v4694_v2, %v453_v48  ;;  %v5010_v48 = vpop.f32.mrf.mxu1 }
 0x12a   :  { %v4175_v24 = vpop.f32.mrf.mxu0 }
 0x12b   :  { %1416 = vrot.lane.b32.xlu1 %v1146_v1, %s4569_s28  ;;  %v4982_v1 = vmax.f32 %v584_v42, 0.0  ;;  %v4995_v5 = vmax.f32 %v454_v7, 0.0  ;;  %v469_v3 = vadd.f32 %v4175_v24, %v4694_v2 }
 0x12c   :  { %1198 = vrot.lane.b32.xlu0 %v4933_v52, %s4570_s12 }
 0x12d   :  { %7107 = vst [vmem:[#allocation22_spill] sm:$0xff] %v4982_v1  ;;  %7108 = vst [vmem:[#allocation23_spill] sm:$0xff] %v4995_v5  ;;  %v1038_v42 = vrot.slane %v4995_v5, 1  ;;  %v1077_v51 = vrot.slane %v4982_v1, 1 }
 0x12f   :  { %1480 = vrot.lane.b32.xlu1 %v1162_v18, %s4569_s28  ;;  %v1147_v18 = vsel %vm1013_vm1, %v1030_v39, 0.0  ;;  %v463_v39 = vpop.f32.mrf.mxu0 }
 0x130   :  { %1268 = vrot.lane.b32.xlu0 %v4943_v8, %s4570_s12  ;;  %v464_v7 = vadd.f32 %v4694_v2, %v463_v39  ;;  %v5032_v39 = vmax.f32 %v469_v3, 0.0 }
 0x131   :  { %v4178_v46 = vpop.f32.mrf.mxu0 }
 0x132   :  { %v5027_v61 = vmax.f32 %v464_v7, 0.0  ;;  %7113 = vst [vmem:[#allocation28_spill] sm:$0xff] %v5032_v39  ;;  %v7007_v7 = vrot.slane %v5032_v39, 1  ;;  %v479_v0 = vadd.f32 %v4178_v46, %v4694_v2 }
 0x133   :  { %1196 = vrot.lane.b32.xlu1 %v4909_v28, %s4570_s12 }
 0x134   :  { %1422 = vrot.lane.b32.xlu0 %v1034_v19, %s4569_s28  ;;  %v629_v19 = vadd.f32 %v4223_v11, %v4694_v2  ;;  %v4226_v11 = vpop.f32.mrf.mxu1  ;;  %7112 = vst [vmem:[#allocation27_spill] sm:$0xff] %v5027_v61  ;;  %v5076_v46 = vmax.f32 %v479_v0, 0.0 }
 0x135   :  { %v639_v24 = vadd.f32 %v4226_v11, %v4694_v2 }
 0x136   :  { %v5003_v38 = vmax.f32 %v629_v19, 0.0  ;;  %v5048_v3 = vpop.f32.mrf.mxu1  ;;  %v7122_v59 = vrot.slane %v5076_v46, 1 }
 0x137   :  { %1478 = vrot.lane.b32.xlu1 %v1076_v45, %s4569_s28  ;;  %v7006_v45 = vrot.slane %v5000_v23, 1  ;;  %v5040_v6 = vmax.f32 %v639_v24, 0.0 }
 0x138   :  { %1202 = vrot.lane.b32.xlu0 %v4962_v30, %s4570_s12  ;;  %7110 = vst [vmem:[#allocation25_spill] sm:$0xff] %v5003_v38  ;;  %v4229_v57 = vpop.f32.mrf.mxu1 }
 0x139   :  { %7116 = vst [vmem:[#allocation31_spill] sm:$0xff] %v5040_v6 }
 0x13b   :  { %1258 = vrot.lane.b32.xlu1 %v4982_v1, %s4570_s12 }
 0x13c   :  { %1272 = vrot.lane.b32.xlu0 %v4973_v47, %s4570_s12 }
 0x13f   :  { %1420 = vrot.lane.b32.xlu1 %v1147_v18, %s4569_s28  ;;  %v594_v18 = vadd.f32 %v4694_v2, %v4919_v40 }
 0x140   :  { %1426 = vrot.lane.b32.xlu0 %v1037_v9, %s4569_s28  ;;  %v1040_v9 = vsel %vm1013_vm1, %v1038_v42, %v7006_v45 }
 0x141   :  { %v5034_v42 = vmax.f32 %v594_v18, 0.0  ;;  %v1148_v18 = vsel %vm1013_vm1, %v1033_v16, 0.0 }
 0x143   :  { %1484 = vrot.lane.b32.xlu1 %v1163_v31, %s4569_s28  ;;  %v1079_v31 = vsel %vm1013_vm1, %v1077_v51, %v1078_v25  ;;  %7114 = vst [vmem:[#allocation29_spill] sm:$0xff] %v5034_v42  ;;  %v473_v25 = vpop.f32.mrf.mxu0  ;;  %v1041_v51 = vrot.slane %v5027_v61, 1 }
 0x144   :  { %1206 = vrot.lane.b32.xlu0 %v4995_v5, %s4570_s12  ;;  %v474_v24 = vadd.f32 %v4694_v2, %v473_v25  ;;  %v649_v25 = vadd.f32 %v4229_v57, %v4694_v2 }
 0x145   :  { %v1043_v26 = vsel %vm1013_vm1, %v1041_v51, %v7007_v7  ;;  %v1080_v7 = vrot.slane %v5034_v42, 1 }
 0x146   :  { %v5071_v56 = vmax.f32 %v474_v24, 0.0  ;;  %v5083_v53 = vmax.f32 %v649_v25, 0.0  ;;  %v5091_v24 = vpop.f32.mrf.mxu1 }
 0x147   :  { %1200 = vrot.lane.b32.xlu1 %v4939_v55, %s4570_s12 }
 0x148   :  { %1276 = vrot.lane.b32.xlu0 %v5003_v38, %s4570_s12  ;;  %7118 = vst [vmem:[#allocation33_spill] sm:$0xff] %v5071_v56  ;;  %7119 = vst [vmem:[#allocation34_spill] sm:$0xff] %v5083_v53  ;;  %v1044_v57 = vrot.slane %v5071_v56, 1 }
 0x14a   :  { %v5024_v19 = vpop.permute.xlu0 %1176 }
 0x14b   :  { %7111 = vst [vmem:[#allocation26_spill] sm:$0xff] %v5024_v19  ;;  %1482 = vrot.lane.b32.xlu1 %v1079_v31, %s4569_s28  ;;  %v1081_v31 = vrot.slane %v4912_v36, 1 }
 0x14c   :  { %1430 = vrot.lane.b32.xlu0 %v1040_v9, %s4569_s28 }
 0x14d   :  { %v5036_v27 = vpop.permute.xlu1 %1400  ;;  %v1164_v16 = vsel %vm1013_vm1, %v1081_v31, 0.0  ;;  %v1082_v62 = vsel %vm1013_vm1, %v1080_v7, %v1081_v31 }
 0x14e   :  { %7115 = vst [vmem:[#allocation30_spill] sm:$0xff] %v5036_v27  ;;  %v5038_v40 = vpop.permute.xlu0 %1240 }
 0x14f   :  { %1262 = vrot.lane.b32.xlu1 %v5034_v42, %s4570_s12  ;;  %v1046_v42 = vsel %vm1013_vm1, %v1044_v57, %v7122_v59 }
 0x150   :  { %1210 = vrot.lane.b32.xlu0 %v5027_v61, %s4570_s12 }
 0x151   :  { %v5050_v9 = vpop.permute.xlu1 %1244 }
 0x152   :  { %v5052_v11 = vpop.permute.xlu0 %1174 }
 0x153   :  { %1424 = vrot.lane.b32.xlu1 %v1148_v18, %s4569_s28  ;;  %v4181_v18 = vpop.f32.mrf.mxu0 }
 0x154   :  { %1280 = vrot.lane.b32.xlu0 %v5040_v6, %s4570_s12  ;;  %v489_v0 = vadd.f32 %v4181_v18, %v4694_v2 }
 0x155   :  { %v5066_v32 = vpop.permute.xlu1 %1398 }
 0x156   :  { %v5068_v20 = vpop.permute.xlu0 %1238  ;;  %v5120_v18 = vmax.f32 %v489_v0, 0.0 }
 0x157   :  { %7117 = vst [vmem:[#allocation32_spill] sm:$0xff] %v5068_v20  ;;  %1488 = vrot.lane.b32.xlu1 %v1164_v16, %s4569_s28  ;;  %v604_v16 = vadd.f32 %v4694_v2, %v4950_v58  ;;  %v4232_v58 = vpop.f32.mrf.mxu1 }
 0x158   :  { %1434 = vrot.lane.b32.xlu0 %v1043_v26, %s4569_s28  ;;  %v483_v26 = vpop.f32.mrf.mxu0  ;;  %v659_v31 = vadd.f32 %v4232_v58, %v4694_v2 }
 0x159   :  { %v5078_v45 = vpop.permute.xlu1 %1178  ;;  %v484_v12 = vadd.f32 %v4694_v2, %v483_v26  ;;  %v5108_v1 = vmax.f32 %v604_v16, 0.0  ;;  %v7128_v16 = vrot.slane %v4968_v37, 1 }
 0x15a   :  { %v5080_v51 = vpop.permute.xlu0 %1464  ;;  %v4184_v43 = vpop.f32.mrf.mxu0  ;;  %v5130_v63 = vmax.f32 %v659_v31, 0.0 }
 0x15b   :  { %1204 = vrot.lane.b32.xlu1 %v4968_v37, %s4570_s12  ;;  %7123 = vst [vmem:[#allocation37_spill] sm:$0xff] %v5108_v1  ;;  %v1149_v35 = vsel %vm1013_vm1, %v7128_v16, 0.0  ;;  %v1083_v34 = vrot.slane %v5108_v1, 1 }
 0x15c   :  { %1214 = vrot.lane.b32.xlu0 %v5071_v56, %s4570_s12  ;;  %v493_v59 = vpop.f32.mrf.mxu0  ;;  %7129 = vst [vmem:[#allocation42_spill] sm:$0xff] %v5130_v63 }
 0x15d   :  { %v5095_v36 = vpop.permute.xlu1 %1242  ;;  %v494_v0 = vadd.f32 %v4694_v2, %v493_v59 }
 0x15e   :  { %7120 = vst [vmem:[#allocation35_spill] sm:$0xff] %v5095_v36  ;;  %v5097_v25 = vpop.permute.xlu0 %1180  ;;  %v4187_v36 = vpop.f32.mrf.mxu0 }
 0x15f   :  { %7121 = vst [vmem:[#allocation36_spill] sm:$0xff] %v5097_v25  ;;  %1486 = vrot.lane.b32.xlu1 %v1082_v62, %s4569_s28  ;;  %v5114_v62 = vmax.f32 %v484_v12, 0.0  ;;  %v1084_v12 = vrot.slane %v4943_v8, 1 }
 0x160   :  { %1284 = vrot.lane.b32.xlu0 %v5083_v53, %s4570_s12  ;;  %v503_v8 = vpop.f32.mrf.mxu0 }
 0x161   :  { %v5110_v50 = vpop.permute.xlu1 %1404  ;;  %7126 = vst [vmem:[#allocation40_spill] sm:$0xff] %v5114_v62  ;;  %v1047_v58 = vrot.slane %v5114_v62, 1  ;;  %v1165_v31 = vsel %vm1013_vm1, %v1084_v12, 0.0 }
 0x162   :  { %7124 = vst [vmem:[#allocation38_spill] sm:$0xff] %v5110_v50  ;;  %v5112_v7 = vpop.permute.xlu0 %1462 }
 0x163   :  { %7125 = vst [vmem:[#allocation39_spill] sm:$0xff] %v5112_v7  ;;  %1266 = vrot.lane.b32.xlu1 %v5108_v1, %s4570_s12  ;;  %v1085_v7 = vsel %vm1013_vm1, %v1083_v34, %v1084_v12 }
 0x164   :  { %1438 = vrot.lane.b32.xlu0 %v1046_v42, %s4569_s28  ;;  %v499_v42 = vadd.f32 %v4184_v43, %v4694_v2  ;;  %v5149_v43 = vmax.f32 %v494_v0, 0.0  ;;  %v504_v0 = vadd.f32 %v4694_v2, %v503_v8 }
 0x165   :  { %v5122_v26 = vpop.permute.xlu1 %1468 }
 0x166   :  { %v5124_v57 = vpop.permute.xlu0 %1248  ;;  %7130 = vst [vmem:[#allocation43_spill] sm:$0xff] %v5149_v43  ;;  %v5178_v8 = vmax.f32 %v504_v0, 0.0 }
 0x167   :  { %7127 = vst [vmem:[#allocation41_spill] sm:$0xff] %v5124_v57  ;;  %1428 = vrot.lane.b32.xlu1 %v1149_v35, %s4569_s28  ;;  %v7019_v57 = vrot.slane %v5120_v18, 1  ;;  %v5147_v35 = vmax.f32 %v499_v42, 0.0  ;;  %v509_v42 = vadd.f32 %v4187_v36, %v4694_v2 }
 0x168   :  { %1218 = vrot.lane.b32.xlu0 %v5114_v62, %s4570_s12  ;;  %7134 = vst [vmem:[#allocation47_spill] sm:$0xff] %v5178_v8  ;;  %v1053_v12 = vrot.slane %v5178_v8, 1 }
 0x169   :  { %v5139_v33 = vpop.permute.xlu1 %1184  ;;  %v1049_v59 = vsel %vm1013_vm1, %v1047_v58, %v7019_v57  ;;  %v7021_v58 = vrot.slane %v5147_v35, 1  ;;  %v4190_v57 = vpop.f32.mrf.mxu0  ;;  %v5176_v36 = vmax.f32 %v509_v42, 0.0 }
 0x16a   :  { %v5141_v16 = vpop.permute.xlu0 %1402  ;;  %v519_v34 = vadd.f32 %v4190_v57, %v4694_v2 }
 0x16b   :  { %1492 = vrot.lane.b32.xlu1 %v1165_v31, %s4569_s28  ;;  %v1050_v31 = vrot.slane %v5149_v43, 1  ;;  %v7026_v42 = vrot.slane %v5176_v36, 1 }
 0x16c   :  { %1288 = vrot.lane.b32.xlu0 %v5130_v63, %s4570_s12  ;;  %v5209_v57 = vmax.f32 %v519_v34, 0.0 }
 0x16d   :  { %v5154_v62 = vpop.permute.xlu1 %1466 }
 0x16e   :  { %7131 = vst [vmem:[#allocation44_spill] sm:$0xff] %v5154_v62  ;;  %v5156_v50 = vpop.permute.xlu0 %1182  ;;  %v614_v62 = vadd.f32 %v4694_v2, %v4980_v60  ;;  %v513_v60 = vpop.f32.mrf.mxu0 }
 0x16f   :  { %1208 = vrot.lane.b32.xlu1 %v5000_v23, %s4570_s12 }
 0x170   :  { %1442 = vrot.lane.b32.xlu0 %v1049_v59, %s4569_s28  ;;  %v1052_v59 = vsel %vm1013_vm1, %v1050_v31, %v7021_v58  ;;  %v5183_v20 = vmax.f32 %v614_v62, 0.0  ;;  %v5200_v31 = vpop.f32.mrf.mxu1  ;;  %v7137_v58 = vrot.slane %v5000_v23, 1  ;;  %v4193_v22 = vpop.f32.mrf.mxu0 }
 0x171   :  { %v5168_v25 = vpop.permute.xlu1 %1246 }
 0x172   :  { %7132 = vst [vmem:[#allocation45_spill] sm:$0xff] %v5168_v25  ;;  %v5170_v1 = vpop.permute.xlu0 %1252  ;;  %7135 = vst [vmem:[#allocation48_spill] sm:$0xff] %v5183_v20  ;;  %v4235_v27 = vpop.f32.mrf.mxu1  ;;  %v1086_v19 = vrot.slane %v5183_v20, 1 }
 0x173   :  { %7133 = vst [vmem:[#allocation46_spill] sm:$0xff] %v5170_v1  ;;  %1490 = vrot.lane.b32.xlu1 %v1085_v7, %s4569_s28  ;;  %v514_v7 = vadd.f32 %v4694_v2, %v513_v60 }
 0x174   :  { %1222 = vrot.lane.b32.xlu0 %v5149_v43, %s4570_s12  ;;  %v1150_v43 = vsel %vm1013_vm1, %v7137_v58, 0.0 }
 0x175   :  { %v5185_v25 = vpop.permute.xlu1 %1408  ;;  %v5211_v60 = vmax.f32 %v514_v7, 0.0  ;;  %v7032_v7 = vrot.slane %v5209_v57, 1 }
 0x176   :  { %v5187_v1 = vpop.permute.xlu0 %1406 }
 0x177   :  { %1270 = vrot.lane.b32.xlu1 %v5183_v20, %s4570_s12  ;;  %7138 = vst [vmem:[#allocation50_spill] sm:$0xff] %v5211_v60  ;;  %v1056_v34 = vrot.slane %v5211_v60, 1 }
 0x178   :  { %1446 = vrot.lane.b32.xlu0 %v1052_v59, %s4569_s28  ;;  %v1087_v59 = vrot.slane %v4973_v47, 1 }
 0x179   :  { %v5196_v0 = vpop.permute.xlu1 %1472 }
 0x17a   :  { %7136 = vst [vmem:[#allocation49_spill] sm:$0xff] %v5196_v0  ;;  %v5198_v62 = vpop.permute.xlu0 %1186  ;;  %v1055_v0 = vsel %vm1013_vm1, %v1053_v12, %v7026_v42  ;;  %v1166_v47 = vsel %vm1013_vm1, %v1087_v59, 0.0  ;;  %v1088_v20 = vsel %vm1013_vm1, %v1086_v19, %v1087_v59 }
 0x17b   :  { %1432 = vrot.lane.b32.xlu1 %v1150_v43, %s4569_s28  ;;  %v523_v43 = vpop.f32.mrf.mxu0 }
 0x17c   :  { %1226 = vrot.lane.b32.xlu0 %v5178_v8, %s4570_s12  ;;  %v5225_v8 = vpop.f32.mrf.mxu1 }
 0x17d   :  { %v5216_v4 = vpop.permute.xlu1 %1188 }
 0x17e   :  { %v5218_v58 = vpop.permute.xlu0 %1256 }
 0x17f   :  { %7139 = vst [vmem:[#allocation51_spill] sm:$0xff] %v5218_v58  ;;  %1496 = vrot.lane.b32.xlu1 %v1166_v47, %s4569_s28  ;;  %v524_v47 = vadd.f32 %v4694_v2, %v523_v43  ;;  %v4238_v58 = vpop.f32.mrf.mxu1  ;;  %v669_v43 = vadd.f32 %v4235_v27, %v4694_v2  ;;  %v529_v27 = vadd.f32 %v4193_v22, %v4694_v2 }
 0x180   :  { %1450 = vrot.lane.b32.xlu0 %v1055_v0, %s4569_s28  ;;  %v1058_v0 = vsel %vm1013_vm1, %v1056_v34, %v7032_v7 }
 0x181   :  { %v5227_v12 = vpop.permute.xlu1 %1470  ;;  %v5247_v5 = vmax.f32 %v524_v47, 0.0  ;;  %v7148_v47 = vrot.slane %v5032_v39, 1 }
 0x182   :  { %7140 = vst [vmem:[#allocation52_spill] sm:$0xff] %v5227_v12  ;;  %v5229_v42 = vpop.permute.xlu0 %1410  ;;  %v624_v12 = vadd.f32 %v4694_v2, %v5010_v48 }
 0x183   :  { %1212 = vrot.lane.b32.xlu1 %v5032_v39, %s4570_s12  ;;  %7142 = vst [vmem:[#allocation54_spill] sm:$0xff] %v5247_v5 }
 0x184   :  { %1230 = vrot.lane.b32.xlu0 %v5211_v60, %s4570_s12  ;;  %v5252_v60 = vpop.f32.mrf.mxu1  ;;  %v5254_v34 = vmax.f32 %v624_v12, 0.0 }
 0x185   :  { %v5242_v56 = vpop.permute.xlu1 %1250  ;;  %7143 = vst [vmem:[#allocation55_spill] sm:$0xff] %v5252_v60 }
 0x186   :  { %7141 = vst [vmem:[#allocation53_spill] sm:$0xff] %v5242_v56  ;;  %v5244_v61 = vpop.permute.xlu0 %1190  ;;  %7144 = vst [vmem:[#allocation56_spill] sm:$0xff] %v5254_v34  ;;  %v5260_v56 = vmax.f32 %v669_v43, 0.0  ;;  %v4241_v19 = vpop.f32.mrf.mxu1  ;;  %v1090_v43 = vrot.slane %v5003_v38, 1  ;;  %v1089_v38 = vrot.slane %v5254_v34, 1 }
 0x187   :  { %1494 = vrot.lane.b32.xlu1 %v1088_v20, %s4569_s28  ;;  %v679_v20 = vadd.f32 %v4238_v58, %v4694_v2  ;;  %v689_v22 = vadd.f32 %v4241_v19, %v4694_v2  ;;  %v5282_v58 = vmax.f32 %v529_v27, 0.0 }
 0x188   :  { %1454 = vrot.lane.b32.xlu0 %v1058_v0, %s4569_s28  ;;  %7146 = vst [vmem:[#allocation58_spill] sm:$0xff] %v5260_v56  ;;  %v1151_v0 = vsel %vm1013_vm1, %v7148_v47, 0.0  ;;  %v1167_v39 = vsel %vm1013_vm1, %v1090_v43, 0.0 }
 0x189   :  { %v5256_v7 = vpop.permute.xlu1 %1412  ;;  %v5289_v47 = vmax.f32 %v689_v22, 0.0 }
 0x18a   :  { %v5258_v48 = vpop.permute.xlu0 %1260 }
 0x18b   :  { %7145 = vst [vmem:[#allocation57_spill] sm:$0xff] %v5258_v48  ;;  %1274 = vrot.lane.b32.xlu1 %v5254_v34, %s4570_s12  ;;  %v5276_v48 = vmax.f32 %v679_v20, 0.0  ;;  %7150 = vst [vmem:[#allocation61_spill] sm:$0xff] %v5289_v47  ;;  %v7041_v20 = vrot.slane %v5282_v58, 1  ;;  %v7042_v22 = vrot.slane %v5289_v47, 1  ;;  %v1091_v34 = vsel %vm1013_vm1, %v1089_v38, %v1090_v43 }
 0x18c   :  { %1234 = vrot.lane.b32.xlu0 %v5247_v5, %s4570_s12  ;;  %v1624_v38 = vsel %vm1590_vm3, %v4806_v13, %v5038_v40  ;;  %v7154_v43 = vrot.slane %v5076_v46, 1  ;;  %v7155_v13 = vrot.slane %v4707_v15, 7  ;;  %v1626_v15 = vsel %vm1590_vm3, %v4816_v17, %v5050_v9 }
 0x18d   :  { %v5268_v59 = vpop.permute.xlu1 %1476  ;;  %7149 = vst [vmem:[#allocation60_spill] sm:$0xff] %v5276_v48 }
 0x18e   :  { %7147 = vst [vmem:[#allocation59_spill] sm:$0xff] %v5268_v59  ;;  %v5270_v12 = vpop.permute.xlu0 %1414  ;;  %v981_v40 = vsel %vm820_vm2, 0.0, %v7155_v13 }
 0x18f   :  { %1436 = vrot.lane.b32.xlu1 %v1151_v0, %s4569_s28  ;;  %v1059_v0 = vrot.slane %v5247_v5, 1  ;;  %v634_v5 = vadd.f32 %v4694_v2, %v5048_v3 }
 0x190   :  { %1292 = vrot.lane.b32.xlu0 %v5260_v56, %s4570_s12 }
 0x191   :  { %v5284_v59 = vpop.permute.xlu1 %1192 }
 0x192   :  { %v5286_v23 = vpop.permute.xlu0 %1194 }
 0x193   :  { %1500 = vrot.lane.b32.xlu1 %v1167_v39, %s4569_s28  ;;  %v1061_v39 = vsel %vm1013_vm1, %v1059_v0, %v7041_v20  ;;  %v5321_v0 = vmax.f32 %v634_v5, 0.0  ;;  %v5339_v5 = vsel %vm1655_vm4, %v1624_v38, %v5080_v51  ;;  %v1591_v51 = vsel %vm1590_vm3, %v981_v40, %v5052_v11 }
 0x194   :  { %1296 = vrot.lane.b32.xlu0 %v5276_v48, %s4570_s12  ;;  %v1173_v48 = vsel %vm1013_vm1, %v7042_v22, 0.0  ;;  %7153 = vst [vmem:[#allocation64_spill] sm:$0xff] %v5339_v5 }
 0x195   :  { %v5296_v19 = vpop.permute.xlu1 %1474  ;;  %v1092_v40 = vrot.slane %v5321_v0, 1 }
 0x196   :  { %7151 = vst [vmem:[#allocation62_spill] sm:$0xff] %v5296_v19  ;;  %v5298_v27 = vpop.permute.xlu0 %1264 }
 0x197   :  { %7152 = vst [vmem:[#allocation63_spill] sm:$0xff] %v5298_v27  ;;  %1216 = vrot.lane.b32.xlu1 %v5076_v46, %s4570_s12 }
 0x198   :  { %1300 = vrot.lane.b32.xlu0 %v5289_v47, %s4570_s12 }
 0x199   :  { %v5311_v19 = vpop.permute.xlu1 %1254 }
 0x19a   :  { %v5313_v27 = vpop.permute.xlu0 %1418 }
 0x19b   :  { %1498 = vrot.lane.b32.xlu1 %v1091_v34, %s4569_s28 }
 0x19c   :  { %1458 = vrot.lane.b32.xlu0 %v1061_v39, %s4569_s28  ;;  %v1152_v39 = vsel %vm1013_vm1, %v7154_v43, 0.0  ;;  %v5359_v43 = vsel %vm1655_vm4, %v1591_v51, %v5066_v32  ;;  %v5375_v32 = vsel %vm1655_vm4, %v1626_v15, %v5122_v26  ;;  %v7157_v51 = vrot.slane %v4731_v29, 7 }
 0x19d   :  { %v5323_v20 = vpop.permute.xlu1 %1416  ;;  %7156 = vst [vmem:[#allocation65_spill] sm:$0xff] %v5375_v32 }
 0x19e   :  { %v5325_v60 = vpop.permute.xlu0 %1198  ;;  %v982_v17 = vsel %vm820_vm2, 0.0, %v7157_v51 }
 0x19f   :  { %1278 = vrot.lane.b32.xlu1 %v5321_v0, %s4570_s12  ;;  %v1593_v9 = vsel %vm1590_vm3, %v982_v17, %v5078_v45 }
 0x1a0   :  { %1524 = vrot.lane.b32.xlu0 %v1173_v48, %s4569_s28  ;;  %v1093_v48 = vrot.slane %v5040_v6, 1  ;;  %v5394_v15 = vsel %vm1655_vm4, %v1593_v9, %v5141_v16 }
 0x1a1   :  { %v5333_v3 = vpop.permute.xlu1 %1480 }
 0x1a2   :  { %v5335_v34 = vpop.permute.xlu0 %1268  ;;  %v1094_v6 = vsel %vm1013_vm1, %v1092_v40, %v1093_v48  ;;  %v1096_v40 = vrot.slane %v5083_v53, 1 }
 0x1a3   :  { %1440 = vrot.lane.b32.xlu1 %v1152_v39, %s4569_s28  ;;  %v1168_v39 = vsel %vm1013_vm1, %v1093_v48, 0.0 }
 0x1a4   :  { %1850 = vrot.lane.b32.xlu0 %v5339_v5, %s4571_s13 }
 0x1a5   :  { %v5353_v38 = vpop.permute.xlu1 %1196 }
 0x1a6   :  { %v5355_v22 = vpop.permute.xlu0 %1422 }
 0x1a7   :  { %1504 = vrot.lane.b32.xlu1 %v1168_v39, %s4569_s28  ;;  %v644_v39 = vadd.f32 %v4694_v2, %v5091_v24  ;;  %v1596_v2 = vsel %vm1590_vm3, %v4854_v44, %v5139_v33  ;;  %v7160_v33 = vrot.slane %v5120_v18, 1 }
 0x1a8   :  { %1784 = vrot.lane.b32.xlu0 %v5359_v43, %s4571_s13  ;;  %v5411_v16 = vsel %vm1655_vm4, %v1596_v2, %v5185_v25  ;;  %v7161_v25 = vrot.slane %v4770_v54, 7 }
 0x1a9   :  { %v5368_v11 = vpop.permute.xlu1 %1478  ;;  %v5400_v29 = vmax.f32 %v644_v39, 0.0  ;;  %7159 = vst [vmem:[#allocation67_spill] sm:$0xff] %v5411_v16  ;;  %v1153_v44 = vsel %vm1013_vm1, %v7160_v33, 0.0  ;;  %v1169_v33 = vsel %vm1013_vm1, %v1096_v40, 0.0 }
 0x1aa   :  { %v5370_v13 = vpop.permute.xlu0 %1202  ;;  %v983_v51 = vsel %vm820_vm2, 0.0, %v7161_v25 }
 0x1ab   :  { %1220 = vrot.lane.b32.xlu1 %v5120_v18, %s4570_s12  ;;  %v1595_v17 = vsel %vm1590_vm3, %v983_v51, %v5156_v50  ;;  %v1095_v50 = vrot.slane %v5400_v29, 1  ;;  %v1598_v51 = vsel %vm1590_vm3, %v4889_v10, %v5216_v4  ;;  %v7167_v10 = vrot.slane %v4808_v14, 7 }
 0x1ac   :  { %2041 = vrot.lane.b32.xlu0 %v5375_v32, %s4572_s14  ;;  %v5439_v2 = vsel %vm1655_vm4, %v1595_v17, %v5187_v1  ;;  %v5457_v1 = vld [vmem:[%s6990_s2] ss:$0 sm:$0xff]  ;;  %v5470_v53 = vsel %vm1655_vm4, %v1598_v51, %v5256_v7  ;;  %v7168_v51 = vrot.slane %v5147_v35, 1  ;;  %v1600_v14 = vsel %vm1590_vm3, %v4924_v41, %v5284_v59 }
 0x1ad   :  { %v5388_v5 = vpop.permute.xlu1 %1258  ;;  %7163 = vst [vmem:[#allocation69_spill] sm:$0xff] %v5439_v2  ;;  %v654_v25 = vadd.f32 %v5457_v1, %v5200_v31  ;;  %7164 = vst [vmem:[#allocation70_spill] sm:$0xff] %v5470_v53  ;;  %v984_v7 = vsel %vm820_vm2, 0.0, %v7167_v10  ;;  %v837_v59 = vrot.slane %v4909_v28, 7 }
 0x1ae   :  { %v5390_v26 = vpop.permute.xlu0 %1272 }
 0x1af   :  { %7158 = vst [vmem:[#allocation66_spill] sm:$0xff] %v5390_v26  ;;  %1502 = vrot.lane.b32.xlu1 %v1094_v6, %s4569_s28  ;;  %v5476_v31 = vmax.f32 %v654_v25, 0.0 }
 0x1b0   :  { %1977 = vrot.lane.b32.xlu0 %v5394_v15, %s4572_s14 }
 0x1b1   :  { %v5405_v45 = vpop.permute.xlu1 %1420  ;;  %7165 = vst [vmem:[#allocation71_spill] sm:$0xff] %v5476_v31  ;;  %v1098_v41 = vrot.slane %v5476_v31, 1 }
 0x1b2   :  { %v5407_v24 = vpop.permute.xlu0 %1426 }
 0x1b3   :  { %1282 = vrot.lane.b32.xlu1 %v5400_v29, %s4570_s12 }
 0x1b4   :  { %1983 = vrot.lane.b32.xlu0 %v5411_v16, %s4572_s14 }
 0x1b5   :  { %v5417_v6 = vpop.permute.xlu1 %1484 }
 0x1b6   :  { %v5419_v48 = vpop.permute.xlu0 %1206 }
 0x1b7   :  { %1444 = vrot.lane.b32.xlu1 %v1153_v44, %s4569_s28 }
 0x1b8   :  { %1794 = vrot.lane.b32.xlu0 %v5411_v16, %s4571_s13 }
 0x1b9   :  { %v5433_v9 = vpop.permute.xlu1 %1200 }
 0x1ba   :  { %v5435_v39 = vpop.permute.xlu0 %1276 }
 0x1bb   :  { %7162 = vst [vmem:[#allocation68_spill] sm:$0xff] %v5435_v39  ;;  %1508 = vrot.lane.b32.xlu1 %v1169_v33, %s4569_s28  ;;  %v1097_v39 = vsel %vm1013_vm1, %v1095_v50, %v1096_v40  ;;  %v1597_v40 = vsel %vm1590_vm3, %v984_v7, %v5198_v62 }
 0x1bc   :  { %1981 = vrot.lane.b32.xlu0 %v5439_v2, %s4572_s14  ;;  %v5497_v25 = vsel %vm1655_vm4, %v1597_v40, %v5229_v42  ;;  %v5515_v42 = vsel %vm1655_vm4, %v1600_v14, %v5323_v20  ;;  %v836_v20 = vrot.slane %v4903_v21, 7 }
 0x1bd   :  { %v5445_v54 = vpop.permute.xlu1 %1482  ;;  %7169 = vst [vmem:[#allocation73_spill] sm:$0xff] %v5515_v42 }
 0x1be   :  { %v5447_v44 = vpop.permute.xlu0 %1430 }
 0x1bf   :  { %1224 = vrot.lane.b32.xlu1 %v5147_v35, %s4570_s12 }
 0x1c0   :  { %1792 = vrot.lane.b32.xlu0 %v5439_v2, %s4571_s13  ;;  %v7187_v2 = vld [vmem:[#allocation60_spill] sm:$0xff] }
 0x1c1   :  { %v5464_v17 = vpop.permute.xlu1 %1262 }
 0x1c2   :  { %v5466_v33 = vpop.permute.xlu0 %1210 }
 0x1c3   :  { %1506 = vrot.lane.b32.xlu1 %v1097_v39, %s4569_s28 }
 0x1c4   :  { %1987 = vrot.lane.b32.xlu0 %v5470_v53, %s4572_s14 }
 0x1c5   :  { %v5478_v16 = vpop.permute.xlu1 %1424 }
 0x1c6   :  { %v5480_v4 = vpop.permute.xlu0 %1280 }
 0x1c7   :  { %7166 = vst [vmem:[#allocation72_spill] sm:$0xff] %v5480_v4  ;;  %1286 = vrot.lane.b32.xlu1 %v5476_v31, %s4570_s12  ;;  %v1154_v4 = vsel %vm1013_vm1, %v7168_v51, 0.0  ;;  %v7171_v51 = vrot.slane %v4860_v49, 7  ;;  %v838_v49 = vsel %vm820_vm2, %v836_v20, %v837_v59  ;;  %v986_v59 = vsel %vm820_vm2, 0.0, %v836_v20 }
 0x1c8   :  { %1798 = vrot.lane.b32.xlu0 %v5470_v53, %s4571_s13  ;;  %v1099_v53 = vrot.slane %v5130_v63, 1 }
 0x1c9   :  { %v5491_v39 = vpop.permute.xlu1 %1488  ;;  %v985_v14 = vsel %vm820_vm2, 0.0, %v7171_v51 }
 0x1ca   :  { %v5493_v50 = vpop.permute.xlu0 %1434  ;;  %v1170_v7 = vsel %vm1013_vm1, %v1099_v53, 0.0 }
 0x1cb   :  { %1448 = vrot.lane.b32.xlu1 %v1154_v4, %s4569_s28 }
 0x1cc   :  { %1796 = vrot.lane.b32.xlu0 %v5497_v25, %s4571_s13 }
 0x1cd   :  { %v5509_v62 = vpop.permute.xlu1 %1204 }
 0x1ce   :  { %v5511_v10 = vpop.permute.xlu0 %1214 }
 0x1cf   :  { %1512 = vrot.lane.b32.xlu1 %v1170_v7, %s4569_s28  ;;  %v1599_v7 = vsel %vm1590_vm3, %v985_v14, %v5244_v61  ;;  %v1602_v61 = vsel %vm1590_vm3, %v838_v49, %v5353_v38  ;;  %v840_v38 = vrot.slane %v4939_v55, 7  ;;  %v1601_v14 = vsel %vm1590_vm3, %v986_v59, %v5286_v23 }
 0x1d0   :  { %1991 = vrot.lane.b32.xlu0 %v5515_v42, %s4572_s14  ;;  %v5543_v31 = vsel %vm1655_vm4, %v1599_v7, %v5270_v12  ;;  %v5556_v51 = vsel %vm1655_vm4, %v1602_v61, %v5405_v45  ;;  %v7173_v12 = vrot.slane %v5176_v36, 1  ;;  %v839_v45 = vrot.slane %v4933_v52, 7 }
 0x1d1   :  { %v5521_v4 = vpop.permute.xlu1 %1486  ;;  %7172 = vst [vmem:[#allocation75_spill] sm:$0xff] %v5556_v51  ;;  %v5581_v61 = vsel %vm1655_vm4, %v1601_v14, %v5313_v27  ;;  %v664_v27 = vadd.f32 %v5457_v1, %v5225_v8 }
 0x1d2   :  { %v5523_v40 = vpop.permute.xlu0 %1284  ;;  %7175 = vst [vmem:[#allocation77_spill] sm:$0xff] %v5581_v61  ;;  %v841_v52 = vsel %vm820_vm2, %v839_v45, %v840_v38 }
 0x1d3   :  { %7170 = vst [vmem:[#allocation74_spill] sm:$0xff] %v5523_v40  ;;  %1228 = vrot.lane.b32.xlu1 %v5176_v36, %s4570_s12  ;;  %v1604_v55 = vsel %vm1590_vm3, %v841_v52, %v5433_v9  ;;  %v5610_v14 = vmax.f32 %v664_v27, 0.0  ;;  %v987_v52 = vsel %vm820_vm2, 0.0, %v839_v45 }
 0x1d4   :  { %1802 = vrot.lane.b32.xlu0 %v5515_v42, %s4571_s13  ;;  %v1100_v42 = vsel %vm1013_vm1, %v1098_v41, %v1099_v53  ;;  %v1155_v53 = vsel %vm1013_vm1, %v7173_v12, 0.0  ;;  %v7176_v12 = vrot.slane %v5209_v57, 1  ;;  %v5600_v59 = vsel %vm1655_vm4, %v1604_v55, %v5478_v16 }
 0x1d5   :  { %v5537_v63 = vpop.permute.xlu1 %1266  ;;  %7177 = vst [vmem:[#allocation78_spill] sm:$0xff] %v5600_v59  ;;  %7178 = vst [vmem:[#allocation79_spill] sm:$0xff] %v5610_v14  ;;  %v843_v16 = vrot.slane %v4968_v37, 7  ;;  %v1603_v55 = vsel %vm1590_vm3, %v987_v52, %v5325_v60  ;;  %v7182_v52 = vld [vmem:[#allocation55_spill] sm:$0xff] }
 0x1d6   :  { %v5539_v40 = vpop.permute.xlu0 %1438 }
 0x1d7   :  { %1510 = vrot.lane.b32.xlu1 %v1100_v42, %s4569_s28 }
 0x1d8   :  { %1800 = vrot.lane.b32.xlu0 %v5543_v31, %s4571_s13 }
 0x1d9   :  { %v1429_v21 = vpop.permute.xlu1 %1428 }
 0x1da   :  { %v5552_v28 = vpop.permute.xlu0 %1218 }
 0x1db   :  { %1452 = vrot.lane.b32.xlu1 %v1155_v53, %s4569_s28  ;;  %v1156_v53 = vsel %vm1013_vm1, %v7176_v12, 0.0  ;;  %v7179_v12 = vrot.slane %v5282_v58, 1 }
 0x1dc   :  { %1995 = vrot.lane.b32.xlu0 %v5556_v51, %s4572_s14 }
 0x1dd   :  { %v5564_v42 = vpop.permute.xlu1 %1492  ;;  %v1157_v8 = vsel %vm1013_vm1, %v7179_v12, 0.0  ;;  %v1101_v12 = vrot.slane %v5610_v14, 1 }
 0x1de   :  { %v5566_v41 = vpop.permute.xlu0 %1288 }
 0x1df   :  { %7174 = vst [vmem:[#allocation76_spill] sm:$0xff] %v5566_v41  ;;  %1232 = vrot.lane.b32.xlu1 %v5209_v57, %s4570_s12 }
 0x1e0   :  { %1806 = vrot.lane.b32.xlu0 %v5556_v51, %s4571_s13  ;;  %v1102_v51 = vrot.slane %v5260_v56, 1  ;;  %v674_v56 = vadd.f32 %v5457_v1, %v7182_v52 }
 0x1e1   :  { %v1209_v7 = vpop.permute.xlu1 %1208 }
 0x1e2   :  { %v5577_v49 = vpop.permute.xlu0 %1442 }
 0x1e3   :  { %1456 = vrot.lane.b32.xlu1 %v1156_v53, %s4569_s28  ;;  %v842_v53 = vrot.slane %v4962_v30, 7 }
 0x1e4   :  { %1804 = vrot.lane.b32.xlu0 %v5581_v61, %s4571_s13 }
 0x1e5   :  { %v5592_v23 = vpop.permute.xlu1 %1490  ;;  %v844_v30 = vsel %vm820_vm2, %v842_v53, %v843_v16 }
 0x1e6   :  { %v5594_v20 = vpop.permute.xlu0 %1222  ;;  %v1606_v37 = vsel %vm1590_vm3, %v844_v30, %v5509_v62  ;;  %v5653_v62 = vmax.f32 %v674_v56, 0.0  ;;  %v1171_v30 = vsel %vm1013_vm1, %v1102_v51, 0.0 }
 0x1e7   :  { %1236 = vrot.lane.b32.xlu1 %v5282_v58, %s4570_s12 }
 0x1e8   :  { %1999 = vrot.lane.b32.xlu0 %v5600_v59, %s4572_s14  ;;  %7184 = vst [vmem:[#allocation82_spill] sm:$0xff] %v5653_v62 }
 0x1e9   :  { %v5606_v38 = vpop.permute.xlu1 %1270 }
 0x1ea   :  { %v5608_v9 = vpop.permute.xlu0 %1446 }
 0x1eb   :  { %1460 = vrot.lane.b32.xlu1 %v1157_v8, %s4569_s28  ;;  %v5629_v8 = vsel %vm1655_vm4, %v1603_v55, %v5355_v22  ;;  %v5645_v22 = vsel %vm1655_vm4, %v1606_v37, %v1429_v21  ;;  %v1103_v55 = vsel %vm1013_vm1, %v1101_v12, %v1102_v51  ;;  %v7185_v21 = vld [vmem:[#allocation24_spill] sm:$0xff]  ;;  %v7186_v12 = vld [vmem:[#allocation23_spill] sm:$0xff]  ;;  %v1105_v51 = vrot.slane %v7187_v2, 1 }
 0x1ec   :  { %1810 = vrot.lane.b32.xlu0 %v5600_v59, %s4571_s13  ;;  %7180 = vst [vmem:[#allocation80_spill] sm:$0xff] %v5629_v8  ;;  %7183 = vst [vmem:[#allocation55_spill] sm:$0xff] %v5645_v22  ;;  %v846_v37 = vrot.slane %v7185_v21, 7  ;;  %v845_v52 = vrot.slane %v7186_v12, 7 }
 0x1ed   :  { %v1433_v27 = vpop.permute.xlu1 %1432 }
 0x1ee   :  { %v5623_v41 = vpop.permute.xlu0 %1226 }
 0x1ef   :  { %1290 = vrot.lane.b32.xlu1 %v5610_v14, %s4570_s12 }
 0x1f0   :  { %1808 = vrot.lane.b32.xlu0 %v5629_v8, %s4571_s13 }
 0x1f1   :  { %v5638_v60 = vpop.permute.xlu1 %1496 }
 0x1f2   :  { %7181 = vst [vmem:[#allocation81_spill] sm:$0xff] %v5638_v60  ;;  %v5640_v45 = vpop.permute.xlu0 %1450 }
 0x1f3   :  { %1514 = vrot.lane.b32.xlu1 %v1103_v55, %s4569_s28  ;;  %v988_v55 = vsel %vm820_vm2, 0.0, %v842_v53 }
 0x1f4   :  { %2003 = vrot.lane.b32.xlu0 %v5645_v22, %s4572_s14  ;;  %v1605_v14 = vsel %vm1590_vm3, %v988_v55, %v5370_v13  ;;  %v847_v13 = vsel %vm820_vm2, %v845_v52, %v846_v37  ;;  %v683_v55 = vpop.f32.mrf.mxu1 }
 0x1f5   :  { %v1213_v16 = vpop.permute.xlu1 %1212  ;;  %v1608_v53 = vsel %vm1590_vm3, %v847_v13, %v1209_v7  ;;  %v1172_v7 = vsel %vm1013_vm1, %v1105_v51, 0.0 }
 0x1f6   :  { %v5651_v59 = vpop.permute.xlu0 %1230  ;;  %v5685_v2 = vsel %vm1655_vm4, %v1608_v53, %v1433_v27  ;;  %v2294_v27 = vld [vmem:[%s6991_s3 + $0x20] sm:$0xf]  ;;  %v7192_v53 = vld [vmem:[#allocation27_spill] sm:$0xff] }
 0x1f7   :  { %1516 = vrot.lane.b32.xlu1 %v1171_v30, %s4569_s28  ;;  %v1104_v30 = vrot.slane %v5653_v62, 1  ;;  %7189 = vst [vmem:[#allocation23_spill] sm:$0xff] %v5685_v2  ;;  %4242 = vmatprep.subr.msk.mxu1 %vm2495_vm5, %v2294_v27 }
 0x1f8   :  { %1814 = vrot.lane.b32.xlu0 %v5645_v22, %s4571_s13  ;;  %v5672_v22 = vsel %vm1655_vm4, %v1605_v14, %v5407_v24  ;;  %v684_v14 = vadd.f32 %v5457_v1, %v683_v55  ;;  %v989_v1 = vsel %vm820_vm2, 0.0, %v845_v52  ;;  %4243 = vmatpush3.msk.msra.mxu1 %vm2495_vm5, %v2294_v27  ;;  %v2293_v52 = vld [vmem:[%s6991_s3 + $0x18] sm:$0xff] }
 0x1f9   :  { %v5664_v60 = vpop.permute.xlu1 %1494  ;;  %7188 = vst [vmem:[#allocation24_spill] sm:$0xff] %v5672_v22  ;;  %v1106_v24 = vsel %vm1013_vm1, %v1104_v30, %v1105_v51  ;;  %v7191_v30 = vld [vmem:[#allocation28_spill] sm:$0xff]  ;;  %v1607_v51 = vsel %vm1590_vm3, %v989_v1, %v5419_v48  ;;  %v2292_v48 = vld [vmem:[%s6991_s3 + $0x10] sm:$0xff]  ;;  %4244 = vmatprep.subr.mxu1 %v2293_v52 }
 0x1fa   :  { %v5666_v56 = vpop.permute.xlu0 %1454  ;;  %v849_v13 = vrot.slane %v7191_v30, 7  ;;  %v5705_v55 = vmax.f32 %v684_v14, 0.0  ;;  %v5716_v30 = vsel %vm1655_vm4, %v1607_v51, %v5447_v44  ;;  %4245 = vmatpush3.msra.mxu1 %v2293_v52  ;;  %v7199_v52 = vrot.slane %v5289_v47, 1 }
 0x1fb   :  { %1294 = vrot.lane.b32.xlu1 %v5653_v62, %s4570_s12  ;;  %7196 = vst [vmem:[#allocation85_spill] sm:$0xff] %v5716_v30  ;;  %4246 = vmatprep.subr.mxu1 %v2292_v48 }
 0x1fc   :  { %1812 = vrot.lane.b32.xlu0 %v5672_v22, %s4571_s13  ;;  %7193 = vst [vmem:[#allocation28_spill] sm:$0xff] %v5705_v55  ;;  %v1107_v1 = vrot.slane %v5705_v55, 1  ;;  %4247 = vmatpush3.msra.mxu1 %v2292_v48  ;;  %v7200_v48 = vld [vmem:[#allocation33_spill] sm:$0xff] }
 0x1fd   :  { %v5680_v21 = vpop.permute.xlu1 %1274 }
 0x1fe   :  { %v5682_v12 = vpop.permute.xlu0 %1234 }
 0x1ff   :  { %1518 = vrot.lane.b32.xlu1 %v1106_v24, %s4569_s28  ;;  %v848_v24 = vrot.slane %v7192_v53, 7 }
 0x200   :  { %2007 = vrot.lane.b32.xlu0 %v5685_v2, %s4572_s14 }
 0x201   :  { %v1437_v37 = vpop.permute.xlu1 %1436  ;;  %v850_v14 = vsel %vm820_vm2, %v848_v24, %v849_v13 }
 0x202   :  { %v5692_v62 = vpop.permute.xlu0 %1292  ;;  %v1610_v44 = vsel %vm1590_vm3, %v850_v14, %v1213_v16  ;;  %v1109_v14 = vsel %vm1013_vm1, %v1107_v1, %v7199_v52 }
 0x203   :  { %7190 = vst [vmem:[#allocation83_spill] sm:$0xff] %v5692_v62  ;;  %1520 = vrot.lane.b32.xlu1 %v1172_v7, %s4569_s28  ;;  %v5734_v51 = vsel %vm1655_vm4, %v1610_v44, %v1437_v37  ;;  %v2290_v37 = vld [vmem:[%s6991_s3] sm:$0xff]  ;;  %v851_v44 = vrot.slane %v7200_v48, 7 }
 0x204   :  { %1818 = vrot.lane.b32.xlu0 %v5685_v2, %s4571_s13  ;;  %7198 = vst [vmem:[#allocation87_spill] sm:$0xff] %v5734_v51  ;;  %v4573_v2 = vmov 0.0  }
 0x205   :  { %v5709_v7 = vpop.permute.xlu1 %1500 }
 0x206   :  { %7194 = vst [vmem:[#allocation27_spill] sm:$0xff] %v5709_v7  ;;  %v5711_v62 = vpop.permute.xlu0 %1296  ;;  %v7202_v7 = vld [vmem:[#allocation11_spill] sm:$0xff] }
 0x207   :  { %7195 = vst [vmem:[#allocation84_spill] sm:$0xff] %v5711_v62  ;;  %1298 = vrot.lane.b32.xlu1 %v5705_v55, %s4570_s12  ;;  %v2291_v62 = vld [vmem:[%s6991_s3 + $0x8] sm:$0xff]  ;;  %v7201_v55 = vld [vmem:[#allocation26_spill] sm:$0xff] }
 0x208   :  { %1816 = vrot.lane.b32.xlu0 %v5716_v30, %s4571_s13  ;;  %4248 = vmatprep.subr.mxu1 %v2291_v62  ;;  %v1592_v26 = vsel %vm1590_vm3, %v7202_v7, %v7201_v55 }
 0x209   :  { %v1217_v27 = vpop.permute.xlu1 %1216  ;;  %4249 = vmatpush3.msra.mxu1 %v2291_v62 }
 0x20a   :  { %v5730_v53 = vpop.permute.xlu0 %1300  ;;  %4250 = vmatprep.subr.mxu1 %v2290_v37 }
 0x20b   :  { %7197 = vst [vmem:[#allocation86_spill] sm:$0xff] %v5730_v53  ;;  %2037 = vrot.lane.b32.xlu1 %v4573_v2, %s4572_s14  ;;  %v852_v2 = vrot.slane %v5076_v46, 7  ;;  %v990_v53 = vsel %vm820_vm2, 0.0, %v848_v24  ;;  %4251 = vmatpush3.msra.mxu1 %v2290_v37  ;;  %v7208_v37 = vld [vmem:[#allocation32_spill] sm:$0xff] }
 0x20c   :  { %2011 = vrot.lane.b32.xlu0 %v5734_v51, %s4572_s14  ;;  %v1609_v1 = vsel %vm1590_vm3, %v990_v53, %v5466_v33  ;;  %v7206_v33 = vld [vmem:[#allocation8_spill] sm:$0xff] }
 0x20d   :  { %v5742_v16 = vpop.permute.xlu1 %1498  ;;  %v5773_v24 = vsel %vm1655_vm4, %v1609_v1, %v5493_v50  ;;  %v7207_v55 = vrot.slane %v7206_v33, 7  ;;  %v853_v53 = vsel %vm820_vm2, %v851_v44, %v852_v2  ;;  %v7210_v1 = vld [vmem:[#allocation39_spill] sm:$0xff]  ;;  %v7213_v2 = vld [vmem:[#allocation36_spill] sm:$0xff] }
 0x20e   :  { %v5744_v13 = vpop.permute.xlu0 %1458  ;;  %7205 = vst [vmem:[#allocation26_spill] sm:$0xff] %v5773_v24  ;;  %v1612_v48 = vsel %vm1590_vm3, %v853_v53, %v1217_v27  ;;  %v7214_v33 = vld [vmem:[#allocation12_spill] sm:$0xff]  ;;  %v7216_v53 = vld [vmem:[#allocation38_spill] sm:$0xff] }
 0x20f   :  { %1522 = vrot.lane.b32.xlu1 %v1109_v14, %s4569_s28  ;;  %v7204_v14 = vld [vmem:[#allocation30_spill] sm:$0xff]  ;;  %v997_v7 = vsel %vm820_vm2, 0.0, %v7207_v55  ;;  %v1594_v27 = vsel %vm1590_vm3, %v7214_v33, %v7213_v2 }
 0x210   :  { %1822 = vrot.lane.b32.xlu0 %v5734_v51, %s4571_s13  ;;  %v5769_v46 = vsel %vm1655_vm4, %v1592_v26, %v7204_v14  ;;  %v1623_v26 = vsel %vm1590_vm3, %v997_v7, %v7208_v37  ;;  %v5806_v37 = vsel %vm1655_vm4, %v1594_v27, %v7216_v53 }
 0x211   :  { %v5763_v62 = vpop.permute.xlu1 %1278 }
 0x212   :  { %v5765_v52 = vpop.permute.xlu0 %1524 }
 0x213   :  { %7203 = vst [vmem:[#allocation33_spill] sm:$0xff] %v5765_v52  ;;  %1786 = vrot.lane.b32.xlu1 %v5769_v46, %s4571_s13  ;;  %v5790_v52 = vsel %vm1655_vm4, %v1623_v26, %v7210_v1  ;;  %v991_v26 = vsel %vm820_vm2, 0.0, %v851_v44 }
 0x214   :  { %1820 = vrot.lane.b32.xlu0 %v5773_v24, %s4571_s13  ;;  %7211 = vst [vmem:[#allocation30_spill] sm:$0xff] %v5790_v52 }
 0x215   :  { %v1441_v14 = vpop.permute.xlu1 %1440 }
 0x216   :  { %v5786_v50 = vpop.permute.xlu0 %1850  ;;  %v5793_v47 = vsel %vm1655_vm4, %v1612_v48, %v1441_v14  ;;  %v1611_v48 = vsel %vm1590_vm3, %v991_v26, %v5511_v10 }
 0x217   :  { %7209 = vst [vmem:[#allocation11_spill] sm:$0xff] %v5786_v50  ;;  %7212 = vst [vmem:[#allocation8_spill] sm:$0xff] %v5793_v47  ;;  %1848 = vrot.lane.b32.xlu1 %v5790_v52, %s4571_s13  ;;  %v5819_v2 = vsel %vm1655_vm4, %v1611_v48, %v5539_v40  ;;  %v7219_v40 = vld [vmem:[#allocation9_spill] sm:$0xff]  ;;  %v855_v48 = vrot.slane %v5120_v18, 7  ;;  %v7221_v52 = vld [vmem:[#allocation40_spill] sm:$0xff] }
 0x218   :  { %2015 = vrot.lane.b32.xlu0 %v5793_v47, %s4572_s14  ;;  %7218 = vst [vmem:[#allocation36_spill] sm:$0xff] %v5819_v2  ;;  %v7220_v53 = vrot.slane %v7219_v40, 7 }
 0x219   :  { %v5802_v55 = vpop.permute.xlu1 %1504 }
 0x21a   :  { %7215 = vst [vmem:[#allocation32_spill] sm:$0xff] %v5802_v55  ;;  %v1785_v7 = vpop.permute.xlu0 %1784  ;;  %v998_v26 = vsel %vm820_vm2, 0.0, %v7220_v53 }
 0x21b   :  { %1979 = vrot.lane.b32.xlu1 %v5806_v37, %s4572_s14  ;;  %v2161_v44 = vsel %vm2160_vm6, 0.0, %v1785_v7  ;;  %v7222_v7 = vld [vmem:[#allocation35_spill] sm:$0xff] }
 0x21c   :  { %1826 = vrot.lane.b32.xlu0 %v5793_v47, %s4571_s13  ;;  %v1625_v50 = vsel %vm1590_vm3, %v998_v26, %v7222_v7 }
 0x21d   :  { %v1221_v14 = vpop.permute.xlu1 %1220 }
 0x21e   :  { %v5815_v1 = vpop.permute.xlu0 %2041 }
 0x21f   :  { %7217 = vst [vmem:[#allocation39_spill] sm:$0xff] %v5815_v1  ;;  %1790 = vrot.lane.b32.xlu1 %v5806_v37, %s4571_s13  ;;  %v854_v1 = vrot.slane %v7221_v52, 7 }
 0x220   :  { %1824 = vrot.lane.b32.xlu0 %v5819_v2, %s4571_s13 }
 0x221   :  { %v5826_v33 = vpop.permute.xlu1 %1502 }
 0x222   :  { %v1978_v10 = vpop.permute.xlu0 %1977 }
 0x223   :  { %v2226_v27 = vsel %vm2225_vm8, %v2161_v44, %v1978_v10  ;;  %1788 = vrot.lane.b32.xlu1 %v5394_v15, %s4571_s13  ;;  %v7223_v44 = vld [vmem:[#allocation44_spill] sm:$0xff] }
 0x224   :  { %4252 = vmatprep.mubr.msk.f32.mxu1 %vm2302_vm7, %v2226_v27  ;;  %v5845_v10 = vsel %vm1655_vm4, %v1625_v50, %v7223_v44  ;;  %v856_v27 = vsel %vm820_vm2, %v854_v1, %v855_v48 }
 0x225   :  { %v5839_v47 = vpop.permute.xlu1 %1282  ;;  %7224 = vst [vmem:[#allocation12_spill] sm:$0xff] %v5845_v10  ;;  %v1614_v18 = vsel %vm1590_vm3, %v856_v27, %v1221_v14  ;;  %v992_v14 = vsel %vm820_vm2, 0.0, %v854_v1  ;;  %v7228_v1 = vld [vmem:[#allocation43_spill] sm:$0xff] }
 0x226   :  { %v5841_v51 = vpop.permute.xlu0 %1983  ;;  %v1613_v48 = vsel %vm1590_vm3, %v992_v14, %v5552_v28  ;;  %v858_v28 = vrot.slane %v5147_v35, 7  ;;  %v857_v14 = vrot.slane %v7228_v1, 7 }
 0x227   :  { %2039 = vrot.lane.b32.xlu1 %v5845_v10, %s4572_s14  ;;  %v5875_v27 = vsel %vm1655_vm4, %v1613_v48, %v5577_v49 }
 0x228   :  { %7227 = vst [vmem:[#allocation40_spill] sm:$0xff] %v5875_v27  ;;  %v859_v48 = vsel %vm820_vm2, %v857_v14, %v858_v28 }
 0x229   :  { %v1445_v40 = vpop.permute.xlu1 %1444 }
 0x22a   :  { %v5851_v52 = vpop.permute.xlu0 %1794  ;;  %v5854_v53 = vsel %vm1655_vm4, %v1614_v18, %v1445_v40 }
 0x22b   :  { %7225 = vst [vmem:[#allocation38_spill] sm:$0xff] %v5854_v53  ;;  %2019 = vrot.lane.b32.xlu0 %v5854_v53, %s4572_s14  ;;  %1852 = vrot.lane.b32.xlu1 %v5845_v10, %s4571_s13 }
 0x22d   :  { %v5860_v50 = vpop.permute.xlu1 %1508 }
 0x22e   :  { %7226 = vst [vmem:[#allocation9_spill] sm:$0xff] %v5860_v50  ;;  %v5862_v26 = vpop.permute.xlu0 %1981 }
 0x22f   :  { %1830 = vrot.lane.b32.xlu0 %v5854_v53, %s4571_s13  ;;  %1985 = vrot.lane.b32.xlu1 %v5497_v25, %s4572_s14 }
 0x231   :  { %v1225_v7 = vpop.permute.xlu1 %1224 }
 0x232   :  { %v5871_v44 = vpop.permute.xlu0 %1792  ;;  %v1616_v53 = vsel %vm1590_vm3, %v859_v48, %v1225_v7  ;;  %v993_v7 = vsel %vm820_vm2, 0.0, %v857_v14 }
 0x233   :  { %1828 = vrot.lane.b32.xlu0 %v5875_v27, %s4571_s13  ;;  %1989 = vrot.lane.b32.xlu1 %v5543_v31, %s4572_s14 }
 0x235   :  { %v5881_v18 = vpop.permute.xlu1 %1506 }
 0x236   :  { %v5883_v40 = vpop.permute.xlu0 %1987 }
 0x237   :  { %1993 = vrot.lane.b32.xlu1 %v5581_v61, %s4572_s14 }
 0x239   :  { %v5889_v10 = vpop.permute.xlu1 %1286 }
 0x23a   :  { %v5891_v49 = vpop.permute.xlu0 %1798 }
 0x23b   :  { %1997 = vrot.lane.b32.xlu1 %v5629_v8, %s4572_s14 }
 0x23d   :  { %v1449_v50 = vpop.permute.xlu1 %1448 }
 0x23e   :  { %v5897_v55 = vpop.permute.xlu0 %1796  ;;  %v5900_v61 = vsel %vm1655_vm4, %v1616_v53, %v1449_v50  ;;  %v1615_v53 = vsel %vm1590_vm3, %v993_v7, %v5594_v20 }
 0x23f   :  { %7229 = vst [vmem:[#allocation35_spill] sm:$0xff] %v5900_v61  ;;  %2023 = vrot.lane.b32.xlu0 %v5900_v61, %s4572_s14  ;;  %2001 = vrot.lane.b32.xlu1 %v5672_v22, %s4572_s14  ;;  %v5921_v48 = vsel %vm1655_vm4, %v1615_v53, %v5608_v9 }
 0x240   :  { %7231 = vst [vmem:[#allocation43_spill] sm:$0xff] %v5921_v48 }
 0x241   :  { %v5906_v35 = vpop.permute.xlu1 %1512 }
 0x242   :  { %7230 = vst [vmem:[#allocation44_spill] sm:$0xff] %v5906_v35  ;;  %v5908_v1 = vpop.permute.xlu0 %1991  ;;  %v7232_v35 = vld [vmem:[#allocation47_spill] sm:$0xff] }
 0x243   :  { %1834 = vrot.lane.b32.xlu0 %v5900_v61, %s4571_s13  ;;  %2005 = vrot.lane.b32.xlu1 %v5716_v30, %s4572_s14  ;;  %v861_v61 = vrot.slane %v5176_v36, 7  ;;  %v860_v14 = vrot.slane %v7232_v35, 7 }
 0x245   :  { %v1229_v50 = vpop.permute.xlu1 %1228  ;;  %v862_v9 = vsel %vm820_vm2, %v860_v14, %v861_v61  ;;  %v864_v61 = vrot.slane %v5209_v57, 7  ;;  %v7236_v57 = vld [vmem:[#allocation54_spill] sm:$0xff] }
 0x246   :  { %v5917_v28 = vpop.permute.xlu0 %1802  ;;  %v1618_v7 = vsel %vm1590_vm3, %v862_v9, %v1229_v50  ;;  %v7234_v50 = vld [vmem:[#allocation50_spill] sm:$0xff] }
 0x247   :  { %1832 = vrot.lane.b32.xlu0 %v5921_v48, %s4571_s13  ;;  %2009 = vrot.lane.b32.xlu1 %v5773_v24, %s4572_s14  ;;  %v863_v9 = vrot.slane %v7234_v50, 7  ;;  %v866_v50 = vrot.slane %v7236_v57, 7 }
 0x249   :  { %v5929_v30 = vpop.permute.xlu1 %1510 }
 0x24a   :  { %v5931_v20 = vpop.permute.xlu0 %1800 }
 0x24b   :  { %2013 = vrot.lane.b32.xlu1 %v5819_v2, %s4572_s14 }
 0x24d   :  { %v1453_v53 = vpop.permute.xlu1 %1452 }
 0x24e   :  { %v5937_v22 = vpop.permute.xlu0 %1995  ;;  %v5940_v24 = vsel %vm1655_vm4, %v1618_v7, %v1453_v53  ;;  %v994_v7 = vsel %vm820_vm2, 0.0, %v860_v14  ;;  %v995_v14 = vsel %vm820_vm2, 0.0, %v863_v9 }
 0x24f   :  { %7233 = vst [vmem:[#allocation47_spill] sm:$0xff] %v5940_v24  ;;  %2027 = vrot.lane.b32.xlu0 %v5940_v24, %s4572_s14  ;;  %2017 = vrot.lane.b32.xlu1 %v5875_v27, %s4572_s14  ;;  %v1617_v53 = vsel %vm1590_vm3, %v994_v7, %v5623_v41  ;;  %v1619_v41 = vsel %vm1590_vm3, %v995_v14, %v5651_v59  ;;  %v996_v59 = vsel %vm820_vm2, 0.0, %v866_v50  ;;  %v867_v14 = vrot.slane %v5282_v58, 7 }
 0x250   :  { %v5961_v8 = vsel %vm1655_vm4, %v1617_v53, %v5640_v45  ;;  %v5977_v53 = vsel %vm1655_vm4, %v1619_v41, %v5666_v56  ;;  %v7242_v41 = vld [vmem:[#allocation45_spill] sm:$0xff] }
 0x251   :  { %v1233_v36 = vpop.permute.xlu1 %1232  ;;  %7235 = vst [vmem:[#allocation50_spill] sm:$0xff] %v5961_v8  ;;  %7237 = vst [vmem:[#allocation54_spill] sm:$0xff] %v5977_v53 }
 0x252   :  { %v5946_v35 = vpop.permute.xlu0 %1806 }
 0x253   :  { %1838 = vrot.lane.b32.xlu0 %v5940_v24, %s4571_s13  ;;  %2021 = vrot.lane.b32.xlu1 %v5921_v48, %s4572_s14  ;;  %v865_v24 = vsel %vm820_vm2, %v863_v9, %v864_v61 }
 0x254   :  { %v1620_v7 = vsel %vm1590_vm3, %v865_v24, %v1233_v36  ;;  %v1621_v24 = vsel %vm1590_vm3, %v996_v59, %v5682_v12 }
 0x255   :  { %v1457_v2 = vpop.permute.xlu1 %1456  ;;  %v1686_v56 = vsel %vm1655_vm4, %v1621_v24, %v5744_v13  ;;  %v868_v24 = vsel %vm820_vm2, %v866_v50, %v867_v14 }
 0x256   :  { %v5957_v27 = vpop.permute.xlu0 %1804 }
 0x257   :  { %1836 = vrot.lane.b32.xlu0 %v5961_v8, %s4571_s13  ;;  %2025 = vrot.lane.b32.xlu1 %v5961_v8, %s4572_s14  ;;  %v5980_v8 = vsel %vm1655_vm4, %v1620_v7, %v1457_v2  ;;  %v7240_v2 = vld [vmem:[#allocation10_spill] sm:$0xff] }
 0x258   :  { %7238 = vst [vmem:[#allocation88_spill] sm:$0xff] %v5980_v8  ;;  %v7241_v9 = vrot.slane %v7240_v2, 7 }
 0x259   :  { %v1237_v48 = vpop.permute.xlu1 %1236 }
 0x25a   :  { %v5973_v45 = vpop.permute.xlu0 %1999  ;;  %v999_v57 = vsel %vm820_vm2, 0.0, %v7241_v9  ;;  %v1622_v58 = vsel %vm1590_vm3, %v868_v24, %v1237_v48  ;;  %v7249_v24 = vld [vmem:[#allocation62_spill] sm:$0xff] }
 0x25b   :  { %2031 = vrot.lane.b32.xlu0 %v5980_v8, %s4572_s14  ;;  %2029 = vrot.lane.b32.xlu1 %v5977_v53, %s4572_s14  ;;  %v1627_v12 = vsel %vm1590_vm3, %v999_v57, %v7242_v41 }
 0x25d   :  { %v1461_v36 = vpop.permute.xlu1 %1460 }
 0x25e   :  { %v5989_v61 = vpop.permute.xlu0 %1810  ;;  %v1687_v57 = vsel %vm1655_vm4, %v1622_v58, %v1461_v36 }
 0x25f   :  { %7239 = vst [vmem:[#allocation89_spill] sm:$0xff] %v5989_v61  ;;  %1842 = vrot.lane.b32.xlu0 %v5980_v8, %s4571_s13  ;;  %2033 = vrot.lane.b32.xlu1 %v1686_v56, %s4572_s14  ;;  %v7243_v61 = vld [vmem:[#allocation52_spill] sm:$0xff] }
 0x260   :  { %v6008_v13 = vsel %vm1655_vm4, %v1627_v12, %v7243_v61  ;;  %v7245_v61 = vld [vmem:[#allocation13_spill] sm:$0xff] }
 0x261   :  { %v6002_v7 = vpop.permute.xlu1 %1290  ;;  %7244 = vst [vmem:[#allocation10_spill] sm:$0xff] %v6008_v13  ;;  %v7246_v41 = vrot.slane %v7245_v61, 7 }
 0x262   :  { %v6004_v59 = vpop.permute.xlu0 %1808 }
 0x263   :  { %1840 = vrot.lane.b32.xlu0 %v5977_v53, %s4571_s13  ;;  %2043 = vrot.lane.b32.xlu1 %v6008_v13, %s4572_s14  ;;  %v1000_v12 = vsel %vm820_vm2, 0.0, %v7246_v41  ;;  %v7247_v53 = vld [vmem:[#allocation53_spill] sm:$0xff] }
 0x264   :  { %v1629_v50 = vsel %vm1590_vm3, %v1000_v12, %v7247_v53  ;;  %v7252_v53 = vld [vmem:[#allocation15_spill] sm:$0xff] }
 0x265   :  { %v6016_v2 = vpop.permute.xlu1 %1514  ;;  %v6035_v8 = vsel %vm1655_vm4, %v1629_v50, %v7249_v24  ;;  %v7253_v61 = vrot.slane %v7252_v53, 7 }
 0x266   :  { %v6018_v9 = vpop.permute.xlu0 %2003  ;;  %7250 = vst [vmem:[#allocation52_spill] sm:$0xff] %v6035_v8 }
 0x267   :  { %2035 = vrot.lane.b32.xlu0 %v1687_v57, %s4572_s14  ;;  %1856 = vrot.lane.b32.xlu1 %v6008_v13, %s4571_s13  ;;  %v1001_v41 = vsel %vm820_vm2, 0.0, %v7253_v61  ;;  %v7257_v61 = vld [vmem:[#allocation41_spill] sm:$0xff] }
 0x268   :  { %v1631_v12 = vsel %vm1590_vm3, %v1001_v41, %v5311_v19 }
 0x269   :  { %v6029_v14 = vpop.permute.xlu1 %1516  ;;  %v6058_v24 = vsel %vm1655_vm4, %v1631_v12, %v5368_v11 }
 0x26a   :  { %7248 = vst [vmem:[#allocation45_spill] sm:$0xff] %v6029_v14  ;;  %v6031_v48 = vpop.permute.xlu0 %1814  ;;  %7255 = vst [vmem:[#allocation62_spill] sm:$0xff] %v6058_v24  ;;  %v7260_v14 = vld [vmem:[#allocation49_spill] sm:$0xff] }
 0x26b   :  { %1846 = vrot.lane.b32.xlu0 %v1687_v57, %s4571_s13  ;;  %2047 = vrot.lane.b32.xlu1 %v6035_v8, %s4572_s14 }
 0x26d   :  { %v6040_v36 = vpop.permute.xlu1 %1294 }
 0x26e   :  { %7251 = vst [vmem:[#allocation13_spill] sm:$0xff] %v6040_v36  ;;  %v6042_v58 = vpop.permute.xlu0 %1812 }
 0x26f   :  { %1844 = vrot.lane.b32.xlu0 %v1686_v56, %s4571_s13  ;;  %1860 = vrot.lane.b32.xlu1 %v6035_v8, %s4571_s13  ;;  %v7256_v56 = vld [vmem:[#allocation22_spill] sm:$0xff] }
 0x270   :  { %v884_v53 = vrot.slane %v7256_v56, 7  ;;  %v7258_v8 = vld [vmem:[#allocation14_spill] sm:$0xff] }
 0x271   :  { %v6052_v57 = vpop.permute.xlu1 %1518  ;;  %v1628_v19 = vsel %vm1590_vm3, %v7258_v8, %v7257_v61 }
 0x272   :  { %7254 = vst [vmem:[#allocation53_spill] sm:$0xff] %v6052_v57  ;;  %v6054_v50 = vpop.permute.xlu0 %2007  ;;  %v6074_v11 = vsel %vm1655_vm4, %v1628_v19, %v7260_v14  ;;  %v1002_v12 = vsel %vm820_vm2, 0.0, %v884_v53  ;;  %v7264_v14 = vld [vmem:[#allocation29_spill] sm:$0xff] }
 0x273   :  { %1854 = vrot.lane.b32.xlu0 %v5375_v32, %s4571_s13  ;;  %2051 = vrot.lane.b32.xlu1 %v6058_v24, %s4572_s14  ;;  %7261 = vst [vmem:[#allocation22_spill] sm:$0xff] %v6074_v11  ;;  %v1633_v56 = vsel %vm1590_vm3, %v1002_v12, %v5388_v5  ;;  %v887_v19 = vrot.slane %v7264_v14, 7 }
 0x274   :  { %v6089_v32 = vsel %vm1655_vm4, %v1633_v56, %v5445_v54 }
 0x275   :  { %v6068_v41 = vpop.permute.xlu1 %1520  ;;  %7263 = vst [vmem:[#allocation14_spill] sm:$0xff] %v6089_v32  ;;  %v1003_v56 = vsel %vm820_vm2, 0.0, %v887_v19 }
 0x276   :  { %7259 = vst [vmem:[#allocation15_spill] sm:$0xff] %v6068_v41  ;;  %v6070_v13 = vpop.permute.xlu0 %1818  ;;  %v7266_v41 = vld [vmem:[#allocation16_spill] sm:$0xff]  ;;  %v1635_v14 = vsel %vm1590_vm3, %v1003_v56, %v5464_v17 }
 0x277   :  { %2045 = vrot.lane.b32.xlu0 %v6074_v11, %s4572_s14  ;;  %1864 = vrot.lane.b32.xlu1 %v6058_v24, %s4571_s13  ;;  %v7265_v24 = vld [vmem:[#allocation46_spill] sm:$0xff] }
 0x278   :  { %v1630_v5 = vsel %vm1590_vm3, %v7266_v41, %v7265_v24  ;;  %v6118_v41 = vsel %vm1655_vm4, %v1635_v14, %v5521_v4  ;;  %v7276_v4 = vld [vmem:[#allocation17_spill] sm:$0xff] }
 0x279   :  { %v6083_v8 = vpop.permute.xlu1 %1298  ;;  %7271 = vst [vmem:[#allocation16_spill] sm:$0xff] %v6118_v41  ;;  %v885_v14 = vrot.slane %v7276_v4, 7 }
 0x27a   :  { %7262 = vst [vmem:[#allocation41_spill] sm:$0xff] %v6083_v8  ;;  %v6085_v61 = vpop.permute.xlu0 %1816  ;;  %v7268_v8 = vld [vmem:[#allocation59_spill] sm:$0xff] }
 0x27b   :  { %1858 = vrot.lane.b32.xlu0 %v6074_v11, %s4571_s13  ;;  %2055 = vrot.lane.b32.xlu1 %v6089_v32, %s4572_s14  ;;  %v6103_v57 = vsel %vm1655_vm4, %v1630_v5, %v7268_v8  ;;  %v7272_v8 = vld [vmem:[#allocation37_spill] sm:$0xff]  ;;  %v7274_v11 = vld [vmem:[#allocation18_spill] sm:$0xff] }
 0x27c   :  { %7269 = vst [vmem:[#allocation29_spill] sm:$0xff] %v6103_v57  ;;  %v890_v5 = vrot.slane %v7272_v8, 7 }
 0x27d   :  { %v6099_v12 = vpop.permute.xlu1 %2037 }
 0x27e   :  { %7267 = vst [vmem:[#allocation49_spill] sm:$0xff] %v6099_v12  ;;  %v6105_v54 = vpop.permute.xlu0 %2011  ;;  %v1004_v8 = vsel %vm820_vm2, 0.0, %v890_v5 }
 0x27f   :  { %2049 = vrot.lane.b32.xlu0 %v6103_v57, %s4572_s14  ;;  %1868 = vrot.lane.b32.xlu1 %v6089_v32, %s4571_s13  ;;  %v7273_v32 = vld [vmem:[#allocation51_spill] sm:$0xff] }
 0x280   :  { %v1632_v12 = vsel %vm1590_vm3, %v7274_v11, %v7273_v32  ;;  %v1637_v32 = vsel %vm1590_vm3, %v1004_v8, %v5537_v63 }
 0x281   :  { %v6114_v24 = vpop.permute.xlu1 %1522  ;;  %v6132_v56 = vsel %vm1655_vm4, %v1632_v12, %v5333_v3  ;;  %v7278_v12 = vld [vmem:[#allocation48_spill] sm:$0xff] }
 0x282   :  { %7270 = vst [vmem:[#allocation46_spill] sm:$0xff] %v6114_v24  ;;  %v6128_v36 = vpop.permute.xlu0 %1822  ;;  %v893_v4 = vrot.slane %v7278_v12, 7  ;;  %v7279_v24 = vld [vmem:[#allocation57_spill] sm:$0xff]  ;;  %v7280_v12 = vld [vmem:[#allocation19_spill] sm:$0xff] }
 0x283   :  { %1862 = vrot.lane.b32.xlu0 %v6103_v57, %s4571_s13  ;;  %2059 = vrot.lane.b32.xlu1 %v6118_v41, %s4572_s14  ;;  %7275 = vst [vmem:[#allocation59_spill] sm:$0xff] %v6128_v36  ;;  %v6144_v57 = vsel %vm1655_vm4, %v1637_v32, %v5592_v23 }
 0x284   :  { %7277 = vst [vmem:[#allocation37_spill] sm:$0xff] %v6144_v57 }
 0x285   :  { %v1787_v17 = vpop.permute.xlu1 %1786 }
 0x286   :  { %v6146_v3 = vpop.permute.xlu0 %1820  ;;  %v2162_v8 = vsel %vm2160_vm6, 0.0, %v1787_v17  ;;  %v7281_v17 = vld [vmem:[#allocation56_spill] sm:$0xff] }
 0x287   :  { %2053 = vrot.lane.b32.xlu0 %v6132_v56, %s4572_s14  ;;  %1872 = vrot.lane.b32.xlu1 %v6118_v41, %s4571_s13  ;;  %v886_v41 = vsel %vm820_vm2, %v884_v53, %v885_v14  ;;  %v888_v53 = vrot.slane %v7280_v12, 7  ;;  %v1005_v14 = vsel %vm820_vm2, 0.0, %v893_v4 }
 0x288   :  { %v1634_v63 = vsel %vm1590_vm3, %v886_v41, %v7279_v24  ;;  %v1639_v24 = vsel %vm1590_vm3, %v1005_v14, %v5606_v38 }
 0x289   :  { %v1849_v11 = vpop.permute.xlu1 %1848  ;;  %v6159_v23 = vsel %vm1655_vm4, %v1634_v63, %v5417_v6  ;;  %v896_v63 = vrot.slane %v7281_v17, 7  ;;  %v7293_v17 = vld [vmem:[#allocation27_spill] sm:$0xff] }
 0x28a   :  { %v6171_v41 = vpop.permute.xlu0 %2015 }
 0x28b   :  { %1866 = vrot.lane.b32.xlu0 %v6132_v56, %s4571_s13  ;;  %2063 = vrot.lane.b32.xlu1 %v6144_v57, %s4572_s14 }
 0x28d   :  { %v1980_v36 = vpop.permute.xlu1 %1979 }
 0x28e   :  { %v2227_v32 = vsel %vm2225_vm8, %v2162_v8, %v1980_v36  ;;  %v6175_v36 = vsel %vm1655_vm4, %v1639_v24, %v5664_v60  ;;  %v889_v8 = vsel %vm820_vm2, %v887_v19, %v888_v53 }
 0x28f   :  { %2057 = vrot.lane.b32.xlu0 %v6159_v23, %s4572_s14  ;;  %1876 = vrot.lane.b32.xlu1 %v6144_v57, %s4571_s13  ;;  %v6193_v57 = vpop.permute.xlu0 %1826 }
 0x290   :  { %4253 = vmatmul.mubr.msk.f32.vlgmr.msra.gmra.mxu1 %vm2302_vm7, %v2227_v32  ;;  %v7282_v32 = vld [vmem:[#allocation63_spill] sm:$0xff] }
 0x291   :  { %v1791_v6 = vpop.permute.xlu1 %1790  ;;  %v1636_v38 = vsel %vm1590_vm3, %v889_v8, %v7282_v32  ;;  %v2193_v8 = vsel %vm2160_vm6, 0.0, %v1849_v11 }
 0x292   :  { %v2164_v12 = vsel %vm2160_vm6, %v5769_v46, %v1791_v6  ;;  %v6189_v60 = vsel %vm1655_vm4, %v1636_v38, %v5491_v39  ;;  %v7283_v46 = vld [vmem:[#allocation20_spill] sm:$0xff]  ;;  %v1006_v39 = vsel %vm820_vm2, 0.0, %v896_v63 }
 0x293   :  { %1870 = vrot.lane.b32.xlu0 %v6159_v23, %s4571_s13  ;;  %2067 = vrot.lane.b32.xlu1 %v6175_v36, %s4572_s14  ;;  %v891_v53 = vrot.slane %v7283_v46, 7  ;;  %v1641_v6 = vsel %vm1590_vm3, %v1006_v39, %v5680_v21  ;;  %v899_v21 = vrot.slane %v5321_v0, 7 }
 0x295   :  { %v1789_v14 = vpop.permute.xlu1 %1788 }
 0x296   :  { %v2163_v24 = vsel %vm2160_vm6, %v5359_v43, %v1789_v14  ;;  %v2229_v43 = vsel %vm2225_vm8, %v2164_v12, %v5841_v51  ;;  %v892_v51 = vsel %vm820_vm2, %v890_v5, %v891_v53  ;;  %v6227_v12 = vpop.permute.xlu0 %1824 }
 0x297   :  { %2061 = vrot.lane.b32.xlu0 %v6189_v60, %s4572_s14  ;;  %1880 = vrot.lane.b32.xlu1 %v6175_v36, %s4571_s13  ;;  %v2228_v19 = vsel %vm2225_vm8, %v2163_v24, %v5862_v26  ;;  %v6214_v26 = vsel %vm1655_vm4, %v1641_v6, %v5742_v16  ;;  %v1638_v11 = vsel %vm1590_vm3, %v892_v51, %v5335_v34  ;;  %v7284_v24 = vld [vmem:[#allocation21_spill] sm:$0xff]  ;;  %v1007_v34 = vsel %vm820_vm2, 0.0, %v899_v21 }
 0x298   :  { %4255 = vmatprep.mubr.msk.f32.mxu1 %vm2302_vm7, %v2228_v19  ;;  %v6233_v14 = vsel %vm1655_vm4, %v1638_v11, %v5564_v42  ;;  %v894_v19 = vrot.slane %v7284_v24, 7  ;;  %v1643_v5 = vsel %vm1590_vm3, %v1007_v34, %v5763_v62  ;;  %v2165_v42 = vsel %vm2160_vm6, %v5394_v15, %v5871_v44  ;;  %v7285_v44 = vld [vmem:[#allocation66_spill] sm:$0xff]  ;;  %v7287_v51 = vld [vmem:[#allocation81_spill] sm:$0xff] }
 0x299   :  { %4256 = vmatmul.mubr.msk.f32.gmra.mxu1 %vm2302_vm7, %v2229_v43  ;;  %v2040_v32 = vpop.permute.xlu1 %2039  ;;  %v6252_v39 = vsel %vm1655_vm4, %v1643_v5, %v5826_v33  ;;  %v2166_v6 = vsel %vm2160_vm6, %v5806_v37, %v5851_v52  ;;  %v902_v15 = vrot.slane %v5400_v29, 7  ;;  %v7286_v37 = vld [vmem:[#allocation69_spill] sm:$0xff] }
 0x29a   :  { %v6217_v38 = vsel %vm2225_vm8, %v2193_v8, %v2040_v32  ;;  %v895_v62 = vsel %vm820_vm2, %v893_v4, %v894_v19  ;;  %v2231_v33 = vsel %vm2225_vm8, %v2166_v6, %v5883_v40  ;;  %v2167_v52 = vsel %vm2160_vm6, %v7286_v37, %v5897_v55  ;;  %v7288_v40 = vld [vmem:[#allocation67_spill] sm:$0xff]  ;;  %v7289_v55 = vld [vmem:[#allocation25_spill] sm:$0xff] }
 0x29b   :  { %1874 = vrot.lane.b32.xlu0 %v6189_v60, %s4571_s13  ;;  %2071 = vrot.lane.b32.xlu1 %v6214_v26, %s4572_s14  ;;  %v1640_v8 = vsel %vm1590_vm3, %v895_v62, %v7285_v44  ;;  %v2168_v24 = vsel %vm2160_vm6, %v7288_v40, %v5891_v49  ;;  %v897_v34 = vrot.slane %v7289_v55, 7  ;;  %v1008_v5 = vsel %vm820_vm2, 0.0, %v902_v15  ;;  %v7292_v44 = vld [vmem:[#allocation68_spill] sm:$0xff] }
 0x29c   :  { %v6275_v11 = vsel %vm1655_vm4, %v1640_v8, %v7287_v51  ;;  %v1645_v49 = vsel %vm1590_vm3, %v1008_v5, %v5839_v47  ;;  %v7291_v47 = vld [vmem:[#allocation71_spill] sm:$0xff]  ;;  %v2171_v8 = vsel %vm2160_vm6, %v5543_v31, %v5957_v27 }
 0x29d   :  { %v6229_v16 = vpop.permute.xlu1 %1852  ;;  %v6248_v46 = vpop.permute.xlu0 %2019  ;;  %v6302_v6 = vsel %vm1655_vm4, %v1645_v49, %v5881_v18  ;;  %v7295_v31 = vld [vmem:[#allocation31_spill] sm:$0xff]  ;;  %v7297_v49 = vld [vmem:[#allocation89_spill] sm:$0xff] }
 0x29e   :  { %v900_v27 = vrot.slane %v7295_v31, 7 }
 0x29f   :  { %2065 = vrot.lane.b32.xlu0 %v6233_v14, %s4572_s14  ;;  %1884 = vrot.lane.b32.xlu1 %v6214_v26, %s4571_s13 }
 0x2a1   :  { %v1986_v53 = vpop.permute.xlu1 %1985  ;;  %v6281_v19 = vpop.permute.xlu0 %1830 }
 0x2a2   :  { %v2230_v43 = vsel %vm2225_vm8, %v2165_v42, %v1986_v53  ;;  %v2233_v42 = vsel %vm2225_vm8, %v2168_v24, %v5908_v1  ;;  %v2169_v53 = vsel %vm2160_vm6, %v5497_v25, %v5931_v20  ;;  %v7290_v1 = vld [vmem:[#allocation70_spill] sm:$0xff]  ;;  %v905_v25 = vrot.slane %v7291_v47, 7  ;;  %v7296_v24 = vld [vmem:[#allocation77_spill] sm:$0xff] }
 0x2a3   :  { %1878 = vrot.lane.b32.xlu0 %v6233_v14, %s4571_s13  ;;  %2075 = vrot.lane.b32.xlu1 %v6252_v39, %s4572_s14  ;;  %v898_v20 = vsel %vm820_vm2, %v896_v63, %v897_v34  ;;  %v2173_v55 = vsel %vm2160_vm6, %v7296_v24, %v6004_v59 }
 0x2a4   :  { %4258 = vmatprep.mubr.msk.f32.mxu1 %vm2302_vm7, %v2230_v43 }
 0x2a5   :  { %4259 = vmatmul.mubr.msk.f32.gmra.mxu1 %vm2302_vm7, %v2231_v33  ;;  %v1990_v32 = vpop.permute.xlu1 %1989  ;;  %v2170_v33 = vsel %vm2160_vm6, %v7290_v1, %v5917_v28  ;;  %v1642_v28 = vsel %vm1590_vm3, %v898_v20, %v7292_v44  ;;  %v6324_v37 = vpop.permute.xlu0 %1828  ;;  %v7300_v1 = vld [vmem:[#allocation72_spill] sm:$0xff] }
 0x2a6   :  { %v2232_v4 = vsel %vm2225_vm8, %v2167_v52, %v1990_v32  ;;  %v2235_v18 = vsel %vm2225_vm8, %v2170_v33, %v5937_v22  ;;  %v6329_v63 = vsel %vm1655_vm4, %v1642_v28, %v7293_v17  ;;  %v7294_v32 = vld [vmem:[#allocation73_spill] sm:$0xff]  ;;  %v7301_v20 = vld [vmem:[#allocation80_spill] sm:$0xff] }
 0x2a7   :  { %2069 = vrot.lane.b32.xlu0 %v6275_v11, %s4572_s14  ;;  %1888 = vrot.lane.b32.xlu1 %v6252_v39, %s4571_s13  ;;  %v2172_v51 = vsel %vm2160_vm6, %v7294_v32, %v5946_v35  ;;  %v7302_v28 = vld [vmem:[#allocation32_spill] sm:$0xff] }
 0x2a8   :  { %4261 = vmatprep.mubr.msk.f32.mxu1 %vm2302_vm7, %v2232_v4  ;;  %v1009_v4 = vsel %vm820_vm2, 0.0, %v905_v25  ;;  %v2237_v40 = vsel %vm2225_vm8, %v2172_v51, %v5973_v45  ;;  %v7305_v51 = vld [vmem:[#allocation24_spill] sm:$0xff] }
 0x2a9   :  { %4262 = vmatmul.mubr.msk.f32.gmra.mxu1 %vm2302_vm7, %v2233_v42  ;;  %v1994_v43 = vpop.permute.xlu1 %1993  ;;  %v1647_v35 = vsel %vm1590_vm3, %v1009_v4, %v5889_v10  ;;  %v7299_v10 = vld [vmem:[#allocation79_spill] sm:$0xff]  ;;  %v2177_v31 = vsel %vm2160_vm6, %v7305_v51, %v6085_v61 }
 0x2aa   :  { %v2234_v62 = vsel %vm2225_vm8, %v2169_v53, %v1994_v43  ;;  %v6356_v42 = vsel %vm1655_vm4, %v1647_v35, %v5929_v30  ;;  %v7298_v53 = vld [vmem:[#allocation75_spill] sm:$0xff]  ;;  %v908_v59 = vrot.slane %v7299_v10, 7  ;;  %v7331_v10 = vld [vmem:[#allocation45_spill] sm:$0xff] }
 0x2ab   :  { %1882 = vrot.lane.b32.xlu0 %v6275_v11, %s4571_s13  ;;  %2079 = vrot.lane.b32.xlu1 %v6302_v6, %s4572_s14  ;;  %v2174_v43 = vsel %vm2160_vm6, %v7298_v53, %v7297_v49 }
 0x2ac   :  { %4264 = vmatprep.mubr.msk.f32.mxu1 %vm2302_vm7, %v2234_v62  ;;  %v901_v62 = vsel %vm820_vm2, %v899_v21, %v900_v27  ;;  %v2239_v30 = vsel %vm2225_vm8, %v2174_v43, %v6018_v9  ;;  %v7303_v9 = vld [vmem:[#allocation78_spill] sm:$0xff]  ;;  %v7310_v43 = vld [vmem:[#allocation9_spill] sm:$0xff] }
 0x2ad   :  { %4265 = vmatmul.mubr.msk.f32.gmra.mxu1 %vm2302_vm7, %v2235_v18  ;;  %v1998_v52 = vpop.permute.xlu1 %1997  ;;  %v1644_v33 = vsel %vm1590_vm3, %v901_v62, %v7300_v1  ;;  %v2175_v18 = vsel %vm2160_vm6, %v7301_v20, %v6042_v58  ;;  %v7304_v58 = vld [vmem:[#allocation34_spill] sm:$0xff]  ;;  %v7312_v62 = vld [vmem:[#allocation23_spill] sm:$0xff] }
 0x2ae   :  { %v2236_v22 = vsel %vm2225_vm8, %v2171_v8, %v1998_v52  ;;  %v6381_v0 = vsel %vm1655_vm4, %v1644_v33, %v7302_v28  ;;  %v2176_v8 = vsel %vm2160_vm6, %v7303_v9, %v6031_v48  ;;  %v903_v17 = vrot.slane %v7304_v58, 7  ;;  %v7315_v28 = vld [vmem:[#allocation26_spill] sm:$0xff]  ;;  %v7316_v58 = vld [vmem:[#allocation53_spill] sm:$0xff] }
 0x2af   :  { %2073 = vrot.lane.b32.xlu0 %v6329_v63, %s4572_s14  ;;  %1892 = vrot.lane.b32.xlu1 %v6302_v6, %s4571_s13  ;;  %v2241_v32 = vsel %vm2225_vm8, %v2176_v8, %v6054_v50  ;;  %v7306_v50 = vld [vmem:[#allocation55_spill] sm:$0xff] }
 0x2b0   :  { %4267 = vmatprep.mubr.msk.f32.mxu1 %vm2302_vm7, %v2236_v22  ;;  %v1010_v22 = vsel %vm820_vm2, 0.0, %v908_v59  ;;  %v2178_v35 = vsel %vm2160_vm6, %v7306_v50, %v6070_v13  ;;  %v904_v24 = vsel %vm820_vm2, %v902_v15, %v903_v17 }
 0x2b1   :  { %4268 = vmatmul.mubr.msk.f32.gmra.mxu1 %vm2302_vm7, %v2237_v40  ;;  %v6352_v34 = vpop.permute.xlu0 %2023  ;;  %v2002_v5 = vpop.permute.xlu1 %2001  ;;  %v1649_v48 = vsel %vm1590_vm3, %v1010_v22, %v6002_v7  ;;  %v7307_v7 = vld [vmem:[#allocation82_spill] sm:$0xff] }
 0x2b2   :  { %v2238_v45 = vsel %vm2225_vm8, %v2173_v55, %v2002_v5  ;;  %v6408_v4 = vsel %vm1655_vm4, %v1649_v48, %v6016_v2  ;;  %v911_v61 = vrot.slane %v7307_v7, 7  ;;  %v2243_v2 = vsel %vm2225_vm8, %v2178_v35, %v6105_v54  ;;  %v7308_v55 = vld [vmem:[#allocation74_spill] sm:$0xff]  ;;  %v7309_v5 = vld [vmem:[#allocation85_spill] sm:$0xff]  ;;  %v7311_v54 = vld [vmem:[#allocation59_spill] sm:$0xff] }
 0x2b3   :  { %1886 = vrot.lane.b32.xlu0 %v6329_v63, %s4571_s13  ;;  %2083 = vrot.lane.b32.xlu1 %v6356_v42, %s4572_s14  ;;  %v1646_v13 = vsel %vm1590_vm3, %v904_v24, %v7308_v55 }
 0x2b4   :  { %4270 = vmatprep.mubr.msk.f32.mxu1 %vm2302_vm7, %v2238_v45  ;;  %v2179_v45 = vsel %vm2160_vm6, %v7309_v5, %v6146_v3  ;;  %v6433_v29 = vsel %vm1655_vm4, %v1646_v13, %v7310_v43  ;;  %v7313_v3 = vld [vmem:[#allocation42_spill] sm:$0xff]  ;;  %v1011_v33 = vsel %vm820_vm2, 0.0, %v911_v61  ;;  %v7325_v43 = vld [vmem:[#allocation40_spill] sm:$0xff] }
 0x2b5   :  { %4271 = vmatmul.mubr.msk.f32.gmra.mxu1 %vm2302_vm7, %v2239_v30  ;;  %v2006_v44 = vpop.permute.xlu1 %2005  ;;  %v6387_v52 = vpop.permute.xlu0 %1834  ;;  %v2180_v30 = vsel %vm2160_vm6, %v7312_v62, %v7311_v54  ;;  %v906_v1 = vrot.slane %v7313_v3, 7 }
 0x2b6   :  { %v2240_v21 = vsel %vm2225_vm8, %v2175_v18, %v2006_v44  ;;  %v2245_v20 = vsel %vm2225_vm8, %v2180_v30, %v6171_v41  ;;  %v7314_v18 = vld [vmem:[#allocation13_spill] sm:$0xff]  ;;  %v7317_v41 = vld [vmem:[#allocation87_spill] sm:$0xff]  ;;  %v7326_v30 = vld [vmem:[#allocation46_spill] sm:$0xff] }
 0x2b7   :  { %2077 = vrot.lane.b32.xlu0 %v6381_v0, %s4572_s14  ;;  %1896 = vrot.lane.b32.xlu1 %v6356_v42, %s4571_s13  ;;  %v1651_v44 = vsel %vm1590_vm3, %v1011_v33, %v7314_v18  ;;  %v907_v51 = vsel %vm820_vm2, %v905_v25, %v906_v1  ;;  %v7327_v33 = vld [vmem:[#allocation38_spill] sm:$0xff]  ;;  %v7328_v18 = vld [vmem:[#allocation83_spill] sm:$0xff] }
 0x2b8   :  { %4273 = vmatprep.mubr.msk.f32.mxu1 %vm2302_vm7, %v2240_v21  ;;  %v2181_v21 = vsel %vm2160_vm6, %v7315_v28, %v6227_v12  ;;  %v6458_v17 = vsel %vm1655_vm4, %v1651_v44, %v7316_v58  ;;  %v7318_v12 = vld [vmem:[#allocation28_spill] sm:$0xff]  ;;  %v7329_v28 = vld [vmem:[#allocation35_spill] sm:$0xff] }
 0x2b9   :  { %4274 = vmatmul.mubr.msk.f32.gmra.mxu1 %vm2302_vm7, %v2241_v32  ;;  %v2010_v27 = vpop.permute.xlu1 %2009  ;;  %v1833_v49 = vpop.permute.xlu0 %1832  ;;  %v2182_v32 = vsel %vm2160_vm6, %v7317_v41, %v6193_v57  ;;  %v914_v48 = vrot.slane %v7318_v12, 7 }
 0x2ba   :  { %v2242_v40 = vsel %vm2225_vm8, %v2177_v31, %v2010_v27  ;;  %v2247_v31 = vsel %vm2225_vm8, %v2182_v32, %v6248_v46  ;;  %v7319_v27 = vld [vmem:[#allocation76_spill] sm:$0xff] }
 0x2bb   :  { %1890 = vrot.lane.b32.xlu0 %v6381_v0, %s4571_s13  ;;  %2087 = vrot.lane.b32.xlu1 %v6408_v4, %s4572_s14  ;;  %v1648_v57 = vsel %vm1590_vm3, %v907_v51, %v7319_v27  ;;  %v7322_v46 = vld [vmem:[#allocation8_spill] sm:$0xff]  ;;  %v1012_v5 = vsel %vm820_vm2, 0.0, %v914_v48 }
 0x2bc   :  { %4276 = vmatprep.mubr.msk.f32.mxu1 %vm2302_vm7, %v2242_v40  ;;  %v7320_v40 = vld [vmem:[#allocation36_spill] sm:$0xff]  ;;  %v2184_v55 = vsel %vm2160_vm6, %v7322_v46, %v6281_v19 }
 0x2bd   :  { %4277 = vmatmul.mubr.msk.f32.gmra.mxu1 %vm2302_vm7, %v2243_v2  ;;  %v2014_v53 = vpop.permute.xlu1 %2013  ;;  %v2183_v50 = vsel %vm2160_vm6, %v7320_v40, %v6324_v37  ;;  %v7321_v2 = vld [vmem:[#allocation44_spill] sm:$0xff]  ;;  %v7323_v37 = vld [vmem:[#allocation58_spill] sm:$0xff] }
 0x2be   :  { %v2244_v15 = vsel %vm2225_vm8, %v2179_v45, %v2014_v53  ;;  %v6483_v47 = vsel %vm1655_vm4, %v1648_v57, %v7321_v2  ;;  %v909_v13 = vrot.slane %v7323_v37, 7  ;;  %v2249_v45 = vsel %vm2225_vm8, %v2184_v55, %v6352_v34  ;;  %v7324_v53 = vld [vmem:[#allocation41_spill] sm:$0xff]  ;;  %v7332_v32 = vld [vmem:[#allocation60_spill] sm:$0xff]  ;;  %v7335_v55 = vld [vmem:[#allocation50_spill] sm:$0xff] }
 0x2bf   :  { %2081 = vrot.lane.b32.xlu0 %v6433_v29, %s4572_s14  ;;  %1900 = vrot.lane.b32.xlu1 %v6408_v4, %s4571_s13  ;;  %v1653_v19 = vsel %vm1590_vm3, %v1012_v5, %v7324_v53  ;;  %v2186_v34 = vsel %vm2160_vm6, %v7327_v33, %v6387_v52  ;;  %v7330_v52 = vld [vmem:[#allocation43_spill] sm:$0xff]  ;;  %v912_v51 = vrot.slane %v7332_v32, 7  ;;  %v7333_v40 = vld [vmem:[#allocation84_spill] sm:$0xff] }
 0x2c0   :  { %4279 = vmatprep.mubr.msk.f32.mxu1 %vm2302_vm7, %v2244_v15  ;;  %v2185_v15 = vsel %vm2160_vm6, %v7325_v43, %v1833_v49  ;;  %v1718_v3 = vsel %vm1655_vm4, %v1653_v19, %v7326_v30  ;;  %v910_v49 = vsel %vm820_vm2, %v908_v59, %v909_v13  ;;  %v2948_v2 = vld [vmem:[%s6993_s5] sm:$0xf]  ;;  %v7337_v5 = vld [vmem:[#allocation47_spill] sm:$0xff] }
 0x2c1   :  { %4280 = vmatmul.mubr.msk.f32.gmra.mxu1 %vm2302_vm7, %v2245_v20  ;;  %v2028_v9 = vpop.permute.xlu0 %2027  ;;  %v2018_v8 = vpop.permute.xlu1 %2017  ;;  %v1650_v44 = vsel %vm1590_vm3, %v910_v49, %v7328_v18  ;;  %v913_v57 = vsel %vm820_vm2, %v911_v61, %v912_v51  ;;  %4348 = vmatprep.subr.msk.mxu0 %vm2495_vm5, %v2948_v2  ;;  %v7336_v61 = vld [vmem:[#allocation61_spill] sm:$0xff] }
 0x2c2   :  { %v2246_v22 = vsel %vm2225_vm8, %v2181_v21, %v2018_v8  ;;  %v2251_v20 = vsel %vm2225_vm8, %v2186_v34, %v2028_v9  ;;  %v6528_v59 = vsel %vm1655_vm4, %v1650_v44, %v7331_v10  ;;  %4349 = vmatpush3.msk.msra.mxu0 %vm2495_vm5, %v2948_v2  ;;  %v915_v13 = vrot.slane %v7336_v61, 7  ;;  %v7340_v34 = vld [vmem:[#allocation88_spill] sm:$0xff]  ;;  %v7341_v44 = vld [vmem:[#allocation54_spill] sm:$0xff]  ;;  %v7344_v10 = vld [vmem:[#allocation39_spill] sm:$0xff] }
 0x2c3   :  { %1894 = vrot.lane.b32.xlu0 %v6433_v29, %s4571_s13  ;;  %2091 = vrot.lane.b32.xlu1 %v6458_v17, %s4572_s14  ;;  %v7349_v61 = vld [vmem:[#allocation10_spill] sm:$0xff] }
 0x2c4   :  { %4282 = vmatprep.mubr.msk.f32.mxu1 %vm2302_vm7, %v2246_v22 }
 0x2c5   :  { %4283 = vmatmul.mubr.msk.f32.gmra.mxu1 %vm2302_vm7, %v2247_v31  ;;  %v1839_v35 = vpop.permute.xlu0 %1838  ;;  %v2022_v24 = vpop.permute.xlu1 %2021 }
 0x2c6   :  { %v2248_v25 = vsel %vm2225_vm8, %v2183_v50, %v2022_v24  ;;  %v2188_v21 = vsel %vm2160_vm6, %v7329_v28, %v1839_v35  ;;  %v1652_v50 = vsel %vm1590_vm3, %v913_v57, %v7333_v40  ;;  %v7346_v57 = vld [vmem:[#allocation64_spill] sm:$0xff] }
 0x2c7   :  { %2085 = vrot.lane.b32.xlu0 %v6483_v47, %s4572_s14  ;;  %1904 = vrot.lane.b32.xlu1 %v6458_v17, %s4571_s13  ;;  %v7347_v40 = vld [vmem:[#allocation12_spill] sm:$0xff] }
 0x2c8   :  { %4285 = vmatprep.mubr.msk.f32.mxu1 %vm2302_vm7, %v2248_v25  ;;  %v7334_v25 = vld [vmem:[#allocation15_spill] sm:$0xff] }
 0x2c9   :  { %4286 = vmatmul.mubr.msk.f32.gmra.mxu1 %vm2302_vm7, %v2249_v45  ;;  %v1837_v54 = vpop.permute.xlu0 %1836  ;;  %v2026_v62 = vpop.permute.xlu1 %2025  ;;  %v6550_v46 = vsel %vm1655_vm4, %v1652_v50, %v7334_v25 }
 0x2ca   :  { %v2250_v1 = vsel %vm2225_vm8, %v2185_v15, %v2026_v62  ;;  %v2187_v8 = vsel %vm2160_vm6, %v7330_v52, %v1837_v54  ;;  %v916_v15 = vsel %vm820_vm2, %v914_v48, %v915_v13  ;;  %v7338_v54 = vld [vmem:[#allocation86_spill] sm:$0xff]  ;;  %v7342_v48 = vld [vmem:[#allocation49_spill] sm:$0xff] }
 0x2cb   :  { %1898 = vrot.lane.b32.xlu0 %v6483_v47, %s4571_s13  ;;  %2095 = vrot.lane.b32.xlu1 %v1718_v3, %s4572_s14  ;;  %v1654_v62 = vsel %vm1590_vm3, %v916_v15, %v7338_v54 }
 0x2cc   :  { %4288 = vmatprep.mubr.msk.f32.mxu1 %vm2302_vm7, %v2250_v1  ;;  %v7339_v1 = vld [vmem:[#allocation33_spill] sm:$0xff] }
 0x2cd   :  { %4289 = vmatmul.mubr.msk.f32.gmra.mxu1 %vm2302_vm7, %v2251_v20  ;;  %v2032_v58 = vpop.permute.xlu0 %2031  ;;  %v2030_v22 = vpop.permute.xlu1 %2029  ;;  %v1719_v33 = vsel %vm1655_vm4, %v1654_v62, %v7339_v1 }
 0x2ce   :  { %v2253_v9 = vsel %vm2225_vm8, %v2188_v21, %v2032_v58  ;;  %v2252_v41 = vsel %vm2225_vm8, %v2187_v8, %v2030_v22  ;;  %v7343_v58 = vld [vmem:[#allocation11_spill] sm:$0xff] }
 0x2cf   :  { %2089 = vrot.lane.b32.xlu0 %v6528_v59, %s4572_s14  ;;  %1908 = vrot.lane.b32.xlu1 %v1718_v3, %s4571_s13  ;;  %v2194_v22 = vsel %vm2160_vm6, 0.0, %v7343_v58 }
 0x2d0   :  { %4291 = vmatprep.mubr.msk.f32.mxu1 %vm2302_vm7, %v2252_v41  ;;  %v7345_v41 = vld [vmem:[#allocation30_spill] sm:$0xff] }
 0x2d1   :  { %4292 = vmatmul.mubr.msk.f32.gmra.mxu1 %vm2302_vm7, %v2253_v9  ;;  %v1843_v31 = vpop.permute.xlu0 %1842  ;;  %v2034_v27 = vpop.permute.xlu1 %2033  ;;  %v2259_v9 = vsel %vm2225_vm8, %v2194_v22, %v7344_v10  ;;  %v2195_v32 = vsel %vm2160_vm6, %v7345_v41, %v6229_v16 }
 0x2d2   :  { %v2190_v45 = vsel %vm2160_vm6, %v7337_v5, %v1843_v31 }
 0x2d3   :  { %1902 = vrot.lane.b32.xlu0 %v6528_v59, %s4571_s13 }
 0x2d5   :  { %v1841_v35 = vpop.permute.xlu0 %1840  ;;  %v2044_v24 = vpop.permute.xlu1 %2043 }
 0x2d6   :  { %v2189_v37 = vsel %vm2160_vm6, %v7335_v55, %v1841_v35  ;;  %v2260_v51 = vsel %vm2225_vm8, %v2195_v32, %v2044_v24  ;;  %v7348_v24 = vld [vmem:[#allocation65_spill] sm:$0xff]  ;;  %v7354_v32 = vld [vmem:[#allocation14_spill] sm:$0xff] }
 0x2d7   :  { %2093 = vrot.lane.b32.xlu0 %v6550_v46, %s4572_s14  ;;  %v2254_v7 = vsel %vm2225_vm8, %v2189_v37, %v2034_v27 }
 0x2d8   :  { %4294 = vmatprep.mubr.msk.f32.mxu1 %vm2302_vm7, %v2254_v7 }
 0x2d9   :  { %v2036_v53 = vpop.permute.xlu0 %2035  ;;  %v1857_v19 = vpop.permute.xlu1 %1856 }
 0x2da   :  { %v2255_v43 = vsel %vm2225_vm8, %v2190_v45, %v2036_v53  ;;  %v2197_v50 = vsel %vm2160_vm6, %v7347_v40, %v1857_v19 }
 0x2db   :  { %1906 = vrot.lane.b32.xlu0 %v6550_v46, %s4571_s13  ;;  %4295 = vmatmul.mubr.msk.f32.gmra.mxu1 %vm2302_vm7, %v2255_v43  ;;  %v7350_v43 = vld [vmem:[#allocation22_spill] sm:$0xff] }
 0x2dd   :  { %v1847_v30 = vpop.permute.xlu0 %1846  ;;  %v2048_v3 = vpop.permute.xlu1 %2047 }
 0x2de   :  { %v2192_v49 = vsel %vm2160_vm6, %v7340_v34, %v1847_v30  ;;  %v2262_v2 = vsel %vm2225_vm8, %v2197_v50, %v2048_v3  ;;  %v7351_v30 = vld [vmem:[#allocation52_spill] sm:$0xff] }
 0x2df   :  { %2097 = vrot.lane.b32.xlu0 %v1719_v33, %s4572_s14  ;;  %v2257_v21 = vsel %vm2225_vm8, %v2192_v49, %v7342_v48 }
 0x2e1   :  { %v1845_v20 = vpop.permute.xlu0 %1844  ;;  %v1861_v18 = vpop.permute.xlu1 %1860 }
 0x2e2   :  { %v2191_v12 = vsel %vm2160_vm6, %v7341_v44, %v1845_v20  ;;  %v2199_v13 = vsel %vm2160_vm6, %v7349_v61, %v1861_v18  ;;  %v7352_v20 = vld [vmem:[#allocation29_spill] sm:$0xff] }
 0x2e3   :  { %1910 = vrot.lane.b32.xlu0 %v1719_v33, %s4571_s13  ;;  %v2256_v28 = vsel %vm2225_vm8, %v2191_v12, %v7342_v48  ;;  %v7356_v61 = vld [vmem:[#allocation37_spill] sm:$0xff] }
 0x2e4   :  { %4297 = vmatprep.mubr.msk.f32.mxu1 %vm2302_vm7, %v2256_v28  ;;  %v7353_v28 = vld [vmem:[#allocation62_spill] sm:$0xff] }
 0x2e5   :  { %v1855_v52 = vpop.permute.xlu0 %1854  ;;  %4298 = vmatmul.mubr.msk.f32.gmra.mxu1 %vm2302_vm7, %v2257_v21  ;;  %v2052_v8 = vpop.permute.xlu1 %2051 }
 0x2e6   :  { %4300 = vmatprep.mubr.msk.f32.mxu1 %vm2302_vm7, %v6217_v38  ;;  %v2196_v38 = vsel %vm2160_vm6, %v7346_v57, %v1855_v52  ;;  %v2264_v45 = vsel %vm2225_vm8, %v2199_v13, %v2052_v8 }
 0x2e9   :  { %v2046_v31 = vpop.permute.xlu0 %2045  ;;  %4301 = vmatmul.mubr.msk.f32.gmra.mxu1 %vm2302_vm7, %v2259_v9  ;;  %v1865_v27 = vpop.permute.xlu1 %1864 }
 0x2ea   :  { %4303 = vmatprep.mubr.msk.f32.mxu1 %vm2302_vm7, %v2260_v51  ;;  %v2261_v35 = vsel %vm2225_vm8, %v2196_v38, %v2046_v31  ;;  %v2201_v3 = vsel %vm2160_vm6, %v7351_v30, %v1865_v27 }
 0x2ed   :  { %v1859_v25 = vpop.permute.xlu0 %1858  ;;  %4304 = vmatmul.mubr.msk.f32.gmra.mxu1 %vm2302_vm7, %v2261_v35  ;;  %v2056_v16 = vpop.permute.xlu1 %2055  ;;  %v7355_v35 = vld [vmem:[#allocation16_spill] sm:$0xff] }
 0x2ee   :  { %4306 = vmatprep.mubr.msk.f32.mxu1 %vm2302_vm7, %v2262_v2  ;;  %v2198_v55 = vsel %vm2160_vm6, %v7348_v24, %v1859_v25  ;;  %v2266_v33 = vsel %vm2225_vm8, %v2201_v3, %v2056_v16 }
 0x2f1   :  { %v2050_v37 = vpop.permute.xlu0 %2049  ;;  %v1869_v7 = vpop.permute.xlu1 %1868 }
 0x2f2   :  { %v2263_v5 = vsel %vm2225_vm8, %v2198_v55, %v2050_v37  ;;  %v2203_v21 = vsel %vm2160_vm6, %v7353_v28, %v1869_v7 }
 0x2f3   :  { %4307 = vmatmul.mubr.msk.f32.gmra.mxu1 %vm2302_vm7, %v2263_v5 }
 0x2f4   :  { %4309 = vmatprep.mubr.msk.f32.mxu1 %vm2302_vm7, %v2264_v45 }
 0x2f5   :  { %v1863_v53 = vpop.permute.xlu0 %1862  ;;  %v2060_v19 = vpop.permute.xlu1 %2059 }
 0x2f6   :  { %v2200_v15 = vsel %vm2160_vm6, %v7350_v43, %v1863_v53  ;;  %v2268_v8 = vsel %vm2225_vm8, %v2203_v21, %v2060_v19 }
 0x2f9   :  { %v2054_v54 = vpop.permute.xlu0 %2053  ;;  %v1873_v62 = vpop.permute.xlu1 %1872 }
 0x2fa   :  { %v2265_v1 = vsel %vm2225_vm8, %v2200_v15, %v2054_v54  ;;  %v2205_v51 = vsel %vm2160_vm6, %v7354_v32, %v1873_v62 }
 0x2fb   :  { %4310 = vmatmul.mubr.msk.f32.gmra.mxu1 %vm2302_vm7, %v2265_v1 }
 0x2fc   :  { %4312 = vmatprep.mubr.msk.f32.mxu1 %vm2302_vm7, %v2266_v33 }
 0x2fd   :  { %v1867_v34 = vpop.permute.xlu0 %1866  ;;  %v2064_v49 = vpop.permute.xlu1 %2063 }
 0x2fe   :  { %v2202_v18 = vsel %vm2160_vm6, %v7352_v20, %v1867_v34  ;;  %v2270_v27 = vsel %vm2225_vm8, %v2205_v51, %v2064_v49 }
 0x301   :  { %v2058_v44 = vpop.permute.xlu0 %2057  ;;  %v1877_v12 = vpop.permute.xlu1 %1876 }
 0x302   :  { %v2267_v52 = vsel %vm2225_vm8, %v2202_v18, %v2058_v44  ;;  %v2207_v2 = vsel %vm2160_vm6, %v7355_v35, %v1877_v12 }
 0x303   :  { %4313 = vmatmul.mubr.msk.f32.gmra.mxu1 %vm2302_vm7, %v2267_v52 }
 0x304   :  { %4315 = vmatprep.mubr.msk.f32.mxu1 %vm2302_vm7, %v2268_v8 }
 0x305   :  { %v1871_v58 = vpop.permute.xlu0 %1870  ;;  %v2068_v22 = vpop.permute.xlu1 %2067 }
 0x306   :  { %v2204_v10 = vsel %vm2160_vm6, %v6132_v56, %v1871_v58  ;;  %v2272_v16 = vsel %vm2225_vm8, %v2207_v2, %v2068_v22 }
 0x309   :  { %v2062_v9 = vpop.permute.xlu0 %2061  ;;  %v1881_v41 = vpop.permute.xlu1 %1880 }
 0x30a   :  { %v2269_v31 = vsel %vm2225_vm8, %v2204_v10, %v2062_v9  ;;  %v2209_v13 = vsel %vm2160_vm6, %v7356_v61, %v1881_v41 }
 0x30b   :  { %4316 = vmatmul.mubr.msk.f32.gmra.mxu1 %vm2302_vm7, %v2269_v31 }
 0x30c   :  { %4318 = vmatprep.mubr.msk.f32.mxu1 %vm2302_vm7, %v2270_v27 }
 0x30d   :  { %v1875_v57 = vpop.permute.xlu0 %1874  ;;  %v2072_v38 = vpop.permute.xlu1 %2071 }
 0x30e   :  { %v2206_v40 = vsel %vm2160_vm6, %v6159_v23, %v1875_v57  ;;  %v2274_v45 = vsel %vm2225_vm8, %v2209_v13, %v2072_v38 }
 0x311   :  { %v2066_v50 = vpop.permute.xlu0 %2065  ;;  %v1885_v56 = vpop.permute.xlu1 %1884 }
 0x312   :  { %v2271_v25 = vsel %vm2225_vm8, %v2206_v40, %v2066_v50  ;;  %v2211_v54 = vsel %vm2160_vm6, %v6175_v36, %v1885_v56 }
 0x313   :  { %4319 = vmatmul.mubr.msk.f32.gmra.mxu1 %vm2302_vm7, %v2271_v25  ;;  %v6705_v25 = vld [vmem:[%s6992_s4] ss:$0 sm:$0xff] }
 0x314   :  { %4321 = vmatprep.mubr.msk.f32.mxu1 %vm2302_vm7, %v2272_v16 }
 0x315   :  { %v1879_v24 = vpop.permute.xlu0 %1878  ;;  %v2076_v55 = vpop.permute.xlu1 %2075 }
 0x316   :  { %v2208_v37 = vsel %vm2160_vm6, %v6189_v60, %v1879_v24  ;;  %v2276_v30 = vsel %vm2225_vm8, %v2211_v54, %v2076_v55 }
 0x319   :  { %v2070_v7 = vpop.permute.xlu0 %2069  ;;  %v1889_v23 = vpop.permute.xlu1 %1888 }
 0x31a   :  { %v2273_v5 = vsel %vm2225_vm8, %v2208_v37, %v2070_v7  ;;  %v2213_v49 = vsel %vm2160_vm6, %v6214_v26, %v1889_v23 }
 0x31b   :  { %4322 = vmatmul.mubr.msk.f32.gmra.mxu1 %vm2302_vm7, %v2273_v5 }
 0x31c   :  { %4324 = vmatprep.mubr.msk.f32.mxu1 %vm2302_vm7, %v2274_v45 }
 0x31d   :  { %v1883_v53 = vpop.permute.xlu0 %1882  ;;  %v2080_v19 = vpop.permute.xlu1 %2079 }
 0x31e   :  { %v2210_v43 = vsel %vm2160_vm6, %v6233_v14, %v1883_v53  ;;  %v2278_v20 = vsel %vm2225_vm8, %v2213_v49, %v2080_v19 }
 0x321   :  { %v2074_v15 = vpop.permute.xlu0 %2073  ;;  %v1893_v60 = vpop.permute.xlu1 %1892 }
 0x322   :  { %v2275_v62 = vsel %vm2225_vm8, %v2210_v43, %v2074_v15 }
 0x323   :  { %4325 = vmatmul.mubr.msk.f32.gmra.mxu1 %vm2302_vm7, %v2275_v62 }
 0x324   :  { %4327 = vmatprep.mubr.msk.f32.mxu1 %vm2302_vm7, %v2276_v30 }
 0x325   :  { %v1887_v3 = vpop.permute.xlu0 %1886  ;;  %v2084_v1 = vpop.permute.xlu1 %2083 }
 0x326   :  { %v2212_v33 = vsel %vm2160_vm6, %v6275_v11, %v1887_v3  ;;  %v2215_v11 = vsel %vm2160_vm6, %v6252_v39, %v1893_v60 }
 0x327   :  { %v2280_v26 = vsel %vm2225_vm8, %v2215_v11, %v2084_v1 }
 0x329   :  { %v2078_v34 = vpop.permute.xlu0 %2077  ;;  %v1897_v14 = vpop.permute.xlu1 %1896 }
 0x32a   :  { %v2277_v36 = vsel %vm2225_vm8, %v2212_v33, %v2078_v34 }
 0x32b   :  { %4328 = vmatmul.mubr.msk.f32.gmra.mxu1 %vm2302_vm7, %v2277_v36 }
 0x32c   :  { %4330 = vmatprep.mubr.msk.f32.mxu1 %vm2302_vm7, %v2278_v20 }
 0x32d   :  { %v1891_v18 = vpop.permute.xlu0 %1890  ;;  %v2088_v44 = vpop.permute.xlu1 %2087 }
 0x32e   :  { %v2214_v12 = vsel %vm2160_vm6, %v6329_v63, %v1891_v18  ;;  %v2217_v63 = vsel %vm2160_vm6, %v6302_v6, %v1897_v14 }
 0x32f   :  { %v2282_v39 = vsel %vm2225_vm8, %v2217_v63, %v2088_v44 }
 0x331   :  { %v2082_v28 = vpop.permute.xlu0 %2081  ;;  %v1901_v52 = vpop.permute.xlu1 %1900 }
 0x332   :  { %v2279_v21 = vsel %vm2225_vm8, %v2214_v12, %v2082_v28 }
 0x333   :  { %4331 = vmatmul.mubr.msk.f32.gmra.mxu1 %vm2302_vm7, %v2279_v21 }
 0x334   :  { %4333 = vmatprep.mubr.msk.f32.mxu1 %vm2302_vm7, %v2280_v26 }
 0x335   :  { %v1895_v8 = vpop.permute.xlu0 %1894  ;;  %v2092_v9 = vpop.permute.xlu1 %2091 }
 0x336   :  { %v2216_v58 = vsel %vm2160_vm6, %v6381_v0, %v1895_v8  ;;  %v2219_v0 = vsel %vm2160_vm6, %v6356_v42, %v1901_v52 }
 0x337   :  { %v2284_v27 = vsel %vm2225_vm8, %v2219_v0, %v2092_v9 }
 0x339   :  { %v2086_v22 = vpop.permute.xlu0 %2085  ;;  %v1905_v32 = vpop.permute.xlu1 %1904 }
 0x33a   :  { %v2281_v10 = vsel %vm2225_vm8, %v2216_v58, %v2086_v22 }
 0x33b   :  { %4334 = vmatmul.mubr.msk.f32.gmra.mxu1 %vm2302_vm7, %v2281_v10 }
 0x33c   :  { %4336 = vmatprep.mubr.msk.f32.mxu1 %vm2302_vm7, %v2282_v39 }
 0x33d   :  { %v1899_v41 = vpop.permute.xlu0 %1898  ;;  %v2096_v38 = vpop.permute.xlu1 %2095 }
 0x33e   :  { %v2218_v51 = vsel %vm2160_vm6, %v6433_v29, %v1899_v41  ;;  %v2221_v29 = vsel %vm2160_vm6, %v6408_v4, %v1905_v32 }
 0x33f   :  { %v2286_v42 = vsel %vm2225_vm8, %v2221_v29, %v2096_v38 }
 0x341   :  { %v2090_v31 = vpop.permute.xlu0 %2089  ;;  %v1909_v35 = vpop.permute.xlu1 %1908 }
 0x342   :  { %v2283_v6 = vsel %vm2225_vm8, %v2218_v51, %v2090_v31 }
 0x343   :  { %4337 = vmatmul.mubr.msk.f32.gmra.mxu1 %vm2302_vm7, %v2283_v6 }
 0x344   :  { %4339 = vmatprep.mubr.msk.f32.mxu1 %vm2302_vm7, %v2284_v27 }
 0x345   :  { %v1903_v57 = vpop.permute.xlu0 %1902 }
 0x346   :  { %v2220_v40 = vsel %vm2160_vm6, %v6483_v47, %v1903_v57  ;;  %v2223_v47 = vsel %vm2160_vm6, %v6458_v17, %v1909_v35 }
 0x347   :  { %v2288_v61 = vsel %vm2225_vm8, %v2223_v47, %v7342_v48 }
 0x349   :  { %v2094_v50 = vpop.permute.xlu0 %2093 }
 0x34a   :  { %v2285_v56 = vsel %vm2225_vm8, %v2220_v40, %v2094_v50 }
 0x34b   :  { %4340 = vmatmul.mubr.msk.f32.gmra.mxu1 %vm2302_vm7, %v2285_v56 }
 0x34c   :  { %4342 = vmatprep.mubr.msk.f32.mxu1 %vm2302_vm7, %v2286_v42 }
 0x34d   :  { %v1907_v2 = vpop.permute.xlu0 %1906 }
 0x34e   :  { %v2222_v4 = vsel %vm2160_vm6, %v6528_v59, %v1907_v2 }
 0x350   :  { %v4254_v16 = vpop.f32.mrf.mxu1 }
 0x351   :  { %v2098_v24 = vpop.permute.xlu0 %2097  ;;  %v2571_v55 = vadd.f32 %v4254_v16, %v6705_v25 }
 0x352   :  { %v2287_v37 = vsel %vm2225_vm8, %v2222_v4, %v2098_v24  ;;  %v2565_v7 = vpop.f32.mrf.mxu1 }
 0x353   :  { %v2566_v23 = vadd.f32 %v6705_v25, %v2565_v7  ;;  %4343 = vmatmul.mubr.msk.f32.gmra.mxu1 %vm2302_vm7, %v2287_v37  ;;  %v2885_v5 = vmax.f32 %v2571_v55, 0.0 }
 0x354   :  { %4345 = vmatprep.mubr.msk.f32.mxu1 %vm2302_vm7, %v2288_v61 }
 0x355   :  { %v2884_v17 = vmax.f32 %v2566_v23, 0.0  ;;  %v1911_v13 = vpop.permute.xlu0 %1910 }
 0x356   :  { %v2224_v59 = vsel %vm2160_vm6, %v6550_v46, %v1911_v13 }
 0x357   :  { %4350 = vmatprep.mubr.msk.f32.mxu0 %vm1590_vm3, %v2884_v17  ;;  %v2289_v45 = vsel %vm2225_vm8, %v2224_v59, %v7342_v48 }
 0x358   :  { %4351 = vmatmul.mubr.msk.f32.vlgmr.msra.gmra.mxu0 %vm1590_vm3, %v2885_v5  ;;  %4346 = vmatmul.mubr.msk.f32.gmra.mxu1 %vm2302_vm7, %v2289_v45 }
 0x359   :  { %v4257_v53 = vpop.f32.mrf.mxu1 }
 0x35a   :  { %v2581_v19 = vadd.f32 %v4257_v53, %v6705_v25 }
 0x35b   :  { %v2575_v43 = vpop.f32.mrf.mxu1 }
 0x35c   :  { %v2576_v15 = vadd.f32 %v6705_v25, %v2575_v43  ;;  %v2887_v54 = vmax.f32 %v2581_v19, 0.0 }
 0x35e   :  { %v2886_v60 = vmax.f32 %v2576_v15, 0.0 }
 0x360   :  { %4353 = vmatprep.mubr.msk.f32.mxu0 %vm1590_vm3, %v2886_v60 }
 0x361   :  { %4354 = vmatmul.mubr.msk.f32.gmra.mxu0 %vm1590_vm3, %v2887_v54 }
 0x365   :  { %v4260_v46 = vpop.f32.mrf.mxu1 }
 0x366   :  { %v2591_v62 = vadd.f32 %v4260_v46, %v6705_v25 }
 0x367   :  { %v2585_v48 = vpop.f32.mrf.mxu1 }
 0x368   :  { %v2586_v30 = vadd.f32 %v6705_v25, %v2585_v48  ;;  %v2889_v33 = vmax.f32 %v2591_v62, 0.0 }
 0x369   :  { %v4263_v3 = vpop.f32.mrf.mxu1 }
 0x36a   :  { %v2888_v1 = vmax.f32 %v2586_v30, 0.0  ;;  %v2601_v34 = vadd.f32 %v4263_v3, %v6705_v25 }
 0x36b   :  { %v2595_v14 = vpop.f32.mrf.mxu1 }
 0x36c   :  { %v2596_v49 = vadd.f32 %v6705_v25, %v2595_v14  ;;  %4356 = vmatprep.mubr.msk.f32.mxu0 %vm1590_vm3, %v2888_v1  ;;  %v2891_v18 = vmax.f32 %v2601_v34, 0.0 }
 0x36d   :  { %v4266_v36 = vpop.f32.mrf.mxu1  ;;  %4357 = vmatmul.mubr.msk.f32.gmra.mxu0 %vm1590_vm3, %v2889_v33 }
 0x36e   :  { %v2890_v20 = vmax.f32 %v2596_v49, 0.0  ;;  %v2611_v44 = vadd.f32 %v4266_v36, %v6705_v25 }
 0x36f   :  { %v2605_v12 = vpop.f32.mrf.mxu1 }
 0x370   :  { %v2606_v28 = vadd.f32 %v6705_v25, %v2605_v12  ;;  %4359 = vmatprep.mubr.msk.f32.mxu0 %vm1590_vm3, %v2890_v20  ;;  %v2893_v26 = vmax.f32 %v2611_v44, 0.0 }
 0x371   :  { %v4269_v11 = vpop.f32.mrf.mxu1  ;;  %4360 = vmatmul.mubr.msk.f32.gmra.mxu0 %vm1590_vm3, %v2891_v18 }
 0x372   :  { %v2892_v21 = vmax.f32 %v2606_v28, 0.0  ;;  %v2621_v52 = vadd.f32 %v4269_v11, %v6705_v25 }
 0x373   :  { %v2615_v8 = vpop.f32.mrf.mxu1 }
 0x374   :  { %v2616_v58 = vadd.f32 %v6705_v25, %v2615_v8  ;;  %4362 = vmatprep.mubr.msk.f32.mxu0 %vm1590_vm3, %v2892_v21  ;;  %v2895_v10 = vmax.f32 %v2621_v52, 0.0 }
 0x375   :  { %v4272_v22 = vpop.f32.mrf.mxu1  ;;  %4363 = vmatmul.mubr.msk.f32.gmra.mxu0 %vm1590_vm3, %v2893_v26 }
 0x376   :  { %v2894_v63 = vmax.f32 %v2616_v58, 0.0  ;;  %v2631_v39 = vadd.f32 %v4272_v22, %v6705_v25 }
 0x377   :  { %v2625_v9 = vpop.f32.mrf.mxu1 }
 0x378   :  { %v2626_v41 = vadd.f32 %v6705_v25, %v2625_v9  ;;  %4365 = vmatprep.mubr.msk.f32.mxu0 %vm1590_vm3, %v2894_v63  ;;  %v2897_v31 = vmax.f32 %v2631_v39, 0.0 }
 0x379   :  { %v4275_v32 = vpop.f32.mrf.mxu1  ;;  %4366 = vmatmul.mubr.msk.f32.gmra.mxu0 %vm1590_vm3, %v2895_v10 }
 0x37a   :  { %v2896_v51 = vmax.f32 %v2626_v41, 0.0  ;;  %v2641_v0 = vadd.f32 %v4275_v32, %v6705_v25 }
 0x37b   :  { %v2635_v6 = vpop.f32.mrf.mxu1 }
 0x37c   :  { %v2636_v27 = vadd.f32 %v6705_v25, %v2635_v6  ;;  %4368 = vmatprep.mubr.msk.f32.mxu0 %vm1590_vm3, %v2896_v51  ;;  %v2899_v40 = vmax.f32 %v2641_v0, 0.0 }
 0x37d   :  { %v4278_v57 = vpop.f32.mrf.mxu1  ;;  %4369 = vmatmul.mubr.msk.f32.gmra.mxu0 %vm1590_vm3, %v2897_v31 }
 0x37e   :  { %v2898_v38 = vmax.f32 %v2636_v27, 0.0  ;;  %v2651_v50 = vadd.f32 %v4278_v57, %v6705_v25 }
 0x37f   :  { %v2645_v29 = vpop.f32.mrf.mxu1 }
 0x380   :  { %v2646_v56 = vadd.f32 %v6705_v25, %v2645_v29  ;;  %4371 = vmatprep.mubr.msk.f32.mxu0 %vm1590_vm3, %v2898_v38  ;;  %v2901_v2 = vmax.f32 %v2651_v50, 0.0 }
 0x381   :  { %v4281_v42 = vpop.f32.mrf.mxu1  ;;  %4372 = vmatmul.mubr.msk.f32.gmra.mxu0 %vm1590_vm3, %v2899_v40 }
 0x382   :  { %v2900_v35 = vmax.f32 %v2646_v56, 0.0  ;;  %v2661_v47 = vadd.f32 %v4281_v42, %v6705_v25 }
 0x383   :  { %v2655_v16 = vpop.f32.mrf.mxu1 }
 0x384   :  { %v2656_v4 = vadd.f32 %v6705_v25, %v2655_v16  ;;  %4374 = vmatprep.mubr.msk.f32.mxu0 %vm1590_vm3, %v2900_v35  ;;  %v2903_v37 = vmax.f32 %v2661_v47, 0.0 }
 0x385   :  { %v4284_v24 = vpop.f32.mrf.mxu1  ;;  %4375 = vmatmul.mubr.msk.f32.gmra.mxu0 %vm1590_vm3, %v2901_v2 }
 0x386   :  { %v2902_v55 = vmax.f32 %v2656_v4, 0.0  ;;  %v2671_v7 = vadd.f32 %v4284_v24, %v6705_v25 }
 0x387   :  { %v2665_v23 = vpop.f32.mrf.mxu1 }
 0x388   :  { %v2666_v61 = vadd.f32 %v6705_v25, %v2665_v23  ;;  %4377 = vmatprep.mubr.msk.f32.mxu0 %vm1590_vm3, %v2902_v55  ;;  %v2905_v5 = vmax.f32 %v2671_v7, 0.0 }
 0x389   :  { %v4287_v17 = vpop.f32.mrf.mxu1  ;;  %4378 = vmatmul.mubr.msk.f32.gmra.mxu0 %vm1590_vm3, %v2903_v37 }
 0x38a   :  { %v2904_v13 = vmax.f32 %v2666_v61, 0.0  ;;  %v2681_v59 = vadd.f32 %v4287_v17, %v6705_v25 }
 0x38b   :  { %v2675_v45 = vpop.f32.mrf.mxu1 }
 0x38c   :  { %v2676_v53 = vadd.f32 %v6705_v25, %v2675_v45  ;;  %4380 = vmatprep.mubr.msk.f32.mxu0 %vm1590_vm3, %v2904_v13  ;;  %v2907_v15 = vmax.f32 %v2681_v59, 0.0 }
 0x38d   :  { %v4290_v19 = vpop.f32.mrf.mxu1  ;;  %4381 = vmatmul.mubr.msk.f32.gmra.mxu0 %vm1590_vm3, %v2905_v5 }
 0x38e   :  { %v2906_v43 = vmax.f32 %v2676_v53, 0.0  ;;  %v2691_v60 = vadd.f32 %v4290_v19, %v6705_v25 }
 0x38f   :  { %v2685_v54 = vpop.f32.mrf.mxu1 }
 0x390   :  { %v2686_v46 = vadd.f32 %v6705_v25, %v2685_v54  ;;  %4383 = vmatprep.mubr.msk.f32.mxu0 %vm1590_vm3, %v2906_v43  ;;  %v2909_v30 = vmax.f32 %v2691_v60, 0.0 }
 0x391   :  { %v4293_v62 = vpop.f32.mrf.mxu1  ;;  %4384 = vmatmul.mubr.msk.f32.gmra.mxu0 %vm1590_vm3, %v2907_v15 }
 0x392   :  { %v2908_v48 = vmax.f32 %v2686_v46, 0.0  ;;  %v2701_v3 = vadd.f32 %v4293_v62, %v6705_v25 }
 0x393   :  { %v2695_v1 = vpop.f32.mrf.mxu1 }
 0x394   :  { %v2696_v33 = vadd.f32 %v6705_v25, %v2695_v1  ;;  %4386 = vmatprep.mubr.msk.f32.mxu0 %vm1590_vm3, %v2908_v48  ;;  %v2911_v14 = vmax.f32 %v2701_v3, 0.0 }
 0x395   :  { %4387 = vmatmul.mubr.msk.f32.gmra.mxu0 %vm1590_vm3, %v2909_v30 }
 0x396   :  { %v2910_v34 = vmax.f32 %v2696_v33, 0.0 }
 0x398   :  { %4389 = vmatprep.mubr.msk.f32.mxu0 %vm1590_vm3, %v2910_v34 }
 0x399   :  { %4390 = vmatmul.mubr.msk.f32.gmra.mxu0 %vm1590_vm3, %v2911_v14 }
 0x39b   :  { %v4296_v49 = vpop.f32.mrf.mxu1 }
 0x39c   :  { %v2711_v36 = vadd.f32 %v4296_v49, %v6705_v25 }
 0x39d   :  { %v2705_v20 = vpop.f32.mrf.mxu1 }
 0x39e   :  { %v2706_v18 = vadd.f32 %v6705_v25, %v2705_v20  ;;  %v2913_v12 = vmax.f32 %v2711_v36, 0.0 }
 0x3a0   :  { %v2912_v44 = vmax.f32 %v2706_v18, 0.0 }
 0x3a2   :  { %4392 = vmatprep.mubr.msk.f32.mxu0 %vm1590_vm3, %v2912_v44 }
 0x3a3   :  { %4393 = vmatmul.mubr.msk.f32.gmra.mxu0 %vm1590_vm3, %v2913_v12 }
 0x3a5   :  { %v4299_v28 = vpop.f32.mrf.mxu1 }
 0x3a6   :  { %v2721_v11 = vadd.f32 %v4299_v28, %v6705_v25 }
 0x3a7   :  { %v2715_v21 = vpop.f32.mrf.mxu1 }
 0x3a8   :  { %v2716_v26 = vadd.f32 %v6705_v25, %v2715_v21  ;;  %v2915_v58 = vmax.f32 %v2721_v11, 0.0 }
 0x3a9   :  { %v4302_v52 = vpop.f32.mrf.mxu1 }
 0x3aa   :  { %v2914_v8 = vmax.f32 %v2716_v26, 0.0  ;;  %v2731_v22 = vadd.f32 %v4302_v52, %v6705_v25 }
 0x3ab   :  { %v2725_v63 = vpop.f32.mrf.mxu1 }
 0x3ac   :  { %v2726_v10 = vadd.f32 %v6705_v25, %v2725_v63  ;;  %4395 = vmatprep.mubr.msk.f32.mxu0 %vm1590_vm3, %v2914_v8  ;;  %v2917_v41 = vmax.f32 %v2731_v22, 0.0 }
 0x3ad   :  { %v4305_v39 = vpop.f32.mrf.mxu1  ;;  %4396 = vmatmul.mubr.msk.f32.gmra.mxu0 %vm1590_vm3, %v2915_v58 }
 0x3ae   :  { %v2916_v9 = vmax.f32 %v2726_v10, 0.0  ;;  %v2741_v32 = vadd.f32 %v4305_v39, %v6705_v25 }
 0x3af   :  { %v2735_v51 = vpop.f32.mrf.mxu1 }
 0x3b0   :  { %v2736_v31 = vadd.f32 %v6705_v25, %v2735_v51  ;;  %4398 = vmatprep.mubr.msk.f32.mxu0 %vm1590_vm3, %v2916_v9  ;;  %v2919_v6 = vmax.f32 %v2741_v32, 0.0 }
 0x3b1   :  { %4399 = vmatmul.mubr.msk.f32.gmra.mxu0 %vm1590_vm3, %v2917_v41 }
 0x3b2   :  { %v2918_v0 = vmax.f32 %v2736_v31, 0.0 }
 0x3b3   :  { %v4308_v27 = vpop.f32.mrf.mxu1 }
 0x3b4   :  { %4401 = vmatprep.mubr.msk.f32.mxu0 %vm1590_vm3, %v2918_v0  ;;  %v2751_v57 = vadd.f32 %v4308_v27, %v6705_v25 }
 0x3b5   :  { %v2745_v38 = vpop.f32.mrf.mxu1  ;;  %4402 = vmatmul.mubr.msk.f32.gmra.mxu0 %vm1590_vm3, %v2919_v6 }
 0x3b6   :  { %v2746_v40 = vadd.f32 %v6705_v25, %v2745_v38  ;;  %v2921_v29 = vmax.f32 %v2751_v57, 0.0 }
 0x3b8   :  { %v2920_v50 = vmax.f32 %v2746_v40, 0.0 }
 0x3ba   :  { %4404 = vmatprep.mubr.msk.f32.mxu0 %vm1590_vm3, %v2920_v50 }
 0x3bb   :  { %v4311_v56 = vpop.f32.mrf.mxu1  ;;  %4405 = vmatmul.mubr.msk.f32.gmra.mxu0 %vm1590_vm3, %v2921_v29 }
 0x3bc   :  { %v2761_v42 = vadd.f32 %v4311_v56, %v6705_v25 }
 0x3bd   :  { %v2755_v35 = vpop.f32.mrf.mxu1 }
 0x3be   :  { %v2756_v2 = vadd.f32 %v6705_v25, %v2755_v35  ;;  %v2923_v16 = vmax.f32 %v2761_v42, 0.0 }
 0x3c0   :  { %v2922_v47 = vmax.f32 %v2756_v2, 0.0 }
 0x3c2   :  { %4407 = vmatprep.mubr.msk.f32.mxu0 %vm1590_vm3, %v2922_v47 }
 0x3c3   :  { %v4314_v4 = vpop.f32.mrf.mxu1  ;;  %4408 = vmatmul.mubr.msk.f32.gmra.mxu0 %vm1590_vm3, %v2923_v16 }
 0x3c4   :  { %v2771_v24 = vadd.f32 %v4314_v4, %v6705_v25 }
 0x3c5   :  { %v2765_v55 = vpop.f32.mrf.mxu1 }
 0x3c6   :  { %v2766_v37 = vadd.f32 %v6705_v25, %v2765_v55  ;;  %v2925_v23 = vmax.f32 %v2771_v24, 0.0  ;;  %v6846_v24 = vld [vmem:[%s6994_s6] ss:$0 sm:$0xff]  ;;  %s4574_s6 = smov [#allocation5]  }
 0x3c7   :  { %s3733_s8 = sshll.u32 %s4574_s6, 4  ;;  %s3734_s8 = int_to_ptr.vmem [resolvable:$true] %s3733_s8 }
 0x3c8   :  { %v2924_v7 = vmax.f32 %v2766_v37, 0.0  ;;  %s4543_s9 = scalar_lea.vmem %s3734_s8, 8192  ;;  %p4548_p6 = scmp.lt.s32.totalorder %s3734_s8, %s3734_s8 }
 0x3c9   :  { %p4544_p5 = scmp.ne.s32.totalorder %s3734_s8, %s4543_s9  ;;  %p4549_p7 = scmp.lt.s32.totalorder %s4543_s9, %s4543_s9 }
 0x3ca   :  { %4410 = vmatprep.mubr.msk.f32.mxu0 %vm1590_vm3, %v2924_v7 }
 0x3cb   :  { %v4317_v61 = vpop.f32.mrf.mxu1  ;;  %4411 = vmatmul.mubr.msk.f32.gmra.mxu0 %vm1590_vm3, %v2925_v23  ;;  %p4550_p8 = por %p4549_p7, %p4548_p6 }
 0x3cc   :  { %v2781_v17 = vadd.f32 %v4317_v61, %v6705_v25 }
 0x3cd   :  { %v2775_v13 = vpop.f32.mrf.mxu1  ;;  %p4551_p9 = pnand %p4550_p8, %p4544_p5 }
 0x3ce   :  { %v2776_v5 = vadd.f32 %v6705_v25, %v2775_v13  ;;  %v2927_v45 = vmax.f32 %v2781_v17, 0.0 }
 0x3d0   :  { %v2926_v59 = vmax.f32 %v2776_v5, 0.0 }
 0x3d2   :  { %4413 = vmatprep.mubr.msk.f32.mxu0 %vm1590_vm3, %v2926_v59  ;;  %v4459_v59 = vld [vmem:[#allocation2 + $0x8] sm:$0xff] }
 0x3d3   :  { %v4320_v53 = vpop.f32.mrf.mxu1  ;;  %4414 = vmatmul.mubr.msk.f32.gmra.mxu0 %vm1590_vm3, %v2927_v45 }
 0x3d4   :  { %v2791_v19 = vadd.f32 %v4320_v53, %v6705_v25 }
 0x3d5   :  { %v2785_v43 = vpop.f32.mrf.mxu1 }
 0x3d6   :  { %v2786_v15 = vadd.f32 %v6705_v25, %v2785_v43  ;;  %v2929_v54 = vmax.f32 %v2791_v19, 0.0 }
 0x3d8   :  { %v2928_v60 = vmax.f32 %v2786_v15, 0.0  ;;  %v4460_v15 = vld [vmem:[#allocation2] sm:$0xff] }
 0x3da   :  { %4416 = vmatprep.mubr.msk.f32.mxu0 %vm1590_vm3, %v2928_v60 }
 0x3db   :  { %v4323_v46 = vpop.f32.mrf.mxu1  ;;  %4417 = vmatmul.mubr.msk.f32.gmra.mxu0 %vm1590_vm3, %v2929_v54 }
 0x3dc   :  { %v2801_v62 = vadd.f32 %v4323_v46, %v6705_v25 }
 0x3dd   :  { %v2795_v48 = vpop.f32.mrf.mxu1 }
 0x3de   :  { %v2796_v30 = vadd.f32 %v6705_v25, %v2795_v48  ;;  %v2931_v1 = vmax.f32 %v2801_v62, 0.0 }
 0x3e0   :  { %v2930_v3 = vmax.f32 %v2796_v30, 0.0 }
 0x3e2   :  { %4419 = vmatprep.mubr.msk.f32.mxu0 %vm1590_vm3, %v2930_v3  ;;  %v4461_v3 = vld [vmem:[#allocation2 + $0x18] sm:$0xff] }
 0x3e3   :  { %v4326_v33 = vpop.f32.mrf.mxu1  ;;  %4420 = vmatmul.mubr.msk.f32.gmra.mxu0 %vm1590_vm3, %v2931_v1 }
 0x3e4   :  { %v2811_v34 = vadd.f32 %v4326_v33, %v6705_v25 }
 0x3e5   :  { %v2805_v14 = vpop.f32.mrf.mxu1 }
 0x3e6   :  { %v2806_v49 = vadd.f32 %v6705_v25, %v2805_v14  ;;  %v2933_v20 = vmax.f32 %v2811_v34, 0.0  ;;  %v4462_v14 = vld [vmem:[#allocation2 + $0x10] sm:$0xff] }
 0x3e8   :  { %v2932_v36 = vmax.f32 %v2806_v49, 0.0 }
 0x3ea   :  { %4422 = vmatprep.mubr.msk.f32.mxu0 %vm1590_vm3, %v2932_v36 }
 0x3eb   :  { %v4329_v18 = vpop.f32.mrf.mxu1  ;;  %4423 = vmatmul.mubr.msk.f32.gmra.mxu0 %vm1590_vm3, %v2933_v20 }
 0x3ec   :  { %v2821_v44 = vadd.f32 %v4329_v18, %v6705_v25 }
 0x3ed   :  { %v2815_v12 = vpop.f32.mrf.mxu1 }
 0x3ee   :  { %v2816_v28 = vadd.f32 %v6705_v25, %v2815_v12  ;;  %v2935_v21 = vmax.f32 %v2821_v44, 0.0  ;;  %v4463_v12 = vld [vmem:[#allocation2 + $0x28] sm:$0xff] }
 0x3f0   :  { %v2934_v11 = vmax.f32 %v2816_v28, 0.0 }
 0x3f2   :  { %4425 = vmatprep.mubr.msk.f32.mxu0 %vm1590_vm3, %v2934_v11 }
 0x3f3   :  { %v4332_v26 = vpop.f32.mrf.mxu1  ;;  %4426 = vmatmul.mubr.msk.f32.gmra.mxu0 %vm1590_vm3, %v2935_v21 }
 0x3f4   :  { %v2831_v52 = vadd.f32 %v4332_v26, %v6705_v25 }
 0x3f5   :  { %v2825_v8 = vpop.f32.mrf.mxu1 }
 0x3f6   :  { %v2826_v58 = vadd.f32 %v6705_v25, %v2825_v8  ;;  %v2937_v63 = vmax.f32 %v2831_v52, 0.0  ;;  %v4464_v52 = vld [vmem:[#allocation2 + $0x20] sm:$0xff] }
 0x3f8   :  { %v2936_v22 = vmax.f32 %v2826_v58, 0.0 }
 0x3fa   :  { %4428 = vmatprep.mubr.msk.f32.mxu0 %vm1590_vm3, %v2936_v22 }
 0x3fb   :  { %v4335_v10 = vpop.f32.mrf.mxu1  ;;  %4429 = vmatmul.mubr.msk.f32.gmra.mxu0 %vm1590_vm3, %v2937_v63 }
 0x3fc   :  { %v2841_v39 = vadd.f32 %v4335_v10, %v6705_v25  ;;  %v4465_v10 = vld [vmem:[#allocation2 + $0x38] sm:$0xff] }
 0x3fd   :  { %v2835_v9 = vpop.f32.mrf.mxu1 }
 0x3fe   :  { %v2836_v41 = vadd.f32 %v6705_v25, %v2835_v9  ;;  %v2939_v51 = vmax.f32 %v2841_v39, 0.0 }
 0x400   :  { %v2938_v32 = vmax.f32 %v2836_v41, 0.0 }
 0x402   :  { %4431 = vmatprep.mubr.msk.f32.mxu0 %vm1590_vm3, %v2938_v32 }
 0x403   :  { %v4338_v31 = vpop.f32.mrf.mxu1  ;;  %4432 = vmatmul.mubr.msk.f32.gmra.mxu0 %vm1590_vm3, %v2939_v51  ;;  %v4466_v51 = vld [vmem:[#allocation2 + $0x30] sm:$0xff] }
 0x404   :  { %v2851_v0 = vadd.f32 %v4338_v31, %v6705_v25 }
 0x405   :  { %v2845_v6 = vpop.f32.mrf.mxu1 }
 0x406   :  { %v2846_v27 = vadd.f32 %v6705_v25, %v2845_v6  ;;  %v2941_v38 = vmax.f32 %v2851_v0, 0.0 }
 0x408   :  { %v2940_v57 = vmax.f32 %v2846_v27, 0.0 }
 0x40a   :  { %4434 = vmatprep.mubr.msk.f32.mxu0 %vm1590_vm3, %v2940_v57  ;;  %v4467_v57 = vld [vmem:[#allocation2 + $0x48] sm:$0xff] }
 0x40b   :  { %v4341_v40 = vpop.f32.mrf.mxu1  ;;  %4435 = vmatmul.mubr.msk.f32.gmra.mxu0 %vm1590_vm3, %v2941_v38 }
 0x40c   :  { %v2861_v50 = vadd.f32 %v4341_v40, %v6705_v25 }
 0x40d   :  { %v2855_v29 = vpop.f32.mrf.mxu1 }
 0x40e   :  { %v2856_v56 = vadd.f32 %v6705_v25, %v2855_v29  ;;  %v2943_v35 = vmax.f32 %v2861_v50, 0.0 }
 0x410   :  { %v2942_v42 = vmax.f32 %v2856_v56, 0.0  ;;  %v4468_v56 = vld [vmem:[#allocation2 + $0x40] sm:$0xff] }
 0x412   :  { %4437 = vmatprep.mubr.msk.f32.mxu0 %vm1590_vm3, %v2942_v42 }
 0x413   :  { %v4344_v2 = vpop.f32.mrf.mxu1  ;;  %4438 = vmatmul.mubr.msk.f32.gmra.mxu0 %vm1590_vm3, %v2943_v35 }
 0x414   :  { %v2871_v47 = vadd.f32 %v4344_v2, %v6705_v25 }
 0x415   :  { %v2865_v16 = vpop.f32.mrf.mxu1 }
 0x416   :  { %v2866_v4 = vadd.f32 %v6705_v25, %v2865_v16  ;;  %v2945_v23 = vmax.f32 %v2871_v47, 0.0  ;;  %v4469_v16 = vld [vmem:[#allocation2 + $0x58] sm:$0xff] }
 0x418   :  { %v2944_v55 = vmax.f32 %v2866_v4, 0.0  ;;  %v4352_v37 = vpop.f32.mrf.mxu0  ;;  %v4347_v7 = vpop.f32.mrf.mxu1 }
 0x419   :  { %v3223_v61 = vadd.f32 %v4352_v37, %v6846_v24  ;;  %v2881_v17 = vadd.f32 %v4347_v7, %v6705_v25 }
 0x41a   :  { %v3217_v13 = vpop.f32.mrf.mxu0  ;;  %v2875_v5 = vpop.f32.mrf.mxu1  ;;  %4440 = vmatprep.mubr.msk.f32.mxu0 %vm1590_vm3, %v2944_v55 }
 0x41b   :  { %v3537_v45 = vadd.f32 %v4459_v59, %v3223_v61  ;;  %v3218_v53 = vadd.f32 %v6846_v24, %v3217_v13  ;;  %v2876_v19 = vadd.f32 %v6705_v25, %v2875_v5  ;;  %4441 = vmatmul.mubr.msk.f32.gmra.mxu0 %vm1590_vm3, %v2945_v23  ;;  %v2947_v46 = vmax.f32 %v2881_v17, 0.0  ;;  %v4470_v23 = vld [vmem:[#allocation2 + $0x50] sm:$0xff]  ;;  %v4471_v59 = vld [vmem:[#allocation2 + $0x68] sm:$0xff] }
 0x41d   :  { %v3601_v43 = vmax.f32 %v3537_v45, 0.0  ;;  %v3536_v60 = vadd.f32 %v4460_v15, %v3218_v53  ;;  %v2946_v54 = vmax.f32 %v2876_v19, 0.0  ;;  %v4472_v15 = vld [vmem:[#allocation2 + $0x60] sm:$0xff] }
 0x41f   :  { %3665 = vst.msk [vmem:[#allocation5 + $0x8] sm:$0xff] %vm114_vm0, %v3601_v43  ;;  %v3600_v62 = vmax.f32 %v3536_v60, 0.0  ;;  %4443 = vmatprep.mubr.msk.f32.mxu0 %vm1590_vm3, %v2946_v54 }
 0x420   :  { %4444 = vmatmul.mubr.msk.f32.gmra.mxu0 %vm1590_vm3, %v2947_v46 }
 0x421   :  { %3664 = vst.msk [vmem:[#allocation5] sm:$0xff] %vm114_vm0, %v3600_v62  ;;  %v4355_v48 = vpop.f32.mrf.mxu0 }
 0x422   :  { %v3233_v30 = vadd.f32 %v4355_v48, %v6846_v24  ;;  %v4473_v48 = vld [vmem:[#allocation2 + $0x78] sm:$0xff] }
 0x423   :  { %v3227_v25 = vpop.f32.mrf.mxu0 }
 0x424   :  { %v3539_v1 = vadd.f32 %v4461_v3, %v3233_v30  ;;  %v3228_v33 = vadd.f32 %v6846_v24, %v3227_v25 }
 0x426   :  { %v3603_v34 = vmax.f32 %v3539_v1, 0.0  ;;  %v3538_v49 = vadd.f32 %v4462_v14, %v3228_v33  ;;  %v4474_v33 = vld [vmem:[#allocation2 + $0x70] sm:$0xff] }
 0x428   :  { %3667 = vst.msk [vmem:[#allocation5 + $0x18] sm:$0xff] %vm114_vm0, %v3603_v34  ;;  %v3602_v36 = vmax.f32 %v3538_v49, 0.0 }
 0x42a   :  { %3666 = vst.msk [vmem:[#allocation5 + $0x10] sm:$0xff] %vm114_vm0, %v3602_v36 }
 0x42d   :  { %v4358_v20 = vpop.f32.mrf.mxu0 }
 0x42e   :  { %v3243_v18 = vadd.f32 %v4358_v20, %v6846_v24  ;;  %v4475_v20 = vld [vmem:[#allocation2 + $0x88] sm:$0xff] }
 0x42f   :  { %v3237_v44 = vpop.f32.mrf.mxu0 }
 0x430   :  { %v3541_v28 = vadd.f32 %v4463_v12, %v3243_v18  ;;  %v3238_v11 = vadd.f32 %v6846_v24, %v3237_v44 }
 0x431   :  { %v4361_v21 = vpop.f32.mrf.mxu0 }
 0x432   :  { %v3605_v26 = vmax.f32 %v3541_v28, 0.0  ;;  %v3540_v8 = vadd.f32 %v4464_v52, %v3238_v11  ;;  %v3253_v58 = vadd.f32 %v4361_v21, %v6846_v24  ;;  %v4476_v11 = vld [vmem:[#allocation2 + $0x80] sm:$0xff] }
 0x433   :  { %v3247_v22 = vpop.f32.mrf.mxu0 }
 0x434   :  { %3669 = vst.msk [vmem:[#allocation5 + $0x28] sm:$0xff] %vm114_vm0, %v3605_v26  ;;  %v3604_v63 = vmax.f32 %v3540_v8, 0.0  ;;  %v3543_v39 = vadd.f32 %v4465_v10, %v3253_v58  ;;  %v3248_v9 = vadd.f32 %v6846_v24, %v3247_v22  ;;  %v4477_v58 = vld [vmem:[#allocation2 + $0x98] sm:$0xff] }
 0x435   :  { %v4364_v41 = vpop.f32.mrf.mxu0 }
 0x436   :  { %3668 = vst.msk [vmem:[#allocation5 + $0x20] sm:$0xff] %vm114_vm0, %v3604_v63  ;;  %v3607_v32 = vmax.f32 %v3543_v39, 0.0  ;;  %v3542_v31 = vadd.f32 %v4466_v51, %v3248_v9  ;;  %v3263_v0 = vadd.f32 %v4364_v41, %v6846_v24  ;;  %v4478_v9 = vld [vmem:[#allocation2 + $0x90] sm:$0xff] }
 0x437   :  { %v3257_v6 = vpop.f32.mrf.mxu0 }
 0x438   :  { %3671 = vst.msk [vmem:[#allocation5 + $0x38] sm:$0xff] %vm114_vm0, %v3607_v32  ;;  %v3606_v27 = vmax.f32 %v3542_v31, 0.0  ;;  %v3545_v38 = vadd.f32 %v4467_v57, %v3263_v0  ;;  %v3258_v40 = vadd.f32 %v6846_v24, %v3257_v6  ;;  %v4479_v0 = vld [vmem:[#allocation2 + $0xa8] sm:$0xff] }
 0x439   :  { %v4367_v50 = vpop.f32.mrf.mxu0 }
 0x43a   :  { %3670 = vst.msk [vmem:[#allocation5 + $0x30] sm:$0xff] %vm114_vm0, %v3606_v27  ;;  %v3609_v29 = vmax.f32 %v3545_v38, 0.0  ;;  %v3544_v42 = vadd.f32 %v4468_v56, %v3258_v40  ;;  %v3273_v35 = vadd.f32 %v4367_v50, %v6846_v24  ;;  %v4480_v40 = vld [vmem:[#allocation2 + $0xa0] sm:$0xff] }
 0x43b   :  { %v3267_v2 = vpop.f32.mrf.mxu0 }
 0x43c   :  { %3673 = vst.msk [vmem:[#allocation5 + $0x48] sm:$0xff] %vm114_vm0, %v3609_v29  ;;  %v3608_v47 = vmax.f32 %v3544_v42, 0.0  ;;  %v3547_v4 = vadd.f32 %v4469_v16, %v3273_v35  ;;  %v3268_v55 = vadd.f32 %v6846_v24, %v3267_v2  ;;  %v4481_v35 = vld [vmem:[#allocation2 + $0xb8] sm:$0xff] }
 0x43d   :  { %v4370_v37 = vpop.f32.mrf.mxu0 }
 0x43e   :  { %3672 = vst.msk [vmem:[#allocation5 + $0x40] sm:$0xff] %vm114_vm0, %v3608_v47  ;;  %v3611_v7 = vmax.f32 %v3547_v4, 0.0  ;;  %v3546_v61 = vadd.f32 %v4470_v23, %v3268_v55  ;;  %v3283_v17 = vadd.f32 %v4370_v37, %v6846_v24  ;;  %v4482_v55 = vld [vmem:[#allocation2 + $0xb0] sm:$0xff] }
 0x43f   :  { %v3277_v13 = vpop.f32.mrf.mxu0 }
 0x440   :  { %3675 = vst.msk [vmem:[#allocation5 + $0x58] sm:$0xff] %vm114_vm0, %v3611_v7  ;;  %v3610_v5 = vmax.f32 %v3546_v61, 0.0  ;;  %v3549_v45 = vadd.f32 %v4471_v59, %v3283_v17  ;;  %v3278_v53 = vadd.f32 %v6846_v24, %v3277_v13  ;;  %v4483_v17 = vld [vmem:[#allocation2 + $0xc8] sm:$0xff] }
 0x441   :  { %v4373_v19 = vpop.f32.mrf.mxu0 }
 0x442   :  { %3674 = vst.msk [vmem:[#allocation5 + $0x50] sm:$0xff] %vm114_vm0, %v3610_v5  ;;  %v3613_v43 = vmax.f32 %v3549_v45, 0.0  ;;  %v3548_v60 = vadd.f32 %v4472_v15, %v3278_v53  ;;  %v3293_v54 = vadd.f32 %v4373_v19, %v6846_v24  ;;  %v4484_v53 = vld [vmem:[#allocation2 + $0xc0] sm:$0xff] }
 0x443   :  { %v3287_v46 = vpop.f32.mrf.mxu0 }
 0x444   :  { %3677 = vst.msk [vmem:[#allocation5 + $0x68] sm:$0xff] %vm114_vm0, %v3613_v43  ;;  %v3612_v62 = vmax.f32 %v3548_v60, 0.0  ;;  %v3551_v30 = vadd.f32 %v4473_v48, %v3293_v54  ;;  %v3288_v25 = vadd.f32 %v6846_v24, %v3287_v46  ;;  %v4485_v54 = vld [vmem:[#allocation2 + $0xd8] sm:$0xff] }
 0x445   :  { %v4376_v3 = vpop.f32.mrf.mxu0 }
 0x446   :  { %3676 = vst.msk [vmem:[#allocation5 + $0x60] sm:$0xff] %vm114_vm0, %v3612_v62  ;;  %v3615_v1 = vmax.f32 %v3551_v30, 0.0  ;;  %v3550_v34 = vadd.f32 %v4474_v33, %v3288_v25  ;;  %v3303_v14 = vadd.f32 %v4376_v3, %v6846_v24  ;;  %v4486_v30 = vld [vmem:[#allocation2 + $0xd0] sm:$0xff] }
 0x447   :  { %v3297_v49 = vpop.f32.mrf.mxu0 }
 0x448   :  { %3679 = vst.msk [vmem:[#allocation5 + $0x78] sm:$0xff] %vm114_vm0, %v3615_v1  ;;  %v3614_v36 = vmax.f32 %v3550_v34, 0.0  ;;  %v3553_v18 = vadd.f32 %v4475_v20, %v3303_v14  ;;  %v3298_v44 = vadd.f32 %v6846_v24, %v3297_v49  ;;  %v4487_v14 = vld [vmem:[#allocation2 + $0xe8] sm:$0xff] }
 0x449   :  { %v4379_v12 = vpop.f32.mrf.mxu0 }
 0x44a   :  { %3678 = vst.msk [vmem:[#allocation5 + $0x70] sm:$0xff] %vm114_vm0, %v3614_v36  ;;  %v3617_v28 = vmax.f32 %v3553_v18, 0.0  ;;  %v3552_v21 = vadd.f32 %v4476_v11, %v3298_v44  ;;  %v3313_v26 = vadd.f32 %v4379_v12, %v6846_v24  ;;  %v4488_v18 = vld [vmem:[#allocation2 + $0xe0] sm:$0xff] }
 0x44b   :  { %v3307_v52 = vpop.f32.mrf.mxu0 }
 0x44c   :  { %3681 = vst.msk [vmem:[#allocation5 + $0x88] sm:$0xff] %vm114_vm0, %v3617_v28  ;;  %v3616_v8 = vmax.f32 %v3552_v21, 0.0  ;;  %v3555_v22 = vadd.f32 %v4477_v58, %v3313_v26  ;;  %v3308_v63 = vadd.f32 %v6846_v24, %v3307_v52  ;;  %v4489_v26 = vld [vmem:[#allocation2 + $0xf8] sm:$0xff] }
 0x44d   :  { %v4382_v10 = vpop.f32.mrf.mxu0 }
 0x44e   :  { %3680 = vst.msk [vmem:[#allocation5 + $0x80] sm:$0xff] %vm114_vm0, %v3616_v8  ;;  %v3619_v39 = vmax.f32 %v3555_v22, 0.0  ;;  %v3554_v41 = vadd.f32 %v4478_v9, %v3308_v63  ;;  %v3323_v32 = vadd.f32 %v4382_v10, %v6846_v24  ;;  %v4490_v63 = vld [vmem:[#allocation2 + $0xf0] sm:$0xff] }
 0x44f   :  { %v3317_v51 = vpop.f32.mrf.mxu0 }
 0x450   :  { %3683 = vst.msk [vmem:[#allocation5 + $0x98] sm:$0xff] %vm114_vm0, %v3619_v39  ;;  %v3618_v31 = vmax.f32 %v3554_v41, 0.0  ;;  %v3557_v6 = vadd.f32 %v4479_v0, %v3323_v32  ;;  %v3318_v27 = vadd.f32 %v6846_v24, %v3317_v51  ;;  %v4491_v32 = vld [vmem:[#allocation2 + $0x108] sm:$0xff] }
 0x451   :  { %v4385_v57 = vpop.f32.mrf.mxu0 }
 0x452   :  { %3682 = vst.msk [vmem:[#allocation5 + $0x90] sm:$0xff] %vm114_vm0, %v3618_v31  ;;  %v3621_v38 = vmax.f32 %v3557_v6, 0.0  ;;  %v3556_v50 = vadd.f32 %v4480_v40, %v3318_v27  ;;  %v3333_v29 = vadd.f32 %v4385_v57, %v6846_v24  ;;  %v4492_v27 = vld [vmem:[#allocation2 + $0x100] sm:$0xff] }
 0x453   :  { %v3327_v56 = vpop.f32.mrf.mxu0 }
 0x454   :  { %3685 = vst.msk [vmem:[#allocation5 + $0xa8] sm:$0xff] %vm114_vm0, %v3621_v38  ;;  %v3620_v42 = vmax.f32 %v3556_v50, 0.0  ;;  %v3559_v2 = vadd.f32 %v4481_v35, %v3333_v29  ;;  %v3328_v47 = vadd.f32 %v6846_v24, %v3327_v56  ;;  %v4493_v29 = vld [vmem:[#allocation2 + $0x118] sm:$0xff] }
 0x455   :  { %v4388_v16 = vpop.f32.mrf.mxu0 }
 0x456   :  { %3684 = vst.msk [vmem:[#allocation5 + $0xa0] sm:$0xff] %vm114_vm0, %v3620_v42  ;;  %v3623_v4 = vmax.f32 %v3559_v2, 0.0  ;;  %v3558_v37 = vadd.f32 %v4482_v55, %v3328_v47  ;;  %v3343_v7 = vadd.f32 %v4388_v16, %v6846_v24  ;;  %v4494_v2 = vld [vmem:[#allocation2 + $0x110] sm:$0xff] }
 0x457   :  { %v3337_v23 = vpop.f32.mrf.mxu0 }
 0x458   :  { %3687 = vst.msk [vmem:[#allocation5 + $0xb8] sm:$0xff] %vm114_vm0, %v3623_v4  ;;  %v3622_v61 = vmax.f32 %v3558_v37, 0.0  ;;  %v3561_v13 = vadd.f32 %v4483_v17, %v3343_v7  ;;  %v3338_v5 = vadd.f32 %v6846_v24, %v3337_v23  ;;  %v4495_v7 = vld [vmem:[#allocation2 + $0x128] sm:$0xff] }
 0x459   :  { %v4391_v59 = vpop.f32.mrf.mxu0 }
 0x45a   :  { %3686 = vst.msk [vmem:[#allocation5 + $0xb0] sm:$0xff] %vm114_vm0, %v3622_v61  ;;  %v3625_v45 = vmax.f32 %v3561_v13, 0.0  ;;  %v3560_v19 = vadd.f32 %v4484_v53, %v3338_v5  ;;  %v3353_v43 = vadd.f32 %v4391_v59, %v6846_v24  ;;  %v4496_v13 = vld [vmem:[#allocation2 + $0x120] sm:$0xff] }
 0x45b   :  { %v3347_v15 = vpop.f32.mrf.mxu0 }
 0x45c   :  { %3689 = vst.msk [vmem:[#allocation5 + $0xc8] sm:$0xff] %vm114_vm0, %v3625_v45  ;;  %v3624_v60 = vmax.f32 %v3560_v19, 0.0  ;;  %v3563_v46 = vadd.f32 %v4485_v54, %v3353_v43  ;;  %v3348_v62 = vadd.f32 %v6846_v24, %v3347_v15  ;;  %v4497_v43 = vld [vmem:[#allocation2 + $0x138] sm:$0xff] }
 0x45e   :  { %3688 = vst.msk [vmem:[#allocation5 + $0xc0] sm:$0xff] %vm114_vm0, %v3624_v60  ;;  %v3627_v48 = vmax.f32 %v3563_v46, 0.0  ;;  %v3562_v25 = vadd.f32 %v4486_v30, %v3348_v62  ;;  %v4498_v46 = vld [vmem:[#allocation2 + $0x130] sm:$0xff] }
 0x460   :  { %3691 = vst.msk [vmem:[#allocation5 + $0xd8] sm:$0xff] %vm114_vm0, %v3627_v48  ;;  %v3626_v3 = vmax.f32 %v3562_v25, 0.0 }
 0x462   :  { %3690 = vst.msk [vmem:[#allocation5 + $0xd0] sm:$0xff] %vm114_vm0, %v3626_v3 }
 0x463   :  { %v4394_v1 = vpop.f32.mrf.mxu0 }
 0x464   :  { %v3363_v33 = vadd.f32 %v4394_v1, %v6846_v24  ;;  %v4499_v1 = vld [vmem:[#allocation2 + $0x148] sm:$0xff] }
 0x465   :  { %v3357_v34 = vpop.f32.mrf.mxu0 }
 0x466   :  { %v3565_v49 = vadd.f32 %v4487_v14, %v3363_v33  ;;  %v3358_v36 = vadd.f32 %v6846_v24, %v3357_v34 }
 0x468   :  { %v3629_v20 = vmax.f32 %v3565_v49, 0.0  ;;  %v3564_v44 = vadd.f32 %v4488_v18, %v3358_v36  ;;  %v4500_v49 = vld [vmem:[#allocation2 + $0x140] sm:$0xff] }
 0x46a   :  { %3693 = vst.msk [vmem:[#allocation5 + $0xe8] sm:$0xff] %vm114_vm0, %v3629_v20  ;;  %v3628_v12 = vmax.f32 %v3564_v44, 0.0 }
 0x46c   :  { %3692 = vst.msk [vmem:[#allocation5 + $0xe0] sm:$0xff] %vm114_vm0, %v3628_v12 }
 0x46d   :  { %v4397_v28 = vpop.f32.mrf.mxu0 }
 0x46e   :  { %v3373_v11 = vadd.f32 %v4397_v28, %v6846_v24  ;;  %v4501_v28 = vld [vmem:[#allocation2 + $0x158] sm:$0xff] }
 0x46f   :  { %v3367_v21 = vpop.f32.mrf.mxu0 }
 0x470   :  { %v3567_v52 = vadd.f32 %v4489_v26, %v3373_v11  ;;  %v3368_v8 = vadd.f32 %v6846_v24, %v3367_v21 }
 0x471   :  { %v4400_v58 = vpop.f32.mrf.mxu0 }
 0x472   :  { %v3631_v22 = vmax.f32 %v3567_v52, 0.0  ;;  %v3566_v10 = vadd.f32 %v4490_v63, %v3368_v8  ;;  %v3383_v39 = vadd.f32 %v4400_v58, %v6846_v24  ;;  %v4502_v52 = vld [vmem:[#allocation2 + $0x150] sm:$0xff] }
 0x473   :  { %v3377_v9 = vpop.f32.mrf.mxu0 }
 0x474   :  { %3695 = vst.msk [vmem:[#allocation5 + $0xf8] sm:$0xff] %vm114_vm0, %v3631_v22  ;;  %v3630_v41 = vmax.f32 %v3566_v10, 0.0  ;;  %v3569_v51 = vadd.f32 %v4491_v32, %v3383_v39  ;;  %v3378_v31 = vadd.f32 %v6846_v24, %v3377_v9  ;;  %v4503_v39 = vld [vmem:[#allocation2 + $0x168] sm:$0xff] }
 0x475   :  { %v4403_v0 = vpop.f32.mrf.mxu0 }
 0x476   :  { %3694 = vst.msk [vmem:[#allocation5 + $0xf0] sm:$0xff] %vm114_vm0, %v3630_v41  ;;  %v3633_v6 = vmax.f32 %v3569_v51, 0.0  ;;  %v3568_v57 = vadd.f32 %v4492_v27, %v3378_v31  ;;  %v3393_v38 = vadd.f32 %v4403_v0, %v6846_v24  ;;  %v4504_v51 = vld [vmem:[#allocation2 + $0x160] sm:$0xff] }
 0x477   :  { %v3387_v40 = vpop.f32.mrf.mxu0 }
 0x478   :  { %3697 = vst.msk [vmem:[#allocation5 + $0x108] sm:$0xff] %vm114_vm0, %v3633_v6  ;;  %v3632_v50 = vmax.f32 %v3568_v57, 0.0  ;;  %v3571_v56 = vadd.f32 %v4493_v29, %v3393_v38  ;;  %v3388_v42 = vadd.f32 %v6846_v24, %v3387_v40  ;;  %v4505_v38 = vld [vmem:[#allocation2 + $0x178] sm:$0xff] }
 0x47a   :  { %3696 = vst.msk [vmem:[#allocation5 + $0x100] sm:$0xff] %vm114_vm0, %v3632_v50  ;;  %v3635_v35 = vmax.f32 %v3571_v56, 0.0  ;;  %v3570_v47 = vadd.f32 %v4494_v2, %v3388_v42  ;;  %v4506_v56 = vld [vmem:[#allocation2 + $0x170] sm:$0xff] }
 0x47b   :  { %v4406_v16 = vpop.f32.mrf.mxu0 }
 0x47c   :  { %3699 = vst.msk [vmem:[#allocation5 + $0x118] sm:$0xff] %vm114_vm0, %v3635_v35  ;;  %v3634_v4 = vmax.f32 %v3570_v47, 0.0  ;;  %v3403_v55 = vadd.f32 %v4406_v16, %v6846_v24 }
 0x47d   :  { %v3397_v37 = vpop.f32.mrf.mxu0 }
 0x47e   :  { %3698 = vst.msk [vmem:[#allocation5 + $0x110] sm:$0xff] %vm114_vm0, %v3634_v4  ;;  %v3573_v23 = vadd.f32 %v4495_v7, %v3403_v55  ;;  %v3398_v61 = vadd.f32 %v6846_v24, %v3397_v37  ;;  %v4507_v4 = vld [vmem:[#allocation2 + $0x188] sm:$0xff] }
 0x480   :  { %v3637_v17 = vmax.f32 %v3573_v23, 0.0  ;;  %v3572_v5 = vadd.f32 %v4496_v13, %v3398_v61  ;;  %v4508_v23 = vld [vmem:[#allocation2 + $0x180] sm:$0xff] }
 0x482   :  { %3701 = vst.msk [vmem:[#allocation5 + $0x128] sm:$0xff] %vm114_vm0, %v3637_v17  ;;  %v3636_v59 = vmax.f32 %v3572_v5, 0.0 }
 0x483   :  { %v4409_v45 = vpop.f32.mrf.mxu0 }
 0x484   :  { %3700 = vst.msk [vmem:[#allocation5 + $0x120] sm:$0xff] %vm114_vm0, %v3636_v59  ;;  %v3413_v53 = vadd.f32 %v4409_v45, %v6846_v24  ;;  %v4509_v45 = vld [vmem:[#allocation2 + $0x198] sm:$0xff] }
 0x485   :  { %v3407_v19 = vpop.f32.mrf.mxu0 }
 0x486   :  { %v3575_v15 = vadd.f32 %v4497_v43, %v3413_v53  ;;  %v3408_v60 = vadd.f32 %v6846_v24, %v3407_v19 }
 0x488   :  { %v3639_v54 = vmax.f32 %v3575_v15, 0.0  ;;  %v3574_v62 = vadd.f32 %v4498_v46, %v3408_v60  ;;  %v4510_v15 = vld [vmem:[#allocation2 + $0x190] sm:$0xff] }
 0x48a   :  { %3703 = vst.msk [vmem:[#allocation5 + $0x138] sm:$0xff] %vm114_vm0, %v3639_v54  ;;  %v3638_v48 = vmax.f32 %v3574_v62, 0.0 }
 0x48b   :  { %v4412_v30 = vpop.f32.mrf.mxu0 }
 0x48c   :  { %3702 = vst.msk [vmem:[#allocation5 + $0x130] sm:$0xff] %vm114_vm0, %v3638_v48  ;;  %v3423_v25 = vadd.f32 %v4412_v30, %v6846_v24  ;;  %v4511_v30 = vld [vmem:[#allocation2 + $0x1a8] sm:$0xff] }
 0x48d   :  { %v3417_v3 = vpop.f32.mrf.mxu0 }
 0x48e   :  { %v3577_v33 = vadd.f32 %v4499_v1, %v3423_v25  ;;  %v3418_v34 = vadd.f32 %v6846_v24, %v3417_v3 }
 0x490   :  { %v3641_v14 = vmax.f32 %v3577_v33, 0.0  ;;  %v3576_v36 = vadd.f32 %v4500_v49, %v3418_v34  ;;  %v4512_v33 = vld [vmem:[#allocation2 + $0x1a0] sm:$0xff] }
 0x492   :  { %3705 = vst.msk [vmem:[#allocation5 + $0x148] sm:$0xff] %vm114_vm0, %v3641_v14  ;;  %v3640_v20 = vmax.f32 %v3576_v36, 0.0 }
 0x493   :  { %v4415_v18 = vpop.f32.mrf.mxu0 }
 0x494   :  { %3704 = vst.msk [vmem:[#allocation5 + $0x140] sm:$0xff] %vm114_vm0, %v3640_v20  ;;  %v3433_v44 = vadd.f32 %v4415_v18, %v6846_v24  ;;  %v4513_v18 = vld [vmem:[#allocation2 + $0x1b8] sm:$0xff] }
 0x495   :  { %v3427_v12 = vpop.f32.mrf.mxu0 }
 0x496   :  { %v3579_v11 = vadd.f32 %v4501_v28, %v3433_v44  ;;  %v3428_v21 = vadd.f32 %v6846_v24, %v3427_v12 }
 0x498   :  { %v3643_v26 = vmax.f32 %v3579_v11, 0.0  ;;  %v3578_v8 = vadd.f32 %v4502_v52, %v3428_v21  ;;  %v4514_v11 = vld [vmem:[#allocation2 + $0x1b0] sm:$0xff] }
 0x49a   :  { %3707 = vst.msk [vmem:[#allocation5 + $0x158] sm:$0xff] %vm114_vm0, %v3643_v26  ;;  %v3642_v58 = vmax.f32 %v3578_v8, 0.0 }
 0x49b   :  { %v4418_v22 = vpop.f32.mrf.mxu0 }
 0x49c   :  { %3706 = vst.msk [vmem:[#allocation5 + $0x150] sm:$0xff] %vm114_vm0, %v3642_v58  ;;  %v3443_v63 = vadd.f32 %v4418_v22, %v6846_v24  ;;  %v4515_v22 = vld [vmem:[#allocation2 + $0x1c8] sm:$0xff] }
 0x49d   :  { %v3437_v10 = vpop.f32.mrf.mxu0 }
 0x49e   :  { %v3581_v9 = vadd.f32 %v4503_v39, %v3443_v63  ;;  %v3438_v41 = vadd.f32 %v6846_v24, %v3437_v10 }
 0x4a0   :  { %v3645_v32 = vmax.f32 %v3581_v9, 0.0  ;;  %v3580_v31 = vadd.f32 %v4504_v51, %v3438_v41  ;;  %v4516_v9 = vld [vmem:[#allocation2 + $0x1c0] sm:$0xff] }
 0x4a2   :  { %3709 = vst.msk [vmem:[#allocation5 + $0x168] sm:$0xff] %vm114_vm0, %v3645_v32  ;;  %v3644_v0 = vmax.f32 %v3580_v31, 0.0 }
 0x4a3   :  { %v4421_v6 = vpop.f32.mrf.mxu0 }
 0x4a4   :  { %3708 = vst.msk [vmem:[#allocation5 + $0x160] sm:$0xff] %vm114_vm0, %v3644_v0  ;;  %v3453_v27 = vadd.f32 %v4421_v6, %v6846_v24  ;;  %v4517_v6 = vld [vmem:[#allocation2 + $0x1d8] sm:$0xff] }
 0x4a5   :  { %v3447_v57 = vpop.f32.mrf.mxu0 }
 0x4a6   :  { %v3583_v40 = vadd.f32 %v4505_v38, %v3453_v27  ;;  %v3448_v50 = vadd.f32 %v6846_v24, %v3447_v57 }
 0x4a8   :  { %v3647_v29 = vmax.f32 %v3583_v40, 0.0  ;;  %v3582_v42 = vadd.f32 %v4506_v56, %v3448_v50  ;;  %v4518_v40 = vld [vmem:[#allocation2 + $0x1d0] sm:$0xff] }
 0x4aa   :  { %3711 = vst.msk [vmem:[#allocation5 + $0x178] sm:$0xff] %vm114_vm0, %v3647_v29  ;;  %v3646_v35 = vmax.f32 %v3582_v42, 0.0 }
 0x4ab   :  { %v4424_v2 = vpop.f32.mrf.mxu0 }
 0x4ac   :  { %3710 = vst.msk [vmem:[#allocation5 + $0x170] sm:$0xff] %vm114_vm0, %v3646_v35  ;;  %v3463_v47 = vadd.f32 %v4424_v2, %v6846_v24  ;;  %v4519_v2 = vld [vmem:[#allocation2 + $0x1e8] sm:$0xff] }
 0x4ad   :  { %v3457_v16 = vpop.f32.mrf.mxu0 }
 0x4ae   :  { %v3585_v55 = vadd.f32 %v4507_v4, %v3463_v47  ;;  %v3458_v37 = vadd.f32 %v6846_v24, %v3457_v16 }
 0x4b0   :  { %v3649_v7 = vmax.f32 %v3585_v55, 0.0  ;;  %v3584_v61 = vadd.f32 %v4508_v23, %v3458_v37  ;;  %v4520_v55 = vld [vmem:[#allocation2 + $0x1e0] sm:$0xff] }
 0x4b2   :  { %3713 = vst.msk [vmem:[#allocation5 + $0x188] sm:$0xff] %vm114_vm0, %v3649_v7  ;;  %v3648_v17 = vmax.f32 %v3584_v61, 0.0 }
 0x4b3   :  { %v4427_v13 = vpop.f32.mrf.mxu0 }
 0x4b4   :  { %3712 = vst.msk [vmem:[#allocation5 + $0x180] sm:$0xff] %vm114_vm0, %v3648_v17  ;;  %v3473_v5 = vadd.f32 %v4427_v13, %v6846_v24  ;;  %v4521_v13 = vld [vmem:[#allocation2 + $0x1f8] sm:$0xff] }
 0x4b5   :  { %v3467_v59 = vpop.f32.mrf.mxu0 }
 0x4b6   :  { %v3587_v53 = vadd.f32 %v4509_v45, %v3473_v5  ;;  %v3468_v19 = vadd.f32 %v6846_v24, %v3467_v59 }
 0x4b8   :  { %v3651_v43 = vmax.f32 %v3587_v53, 0.0  ;;  %v3586_v60 = vadd.f32 %v4510_v15, %v3468_v19  ;;  %v4522_v53 = vld [vmem:[#allocation2 + $0x1f0] sm:$0xff] }
 0x4ba   :  { %3715 = vst.msk [vmem:[#allocation5 + $0x198] sm:$0xff] %vm114_vm0, %v3651_v43  ;;  %v3650_v54 = vmax.f32 %v3586_v60, 0.0 }
 0x4bb   :  { %v4430_v46 = vpop.f32.mrf.mxu0 }
 0x4bc   :  { %3714 = vst.msk [vmem:[#allocation5 + $0x190] sm:$0xff] %vm114_vm0, %v3650_v54  ;;  %v3483_v62 = vadd.f32 %v4430_v46, %v6846_v24 }
 0x4bd   :  { %v3477_v48 = vpop.f32.mrf.mxu0 }
 0x4be   :  { %v3589_v25 = vadd.f32 %v4511_v30, %v3483_v62  ;;  %v3478_v3 = vadd.f32 %v6846_v24, %v3477_v48 }
 0x4c0   :  { %v3653_v1 = vmax.f32 %v3589_v25, 0.0  ;;  %v3588_v34 = vadd.f32 %v4512_v33, %v3478_v3 }
 0x4c2   :  { %3717 = vst.msk [vmem:[#allocation5 + $0x1a8] sm:$0xff] %vm114_vm0, %v3653_v1  ;;  %v3652_v14 = vmax.f32 %v3588_v34, 0.0 }
 0x4c3   :  { %v4433_v49 = vpop.f32.mrf.mxu0 }
 0x4c4   :  { %3716 = vst.msk [vmem:[#allocation5 + $0x1a0] sm:$0xff] %vm114_vm0, %v3652_v14  ;;  %v3493_v36 = vadd.f32 %v4433_v49, %v6846_v24 }
 0x4c5   :  { %v3487_v20 = vpop.f32.mrf.mxu0 }
 0x4c6   :  { %v3591_v44 = vadd.f32 %v4513_v18, %v3493_v36  ;;  %v3488_v12 = vadd.f32 %v6846_v24, %v3487_v20 }
 0x4c8   :  { %v3655_v28 = vmax.f32 %v3591_v44, 0.0  ;;  %v3590_v21 = vadd.f32 %v4514_v11, %v3488_v12 }
 0x4ca   :  { %3719 = vst.msk [vmem:[#allocation5 + $0x1b8] sm:$0xff] %vm114_vm0, %v3655_v28  ;;  %v3654_v26 = vmax.f32 %v3590_v21, 0.0 }
 0x4cb   :  { %v4436_v52 = vpop.f32.mrf.mxu0 }
 0x4cc   :  { %3718 = vst.msk [vmem:[#allocation5 + $0x1b0] sm:$0xff] %vm114_vm0, %v3654_v26  ;;  %v3503_v8 = vadd.f32 %v4436_v52, %v6846_v24 }
 0x4cd   :  { %v3497_v58 = vpop.f32.mrf.mxu0 }
 0x4ce   :  { %v3593_v63 = vadd.f32 %v4515_v22, %v3503_v8  ;;  %v3498_v10 = vadd.f32 %v6846_v24, %v3497_v58 }
 0x4d0   :  { %v3657_v39 = vmax.f32 %v3593_v63, 0.0  ;;  %v3592_v41 = vadd.f32 %v4516_v9, %v3498_v10 }
 0x4d2   :  { %3721 = vst.msk [vmem:[#allocation5 + $0x1c8] sm:$0xff] %vm114_vm0, %v3657_v39  ;;  %v3656_v32 = vmax.f32 %v3592_v41, 0.0 }
 0x4d3   :  { %v4439_v51 = vpop.f32.mrf.mxu0 }
 0x4d4   :  { %3720 = vst.msk [vmem:[#allocation5 + $0x1c0] sm:$0xff] %vm114_vm0, %v3656_v32  ;;  %v3513_v31 = vadd.f32 %v4439_v51, %v6846_v24 }
 0x4d5   :  { %v3507_v0 = vpop.f32.mrf.mxu0 }
 0x4d6   :  { %v3595_v27 = vadd.f32 %v4517_v6, %v3513_v31  ;;  %v3508_v57 = vadd.f32 %v6846_v24, %v3507_v0 }
 0x4d8   :  { %v3659_v38 = vmax.f32 %v3595_v27, 0.0  ;;  %v3594_v50 = vadd.f32 %v4518_v40, %v3508_v57 }
 0x4da   :  { %3723 = vst.msk [vmem:[#allocation5 + $0x1d8] sm:$0xff] %vm114_vm0, %v3659_v38  ;;  %v3658_v29 = vmax.f32 %v3594_v50, 0.0 }
 0x4db   :  { %v4442_v56 = vpop.f32.mrf.mxu0 }
 0x4dc   :  { %3722 = vst.msk [vmem:[#allocation5 + $0x1d0] sm:$0xff] %vm114_vm0, %v3658_v29  ;;  %v3523_v42 = vadd.f32 %v4442_v56, %v6846_v24 }
 0x4dd   :  { %v3517_v35 = vpop.f32.mrf.mxu0 }
 0x4de   :  { %v3597_v47 = vadd.f32 %v4519_v2, %v3523_v42  ;;  %v3518_v16 = vadd.f32 %v6846_v24, %v3517_v35 }
 0x4e0   :  { %v3661_v4 = vmax.f32 %v3597_v47, 0.0  ;;  %v3596_v37 = vadd.f32 %v4520_v55, %v3518_v16  ;;  %v4445_v7 = vpop.f32.mrf.mxu0 }
 0x4e1   :  { %v3533_v23 = vadd.f32 %v4445_v7, %v6846_v24 }
 0x4e2   :  { %3725 = vst.msk [vmem:[#allocation5 + $0x1e8] sm:$0xff] %vm114_vm0, %v3661_v4  ;;  %v3660_v61 = vmax.f32 %v3596_v37, 0.0  ;;  %v3527_v17 = vpop.f32.mrf.mxu0 }
 0x4e3   :  { %v3599_v5 = vadd.f32 %v4521_v13, %v3533_v23  ;;  %v3528_v59 = vadd.f32 %v6846_v24, %v3527_v17 }
 0x4e4   :  { %3724 = vst.msk [vmem:[#allocation5 + $0x1e0] sm:$0xff] %vm114_vm0, %v3660_v61 }
 0x4e5   :  { %v3663_v45 = vmax.f32 %v3599_v5, 0.0  ;;  %v3598_v19 = vadd.f32 %v4522_v53, %v3528_v59 }
 0x4e7   :  { %3727 = vst.msk [vmem:[#allocation5 + $0x1f8] sm:$0xff] %vm114_vm0, %v3663_v45  ;;  %v3662_v43 = vmax.f32 %v3598_v19, 0.0 }
 0x4e9   :  { %3726 = vst.msk [vmem:[#allocation5 + $0x1f0] sm:$0xff] %vm114_vm0, %v3662_v43 }
 0x4ea   :  { %4554 = shalt.err (!%p4551_p9)
}
 0x4eb   :  { %3739 = dma.vmem_to_hbm [thread:$0]  %s3734_s8, 8192, %s6995_s7, [#allocation4], %s4568_s27, %s4568_s27, %s4569_s28  }
 0x4ec   :  { %4565 = dma.done.wait [#allocation4], 8192  }
 0x4ed   :  { %4566 = vsyncadd [#allocation4], 4294959104 }
 0x4ee   :  { %3743 = vsyncpa [#allocation3], 1 }
 0x4ef   :  { %3744 = vsyncpa [#allocation4], 1 }

</bundles_post_ra>
